<compile_context>
chip_gen: v7x
topology: tpu7x:2x2x1
jax: 0.10.0
libtpu: 0.0.40
codegen_flags: <defaults>
</compile_context>

<pallas_src>
import functools
import math

import jax
import jax.numpy as jnp
from jax import lax
from jax.experimental import pallas as pl
from jax.experimental.pallas import tpu as pltpu

MATMUL_DTYPE = jnp.bfloat16   # MXU operand dtype (accumulation stays f32)
WEIGHT_DTYPE = jnp.bfloat16   # HBM storage of matmul weights
ACT_DTYPE = jnp.bfloat16      # layer-to-layer activation storage
ATTN_W_DTYPE = jnp.float32    # returned attention weights (bf16 halves the
                              # HBM write if bit-level row sums are not needed)
LN_EPS = 1e-5
NEG_INF = -1e9


def _mm(a, b):
    """MXU matmul: bf16 operands, f32 accumulation."""
    return jnp.dot(a.astype(MATMUL_DTYPE), b.astype(MATMUL_DTYPE),
                   preferred_element_type=jnp.float32)


def _mm_t(a, b):
    """a @ b.T without an explicit transpose (contract dim 1 of both)."""
    return lax.dot_general(a.astype(MATMUL_DTYPE), b.astype(MATMUL_DTYPE),
                           dimension_numbers=(((1,), (1,)), ((), ())),
                           preferred_element_type=jnp.float32)


def _shift_down(x, s):
    """Causal shift: result[t] = x[t - s], zeros for t < s (s is static)."""
    if s == 0:
        return x
    L = x.shape[0]
    pad = jnp.zeros((s,) + x.shape[1:], x.dtype)
    return jnp.concatenate([pad, x[:L - s]], axis=0)


def _layer_norm(h, g, b):
    mu = jnp.mean(h, axis=-1, keepdims=True)
    var = jnp.mean(jnp.square(h - mu), axis=-1, keepdims=True)
    return (h - mu) * lax.rsqrt(var + LN_EPS) * g + b


# ----------------------------- Pallas kernel -------------------------------

def _block_kernel(*refs, q_len, scale, fuse_embed, fuse_outproj):
    """One transformer block; grid = (batch, head)."""
    it = iter(refs)
    if fuse_embed:
        enc_ref, proj_w_ref, proj_b_ref, pe_ref = (next(it) for _ in range(4))
    else:
        x_ref = next(it)
    (q_w_ref, q_b_ref, k_w_ref, k_b_ref, v_w_ref, v_b_ref,
     cp_w_ref, cp_b_ref, l1_w_ref, l1_b_ref, l2_w_ref, l2_b_ref,
     ln1_g_ref, ln1_b_ref, ln2_g_ref, ln2_b_ref) = (next(it) for _ in range(16))
    if fuse_outproj:
        out_w_ref, out_b_ref = next(it), next(it)
    y_ref, aw_ref = next(it), next(it)
    x_scr, acc_scr = next(it), next(it)

    h_id = pl.program_id(1)
    n_heads = pl.num_programs(1)

    # h == 0: materialize x (fused embedding for the first layer) and init the
    # attention-output accumulator with the residual + c_proj bias.
    @pl.when(h_id == 0)
    def _():
        if fuse_embed:
            x0 = _mm(enc_ref[...], proj_w_ref[...]) + proj_b_ref[...] + pe_ref[...]
        else:
            x0 = x_ref[...].astype(jnp.float32)
        x_scr[...] = x0
        acc_scr[...] = x0 + cp_b_ref[...]

    x = x_scr[...]                                    # (L, D) f32
    L, D = x.shape

    # Causal Conv1d (query / key) for this head: per-tap shifted matmuls.
    # Tap k of the conv reads x[t - (q_len - 1) + k].
    q = jnp.zeros((L, D), jnp.float32)
    k = jnp.zeros((L, D), jnp.float32)
    for t in range(q_len):
        xs = _shift_down(x, q_len - 1 - t)
        q = q + _mm(xs, q_w_ref[t])
        k = k + _mm(xs, k_w_ref[t])
    q = q + q_b_ref[...]
    k = k + k_b_ref[...]
    v = _mm(x, v_w_ref[...]) + v_b_ref[...]

    # Scaled, causally-masked softmax attention (mask built in-kernel).
    # TODO(synk): args['sparse']=True log-sparse mask would need a precomputed
    # mask input; only the default dense causal path is implemented.
    s = _mm_t(q, k)                                   # (L, L), f32
    if scale:
        s = s * (1.0 / math.sqrt(D))
    row = lax.broadcasted_iota(jnp.int32, (L, L), 0)
    col = lax.broadcasted_iota(jnp.int32, (L, L), 1)
    s = jnp.where(row >= col, s, NEG_INF)
    s = s - jnp.max(s, axis=-1, keepdims=True)
    e = jnp.exp(s)
    p = e / jnp.sum(e, axis=-1, keepdims=True)        # exact softmax
    aw_ref[...] = p.astype(aw_ref.dtype)

    # Per-head context folded straight through this head's c_proj slice:
    # acc += (p @ v_h) @ cproj_w[h]  (no (L, H*D) concat intermediate).
    acc_scr[...] = acc_scr[...] + _mm(_mm(p, v), cp_w_ref[...])

    # h == H-1: LayerNorm1 + FFN + LayerNorm2 (+ fused output projection).
    @pl.when(h_id == n_heads - 1)
    def _():
        y1 = _layer_norm(acc_scr[...], ln1_g_ref[...], ln1_b_ref[...])
        f = jnp.maximum(_mm(y1, l1_w_ref[...]) + l1_b_ref[...], 0.0)
        f = _mm(f, l2_w_ref[...]) + l2_b_ref[...]
        y = _layer_norm(y1 + f, ln2_g_ref[...], ln2_b_ref[...])
        if fuse_outproj:
            # TODO(synk): d_output=1 gives a lane-sparse (L, 1) store; pad
            # d_output toward the 128-lane width in the wrapper for big models.
            y = _mm(y, out_w_ref[...]) + out_b_ref[...]
        y_ref[...] = y.astype(y_ref.dtype)


# ------------------------------- wrappers ----------------------------------

def sinusoidal_pe(L, d):
    pos = jnp.arange(L, dtype=jnp.float32)[:, None]
    div = jnp.exp(jnp.arange(0, d, 2, dtype=jnp.float32) *
                  (-math.log(10000.0) / d))
    pe = jnp.zeros((L, d), jnp.float32)
    pe = pe.at[:, 0::2].set(jnp.sin(pos * div))
    pe = pe.at[:, 1::2].set(jnp.cos(pos * div))
    return pe


def _vmem_limit_bytes(L, D, F, d_in, d_out, q_len):
    """Rough double-buffered per-step footprint with headroom, clamped so the
    value is valid on v5e/v6e (<=128 MiB physical) and v7x (<=64 MiB)."""
    bf, f4 = 2, 4
    per_head_w = (2 * q_len * D * D + 2 * D * D) * bf + 3 * D * f4
    shared_w = (d_in * D + D * F + F * D + D * d_out) * bf + (8 * D + F + d_out) * f4
    acts = L * max(D, d_in) * f4 + L * D * bf + L * max(d_out, D) * f4
    aw = L * L * f4
    scratch = 2 * L * D * f4
    est = 2 * (per_head_w + shared_w + acts + aw) + scratch
    return int(min(64 << 20, max(32 << 20, 2 * est)))


def _block_call(x, bp, *, pe, proj_w, proj_b, out_w, out_b,
                n_head, q_len, scale, first, last):
    B = x.shape[0]
    L, D = pe.shape
    H = n_head
    F = bp["lin1_w"].shape[1]
    d_out = out_w.shape[1]

    batch3 = lambda b, h: (b, 0, 0)
    head3 = lambda b, h: (h, 0, 0)
    head4 = lambda b, h: (h, 0, 0, 0)
    const2 = lambda b, h: (0, 0)

    inputs, in_specs = [], []
    if first:
        d_in = x.shape[-1]
        inputs += [x, proj_w, proj_b, pe]
        in_specs += [pl.BlockSpec((None, L, d_in), batch3),
                     pl.BlockSpec((d_in, D), const2),
                     pl.BlockSpec((1, D), const2),
                     pl.BlockSpec((L, D), const2)]
    else:
        inputs += [x]
        in_specs += [pl.BlockSpec((None, L, D), batch3)]

    inputs += [bp["q_w"], bp["q_b"], bp["k_w"], bp["k_b"],
               bp["v_w"], bp["v_b"], bp["cproj_w"], bp["cproj_b"],
               bp["lin1_w"], bp["lin1_b"], bp["lin2_w"], bp["lin2_b"],
               bp["ln1_g"], bp["ln1_b"], bp["ln2_g"], bp["ln2_b"]]
    in_specs += [
        pl.BlockSpec((None, q_len, D, D), head4),   # q_w  (H, q_len, D, D)
        pl.BlockSpec((None, 1, D), head3),          # q_b  (H, 1, D)
        pl.BlockSpec((None, q_len, D, D), head4),   # k_w
        pl.BlockSpec((None, 1, D), head3),          # k_b
        pl.BlockSpec((None, D, D), head3),          # v_w  (H, D, D)
        pl.BlockSpec((None, 1, D), head3),          # v_b
        pl.BlockSpec((None, D, D), head3),          # cproj_w (H, D, D)
        pl.BlockSpec((1, D), const2),               # cproj_b
        pl.BlockSpec((D, F), const2),               # lin1_w
        pl.BlockSpec((1, F), const2),               # lin1_b
        pl.BlockSpec((F, D), const2),               # lin2_w
        pl.BlockSpec((1, D), const2),               # lin2_b
        pl.BlockSpec((1, D), const2),               # ln1_g
        pl.BlockSpec((1, D), const2),               # ln1_b
        pl.BlockSpec((1, D), const2),               # ln2_g
        pl.BlockSpec((1, D), const2),               # ln2_b
    ]
    if last:
        inputs += [out_w, out_b]
        in_specs += [pl.BlockSpec((D, d_out), const2),
                     pl.BlockSpec((1, d_out), const2)]

    out_dim = d_out if last else D
    out_dtype = jnp.float32 if last else ACT_DTYPE
    out_shape = (jax.ShapeDtypeStruct((B, L, out_dim), out_dtype),
                 jax.ShapeDtypeStruct((B, H, L, L), ATTN_W_DTYPE))
    out_specs = (pl.BlockSpec((None, L, out_dim), batch3),
                 pl.BlockSpec((None, None, L, L), lambda b, h: (b, h, 0, 0)))

    # TODO(synk): for B == 1 on v7x add a second "parallel" grid axis over L
    # (flash-style online softmax) so both TensorCores have work.
    y, aw = pl.pallas_call(
        functools.partial(_block_kernel, q_len=q_len, scale=scale,
                          fuse_embed=first, fuse_outproj=last),
        grid=(B, H),
        in_specs=in_specs,
        out_specs=out_specs,
        out_shape=out_shape,
        scratch_shapes=[pltpu.VMEM((L, D), jnp.float32),    # x (this batch)
                        pltpu.VMEM((L, D), jnp.float32)],   # attn-out accum
        compiler_params=pltpu.CompilerParams(
            dimension_semantics=("parallel", "arbitrary"),
            vmem_limit_bytes=_vmem_limit_bytes(
                L, D, F, x.shape[-1], d_out, q_len)),
    )(*inputs)
    return y, aw


def make_forward(*, n_head, q_len, scale=True):
    @jax.jit
    def forward(params, enc):
        B, L, _ = enc.shape
        D = params["proj_w"].shape[1]
        pe = sinusoidal_pe(L, D)             # constant-folded inside jit
        n_layer = len(params["blocks"])
        x = enc
        aws = []
        for li, bp in enumerate(params["blocks"]):
            x, aw = _block_call(
                x, bp, pe=pe,
                proj_w=params["proj_w"], proj_b=params["proj_b"],
                out_w=params["out_w"], out_b=params["out_b"],
                n_head=n_head, q_len=q_len, scale=scale,
                first=(li == 0), last=(li == n_layer - 1))
            aws.append(aw)
        # No jnp.stack of the attention weights (extra HBM round trip of the
        # largest tensor); callers can stack the tuple themselves if needed.
        # TODO(synk): LossHelper.get_output_activation not provided in the
        # reference; identity output activation used.
        return x, tuple(aws)
    return forward


# ----------------------------- parameter init ------------------------------

def _xavier(key, shape):
    fan_in, fan_out = shape[-2], shape[-1]
    limit = math.sqrt(6.0 / (fan_in + fan_out))
    return jax.random.uniform(key, shape, jnp.float32, -limit, limit)


def init_params(key, *, d_input, d_model, n_head, n_layer, d_hidden, d_output,
                q_len):
    D, H, F = d_model, n_head, d_hidden
    keys = iter(jax.random.split(key, 2 + 6 * n_layer))
    wd = WEIGHT_DTYPE
    params = {
        "proj_w": _xavier(next(keys), (d_input, D)).astype(wd),
        "proj_b": jnp.zeros((1, D), jnp.float32),
        "out_w": _xavier(next(keys), (D, d_output)).astype(wd),
        "out_b": jnp.zeros((1, d_output), jnp.float32),
        "blocks": [],
    }
    for _ in range(n_layer):
        blk = {
            # Head-major causal-conv weights: q_w[h, k] maps x[t-(q_len-1)+k]
            # into head h's query (PyTorch Conv1d weight (2*H*D, D, q_len)
            # maps as q_w[h, k] = W[h*D:(h+1)*D, :, k].T; k_w from the second
            # half of the output channels).
            "q_w": _xavier(next(keys), (H, q_len, D, D)).astype(wd),
            "q_b": jnp.zeros((H, 1, D), jnp.float32),
            "k_w": _xavier(next(keys), (H, q_len, D, D)).astype(wd),
            "k_b": jnp.zeros((H, 1, D), jnp.float32),
            "v_w": _xavier(next(keys), (H, D, D)).astype(wd),
            "v_b": jnp.zeros((H, 1, D), jnp.float32),
            "cproj_w": _xavier(next(keys), (H, D, D)).astype(wd),
            "cproj_b": jnp.zeros((1, D), jnp.float32),
            "lin1_w": _xavier(next(keys), (D, F)).astype(wd),
            "lin1_b": jnp.zeros((1, F), jnp.float32),
            "lin2_w": _xavier(next(keys), (F, D)).astype(wd),
            "lin2_b": jnp.zeros((1, D), jnp.float32),
            "ln1_g": jnp.ones((1, D), jnp.float32),
            "ln1_b": jnp.zeros((1, D), jnp.float32),
            "ln2_g": jnp.ones((1, D), jnp.float32),
            "ln2_b": jnp.zeros((1, D), jnp.float32),
        }
        params["blocks"].append(blk)
    return params


# --------------------------------- main -------------------------------------

if __name__ == "__main__":
    B, L = 2, 8                      # batch, win_len (sequence length)
    d_input, d_model = 4, 32
    n_head, n_layer = 2, 2
    d_hidden, d_output = 64, 1
    q_len = 3

    key = jax.random.PRNGKey(0)
    kparam, kdata = jax.random.split(key)
    params = init_params(kparam, d_input=d_input, d_model=d_model,
                         n_head=n_head, n_layer=n_layer, d_hidden=d_hidden,
                         d_output=d_output, q_len=q_len)
    enc = jax.random.normal(kdata, (B, L, d_input), jnp.float32)

    forward = make_forward(n_head=n_head, q_len=q_len, scale=True)
    out, attn_ws = forward(params, enc)
    jax.block_until_ready((out, attn_ws))

    assert out.shape == (B, L, d_output), out.shape
    assert len(attn_ws) == n_layer
    assert bool(jnp.all(jnp.isfinite(out)))
    future = jnp.triu(jnp.ones((L, L), jnp.float32), k=1) > 0
    for aw in attn_ws:
        assert aw.shape == (B, n_head, L, L), aw.shape
        assert bool(jnp.all(jnp.isfinite(aw)))
        # exact softmax: rows sum to ~1
        assert bool(jnp.all(jnp.abs(jnp.sum(aw, axis=-1) - 1.0) < 1e-3))
        # causal: no attention to the future
        assert bool(jnp.all(jnp.where(future, aw, 0.0) < 1e-6))
    print("KERNEL_OK")
</pallas_src>

<mosaic_0001>
module attributes {stable_mosaic.version = 11 : i64} {
  func.func @_block_kernel(%arg0: i32, %arg1: i32, %arg2: memref<1x8x4xf32, #tpu.memory_space<vmem>>, %arg3: memref<4x32xbf16, #tpu.memory_space<vmem>>, %arg4: memref<1x32xf32, #tpu.memory_space<vmem>>, %arg5: memref<8x32xf32, #tpu.memory_space<vmem>>, %arg6: memref<1x3x32x32xbf16, #tpu.memory_space<vmem>>, %arg7: memref<1x1x32xf32, #tpu.memory_space<vmem>>, %arg8: memref<1x3x32x32xbf16, #tpu.memory_space<vmem>>, %arg9: memref<1x1x32xf32, #tpu.memory_space<vmem>>, %arg10: memref<1x32x32xbf16, #tpu.memory_space<vmem>>, %arg11: memref<1x1x32xf32, #tpu.memory_space<vmem>>, %arg12: memref<1x32x32xbf16, #tpu.memory_space<vmem>>, %arg13: memref<1x32xf32, #tpu.memory_space<vmem>>, %arg14: memref<32x64xbf16, #tpu.memory_space<vmem>>, %arg15: memref<1x64xf32, #tpu.memory_space<vmem>>, %arg16: memref<64x32xbf16, #tpu.memory_space<vmem>>, %arg17: memref<1x32xf32, #tpu.memory_space<vmem>>, %arg18: memref<1x32xf32, #tpu.memory_space<vmem>>, %arg19: memref<1x32xf32, #tpu.memory_space<vmem>>, %arg20: memref<1x32xf32, #tpu.memory_space<vmem>>, %arg21: memref<1x32xf32, #tpu.memory_space<vmem>>, %arg22: memref<1x8x32xbf16, #tpu.memory_space<vmem>>, %arg23: memref<1x1x8x8xf32, #tpu.memory_space<vmem>>, %arg24: memref<8x32xf32, #tpu.memory_space<vmem>>, %arg25: memref<8x32xf32, #tpu.memory_space<vmem>>) attributes {dimension_semantics = [#tpu.dimension_semantics<parallel>, #tpu.dimension_semantics<arbitrary>], iteration_bounds = array<i64: 2, 2>, scalar_prefetch = 0 : i64, scratch_operands = 2 : i64, tpu.core_type = #tpu.core_type<tc>, window_params = [{transform_indices = @transform_0, window_bounds = array<i64: 1, 8, 4>}, {pipeline_mode = #tpu.pipeline_mode<synchronous>, transform_indices = @transform_1, window_bounds = array<i64: 4, 32>}, {pipeline_mode = #tpu.pipeline_mode<synchronous>, transform_indices = @transform_2, window_bounds = array<i64: 1, 32>}, {pipeline_mode = #tpu.pipeline_mode<synchronous>, transform_indices = @transform_3, window_bounds = array<i64: 8, 32>}, {transform_indices = @transform_4, window_bounds = array<i64: 1, 3, 32, 32>}, {transform_indices = @transform_5, window_bounds = array<i64: 1, 1, 32>}, {transform_indices = @transform_6, window_bounds = array<i64: 1, 3, 32, 32>}, {transform_indices = @transform_7, window_bounds = array<i64: 1, 1, 32>}, {transform_indices = @transform_8, window_bounds = array<i64: 1, 32, 32>}, {transform_indices = @transform_9, window_bounds = array<i64: 1, 1, 32>}, {transform_indices = @transform_10, window_bounds = array<i64: 1, 32, 32>}, {pipeline_mode = #tpu.pipeline_mode<synchronous>, transform_indices = @transform_11, window_bounds = array<i64: 1, 32>}, {pipeline_mode = #tpu.pipeline_mode<synchronous>, transform_indices = @transform_12, window_bounds = array<i64: 32, 64>}, {pipeline_mode = #tpu.pipeline_mode<synchronous>, transform_indices = @transform_13, window_bounds = array<i64: 1, 64>}, {pipeline_mode = #tpu.pipeline_mode<synchronous>, transform_indices = @transform_14, window_bounds = array<i64: 64, 32>}, {pipeline_mode = #tpu.pipeline_mode<synchronous>, transform_indices = @transform_15, window_bounds = array<i64: 1, 32>}, {pipeline_mode = #tpu.pipeline_mode<synchronous>, transform_indices = @transform_16, window_bounds = array<i64: 1, 32>}, {pipeline_mode = #tpu.pipeline_mode<synchronous>, transform_indices = @transform_17, window_bounds = array<i64: 1, 32>}, {pipeline_mode = #tpu.pipeline_mode<synchronous>, transform_indices = @transform_18, window_bounds = array<i64: 1, 32>}, {pipeline_mode = #tpu.pipeline_mode<synchronous>, transform_indices = @transform_19, window_bounds = array<i64: 1, 32>}, {transform_indices = @transform_20, window_bounds = array<i64: 1, 8, 32>}, {transform_indices = @transform_21, window_bounds = array<i64: 1, 1, 8, 8>}]} {
    %c0_i32 = arith.constant 0 : i32
    %0 = arith.cmpi eq, %arg1, %c0_i32 : i32
    %1 = arith.extui %0 : i1 to i32
    %c0_i32_0 = arith.constant 0 : i32
    %2 = arith.cmpi ne, %1, %c0_i32_0 : i32
    scf.if %2 {
      %c0_65 = arith.constant 0 : index
      %c0_66 = arith.constant 0 : index
      %c0_67 = arith.constant 0 : index
      %93 = vector.load %arg2[%c0_65, %c0_66, %c0_67] : memref<1x8x4xf32, #tpu.memory_space<vmem>>, vector<1x8x4xf32>
      %94 = vector.shape_cast %93 : vector<1x8x4xf32> to vector<8x4xf32>
      %c0_68 = arith.constant 0 : index
      %c0_69 = arith.constant 0 : index
      %95 = vector.load %arg3[%c0_68, %c0_69] : memref<4x32xbf16, #tpu.memory_space<vmem>>, vector<4x32xbf16>
      %96 = arith.truncf %94 : vector<8x4xf32> to vector<8x4xbf16>
      %cst_70 = arith.constant dense<0.000000e+00> : vector<8x32xf32>
      %97 = tpu.matmul %96, %95, %cst_70 {dimension_numbers = #tpu.dot_dimension_numbers<[1], [0], [0], [1], [0, 0, 1, 1], [], []>} : vector<8x4xbf16>, vector<4x32xbf16>, vector<8x32xf32> -> vector<8x32xf32>
      %c0_71 = arith.constant 0 : index
      %c0_72 = arith.constant 0 : index
      %98 = vector.load %arg4[%c0_71, %c0_72] : memref<1x32xf32, #tpu.memory_space<vmem>>, vector<1x32xf32>
      %99 = vector.broadcast %98 : vector<1x32xf32> to vector<8x32xf32>
      %100 = arith.addf %97, %99 : vector<8x32xf32>
      %c0_73 = arith.constant 0 : index
      %c0_74 = arith.constant 0 : index
      %101 = vector.load %arg5[%c0_73, %c0_74] : memref<8x32xf32, #tpu.memory_space<vmem>>, vector<8x32xf32>
      %102 = arith.addf %100, %101 : vector<8x32xf32>
      %c0_75 = arith.constant 0 : index
      %c0_76 = arith.constant 0 : index
      %103 = vector.load %arg24[%c0_75, %c0_76] : memref<8x32xf32, #tpu.memory_space<vmem>>, vector<8x32xf32>
      tpu.vector_store %arg24[%c0_75, %c0_76], %102 {strides = array<i32>} : memref<8x32xf32, #tpu.memory_space<vmem>>, vector<8x32xf32>,
      %c0_77 = arith.constant 0 : index
      %c0_78 = arith.constant 0 : index
      %104 = vector.load %arg13[%c0_77, %c0_78] : memref<1x32xf32, #tpu.memory_space<vmem>>, vector<1x32xf32>
      %105 = vector.broadcast %104 : vector<1x32xf32> to vector<8x32xf32>
      %106 = arith.addf %102, %105 : vector<8x32xf32>
      %c0_79 = arith.constant 0 : index
      %c0_80 = arith.constant 0 : index
      %107 = vector.load %arg25[%c0_79, %c0_80] : memref<8x32xf32, #tpu.memory_space<vmem>>, vector<8x32xf32>
      tpu.vector_store %arg25[%c0_79, %c0_80], %106 {strides = array<i32>} : memref<8x32xf32, #tpu.memory_space<vmem>>, vector<8x32xf32>,
    } else {
    }
    %c0 = arith.constant 0 : index
    %c0_1 = arith.constant 0 : index
    %3 = vector.load %arg24[%c0, %c0_1] : memref<8x32xf32, #tpu.memory_space<vmem>>, vector<8x32xf32>
    %cst = arith.constant 0.000000e+00 : f32
    %4 = vector.broadcast %cst : f32 to vector<8x32xf32>
    %cst_2 = arith.constant 0.000000e+00 : f32
    %5 = vector.broadcast %cst_2 : f32 to vector<8x32xf32>
    %cst_3 = arith.constant 0.000000e+00 : f32
    %6 = vector.broadcast %cst_3 : f32 to vector<2x32xf32>
    %7 = vector.extract_strided_slice %3 {offsets = [0, 0], sizes = [6, 32], strides = [1, 1]} : vector<8x32xf32> to vector<6x32xf32>
    %8 = tpu.concatenate %6, %7 in 0 : vector<2x32xf32>, vector<6x32xf32> -> vector<8x32xf32>
    %c0_4 = arith.constant 0 : index
    %c0_5 = arith.constant 0 : index
    %c0_6 = arith.constant 0 : index
    %c0_7 = arith.constant 0 : index
    %9 = vector.load %arg6[%c0_4, %c0_5, %c0_6, %c0_7] : memref<1x3x32x32xbf16, #tpu.memory_space<vmem>>, vector<1x1x32x32xbf16>
    %10 = vector.shape_cast %9 : vector<1x1x32x32xbf16> to vector<32x32xbf16>
    %11 = arith.truncf %8 : vector<8x32xf32> to vector<8x32xbf16>
    %cst_8 = arith.constant dense<0.000000e+00> : vector<8x32xf32>
    %12 = tpu.matmul %11, %10, %cst_8 {dimension_numbers = #tpu.dot_dimension_numbers<[1], [0], [0], [1], [0, 0, 1, 1], [], []>} : vector<8x32xbf16>, vector<32x32xbf16>, vector<8x32xf32> -> vector<8x32xf32>
    %13 = arith.addf %4, %12 : vector<8x32xf32>
    %c0_9 = arith.constant 0 : index
    %c0_10 = arith.constant 0 : index
    %c0_11 = arith.constant 0 : index
    %c0_12 = arith.constant 0 : index
    %14 = vector.load %arg8[%c0_9, %c0_10, %c0_11, %c0_12] : memref<1x3x32x32xbf16, #tpu.memory_space<vmem>>, vector<1x1x32x32xbf16>
    %15 = vector.shape_cast %14 : vector<1x1x32x32xbf16> to vector<32x32xbf16>
    %16 = arith.truncf %8 : vector<8x32xf32> to vector<8x32xbf16>
    %cst_13 = arith.constant dense<0.000000e+00> : vector<8x32xf32>
    %17 = tpu.matmul %16, %15, %cst_13 {dimension_numbers = #tpu.dot_dimension_numbers<[1], [0], [0], [1], [0, 0, 1, 1], [], []>} : vector<8x32xbf16>, vector<32x32xbf16>, vector<8x32xf32> -> vector<8x32xf32>
    %18 = arith.addf %5, %17 : vector<8x32xf32>
    %cst_14 = arith.constant 0.000000e+00 : f32
    %19 = vector.broadcast %cst_14 : f32 to vector<1x32xf32>
    %20 = vector.extract_strided_slice %3 {offsets = [0, 0], sizes = [7, 32], strides = [1, 1]} : vector<8x32xf32> to vector<7x32xf32>
    %21 = tpu.concatenate %19, %20 in 0 : vector<1x32xf32>, vector<7x32xf32> -> vector<8x32xf32>
    %c0_15 = arith.constant 0 : index
    %c1 = arith.constant 1 : index
    %c0_16 = arith.constant 0 : index
    %c0_17 = arith.constant 0 : index
    %22 = vector.load %arg6[%c0_15, %c1, %c0_16, %c0_17] : memref<1x3x32x32xbf16, #tpu.memory_space<vmem>>, vector<1x1x32x32xbf16>
    %23 = vector.shape_cast %22 : vector<1x1x32x32xbf16> to vector<32x32xbf16>
    %24 = arith.truncf %21 : vector<8x32xf32> to vector<8x32xbf16>
    %cst_18 = arith.constant dense<0.000000e+00> : vector<8x32xf32>
    %25 = tpu.matmul %24, %23, %cst_18 {dimension_numbers = #tpu.dot_dimension_numbers<[1], [0], [0], [1], [0, 0, 1, 1], [], []>} : vector<8x32xbf16>, vector<32x32xbf16>, vector<8x32xf32> -> vector<8x32xf32>
    %26 = arith.addf %13, %25 : vector<8x32xf32>
    %c0_19 = arith.constant 0 : index
    %c1_20 = arith.constant 1 : index
    %c0_21 = arith.constant 0 : index
    %c0_22 = arith.constant 0 : index
    %27 = vector.load %arg8[%c0_19, %c1_20, %c0_21, %c0_22] : memref<1x3x32x32xbf16, #tpu.memory_space<vmem>>, vector<1x1x32x32xbf16>
    %28 = vector.shape_cast %27 : vector<1x1x32x32xbf16> to vector<32x32xbf16>
    %29 = arith.truncf %21 : vector<8x32xf32> to vector<8x32xbf16>
    %cst_23 = arith.constant dense<0.000000e+00> : vector<8x32xf32>
    %30 = tpu.matmul %29, %28, %cst_23 {dimension_numbers = #tpu.dot_dimension_numbers<[1], [0], [0], [1], [0, 0, 1, 1], [], []>} : vector<8x32xbf16>, vector<32x32xbf16>, vector<8x32xf32> -> vector<8x32xf32>
    %31 = arith.addf %18, %30 : vector<8x32xf32>
    %c0_24 = arith.constant 0 : index
    %c2 = arith.constant 2 : index
    %c0_25 = arith.constant 0 : index
    %c0_26 = arith.constant 0 : index
    %32 = vector.load %arg6[%c0_24, %c2, %c0_25, %c0_26] : memref<1x3x32x32xbf16, #tpu.memory_space<vmem>>, vector<1x1x32x32xbf16>
    %33 = vector.shape_cast %32 : vector<1x1x32x32xbf16> to vector<32x32xbf16>
    %34 = arith.truncf %3 : vector<8x32xf32> to vector<8x32xbf16>
    %cst_27 = arith.constant dense<0.000000e+00> : vector<8x32xf32>
    %35 = tpu.matmul %34, %33, %cst_27 {dimension_numbers = #tpu.dot_dimension_numbers<[1], [0], [0], [1], [0, 0, 1, 1], [], []>} : vector<8x32xbf16>, vector<32x32xbf16>, vector<8x32xf32> -> vector<8x32xf32>
    %36 = arith.addf %26, %35 : vector<8x32xf32>
    %c0_28 = arith.constant 0 : index
    %c2_29 = arith.constant 2 : index
    %c0_30 = arith.constant 0 : index
    %c0_31 = arith.constant 0 : index
    %37 = vector.load %arg8[%c0_28, %c2_29, %c0_30, %c0_31] : memref<1x3x32x32xbf16, #tpu.memory_space<vmem>>, vector<1x1x32x32xbf16>
    %38 = vector.shape_cast %37 : vector<1x1x32x32xbf16> to vector<32x32xbf16>
    %39 = arith.truncf %3 : vector<8x32xf32> to vector<8x32xbf16>
    %cst_32 = arith.constant dense<0.000000e+00> : vector<8x32xf32>
    %40 = tpu.matmul %39, %38, %cst_32 {dimension_numbers = #tpu.dot_dimension_numbers<[1], [0], [0], [1], [0, 0, 1, 1], [], []>} : vector<8x32xbf16>, vector<32x32xbf16>, vector<8x32xf32> -> vector<8x32xf32>
    %41 = arith.addf %31, %40 : vector<8x32xf32>
    %c0_33 = arith.constant 0 : index
    %c0_34 = arith.constant 0 : index
    %c0_35 = arith.constant 0 : index
    %42 = vector.load %arg7[%c0_33, %c0_34, %c0_35] : memref<1x1x32xf32, #tpu.memory_space<vmem>>, vector<1x1x32xf32>
    %43 = vector.shape_cast %42 : vector<1x1x32xf32> to vector<1x32xf32>
    %44 = vector.broadcast %43 : vector<1x32xf32> to vector<8x32xf32>
    %45 = arith.addf %36, %44 : vector<8x32xf32>
    %c0_36 = arith.constant 0 : index
    %c0_37 = arith.constant 0 : index
    %c0_38 = arith.constant 0 : index
    %46 = vector.load %arg9[%c0_36, %c0_37, %c0_38] : memref<1x1x32xf32, #tpu.memory_space<vmem>>, vector<1x1x32xf32>
    %47 = vector.shape_cast %46 : vector<1x1x32xf32> to vector<1x32xf32>
    %48 = vector.broadcast %47 : vector<1x32xf32> to vector<8x32xf32>
    %49 = arith.addf %41, %48 : vector<8x32xf32>
    %c0_39 = arith.constant 0 : index
    %c0_40 = arith.constant 0 : index
    %c0_41 = arith.constant 0 : index
    %50 = vector.load %arg10[%c0_39, %c0_40, %c0_41] : memref<1x32x32xbf16, #tpu.memory_space<vmem>>, vector<1x32x32xbf16>
    %51 = vector.shape_cast %50 : vector<1x32x32xbf16> to vector<32x32xbf16>
    %52 = arith.truncf %3 : vector<8x32xf32> to vector<8x32xbf16>
    %cst_42 = arith.constant dense<0.000000e+00> : vector<8x32xf32>
    %53 = tpu.matmul %52, %51, %cst_42 {dimension_numbers = #tpu.dot_dimension_numbers<[1], [0], [0], [1], [0, 0, 1, 1], [], []>} : vector<8x32xbf16>, vector<32x32xbf16>, vector<8x32xf32> -> vector<8x32xf32>
    %c0_43 = arith.constant 0 : index
    %c0_44 = arith.constant 0 : index
    %c0_45 = arith.constant 0 : index
    %54 = vector.load %arg11[%c0_43, %c0_44, %c0_45] : memref<1x1x32xf32, #tpu.memory_space<vmem>>, vector<1x1x32xf32>
    %55 = vector.shape_cast %54 : vector<1x1x32xf32> to vector<1x32xf32>
    %56 = vector.broadcast %55 : vector<1x32xf32> to vector<8x32xf32>
    %57 = arith.addf %53, %56 : vector<8x32xf32>
    %58 = arith.truncf %45 : vector<8x32xf32> to vector<8x32xbf16>
    %59 = arith.truncf %49 : vector<8x32xf32> to vector<8x32xbf16>
    %cst_46 = arith.constant dense<0.000000e+00> : vector<8x8xf32>
    %60 = tpu.matmul %58, %59, %cst_46 {dimension_numbers = #tpu.dot_dimension_numbers<[1], [1], [0], [0], [0, 0, 1, 0], [], []>} : vector<8x32xbf16>, vector<8x32xbf16>, vector<8x8xf32> -> vector<8x8xf32>
    %cst_47 = arith.constant 0.176776692 : f32
    %61 = vector.broadcast %cst_47 : f32 to vector<8x8xf32>
    %62 = arith.mulf %60, %61 : vector<8x8xf32>
    %63 = tpu.iota {dimensions = array<i32: 0>} : vector<8x8xi32>
    %64 = tpu.iota {dimensions = array<i32: 1>} : vector<8x8xi32>
    %65 = arith.cmpi sge, %63, %64 : vector<8x8xi32>
    %cst_48 = arith.constant -1.000000e+09 : f32
    %66 = vector.broadcast %cst_48 : f32 to vector<8x8xf32>
    %67 = arith.select %65, %62, %66 : vector<8x8xi1>, vector<8x8xf32>
    %cst_49 = arith.constant dense<0xFF800000> : vector<8xf32>
    %68 = vector.multi_reduction <maximumf>, %67, %cst_49 [1] : vector<8x8xf32> to vector<8xf32>
    %69 = vector.shape_cast %68 : vector<8xf32> to vector<8x1xf32>
    %70 = vector.broadcast %69 : vector<8x1xf32> to vector<8x8xf32>
    %71 = arith.subf %67, %70 : vector<8x8xf32>
    %72 = math.exp %71 : vector<8x8xf32>
    %cst_50 = arith.constant dense<0.000000e+00> : vector<8xf32>
    %73 = vector.multi_reduction <add>, %72, %cst_50 [1] : vector<8x8xf32> to vector<8xf32>
    %74 = vector.shape_cast %73 : vector<8xf32> to vector<8x1xf32>
    %75 = vector.broadcast %74 : vector<8x1xf32> to vector<8x8xf32>
    %76 = arith.divf %72, %75 : vector<8x8xf32>
    %c0_51 = arith.constant 0 : index
    %c0_52 = arith.constant 0 : index
    %c0_53 = arith.constant 0 : index
    %c0_54 = arith.constant 0 : index
    %77 = vector.load %arg23[%c0_51, %c0_52, %c0_53, %c0_54] : memref<1x1x8x8xf32, #tpu.memory_space<vmem>>, vector<1x1x8x8xf32>
    %78 = vector.shape_cast %77 : vector<1x1x8x8xf32> to vector<8x8xf32>
    %79 = vector.shape_cast %76 : vector<8x8xf32> to vector<1x1x8x8xf32>
    tpu.vector_store %arg23[%c0_51, %c0_52, %c0_53, %c0_54], %79 {strides = array<i32>} : memref<1x1x8x8xf32, #tpu.memory_space<vmem>>, vector<1x1x8x8xf32>,
    %c0_55 = arith.constant 0 : index
    %c0_56 = arith.constant 0 : index
    %80 = vector.load %arg25[%c0_55, %c0_56] : memref<8x32xf32, #tpu.memory_space<vmem>>, vector<8x32xf32>
    %81 = arith.truncf %76 : vector<8x8xf32> to vector<8x8xbf16>
    %82 = arith.truncf %57 : vector<8x32xf32> to vector<8x32xbf16>
    %cst_57 = arith.constant dense<0.000000e+00> : vector<8x32xf32>
    %83 = tpu.matmul %81, %82, %cst_57 {dimension_numbers = #tpu.dot_dimension_numbers<[1], [0], [0], [1], [0, 0, 1, 1], [], []>} : vector<8x8xbf16>, vector<8x32xbf16>, vector<8x32xf32> -> vector<8x32xf32>
    %c0_58 = arith.constant 0 : index
    %c0_59 = arith.constant 0 : index
    %c0_60 = arith.constant 0 : index
    %84 = vector.load %arg12[%c0_58, %c0_59, %c0_60] : memref<1x32x32xbf16, #tpu.memory_space<vmem>>, vector<1x32x32xbf16>
    %85 = vector.shape_cast %84 : vector<1x32x32xbf16> to vector<32x32xbf16>
    %86 = arith.truncf %83 : vector<8x32xf32> to vector<8x32xbf16>
    %cst_61 = arith.constant dense<0.000000e+00> : vector<8x32xf32>
    %87 = tpu.matmul %86, %85, %cst_61 {dimension_numbers = #tpu.dot_dimension_numbers<[1], [0], [0], [1], [0, 0, 1, 1], [], []>} : vector<8x32xbf16>, vector<32x32xbf16>, vector<8x32xf32> -> vector<8x32xf32>
    %88 = arith.addf %80, %87 : vector<8x32xf32>
    %c0_62 = arith.constant 0 : index
    %c0_63 = arith.constant 0 : index
    %89 = vector.load %arg25[%c0_62, %c0_63] : memref<8x32xf32, #tpu.memory_space<vmem>>, vector<8x32xf32>
    tpu.vector_store %arg25[%c0_62, %c0_63], %88 {strides = array<i32>} : memref<8x32xf32, #tpu.memory_space<vmem>>, vector<8x32xf32>,
    %c1_i32 = arith.constant 1 : i32
    %90 = arith.cmpi eq, %arg1, %c1_i32 : i32
    %91 = arith.extui %90 : i1 to i32
    %c0_i32_64 = arith.constant 0 : i32
    %92 = arith.cmpi ne, %91, %c0_i32_64 : i32
    scf.if %92 {
      %c0_65 = arith.constant 0 : index
      %c0_66 = arith.constant 0 : index
      %93 = vector.load %arg25[%c0_65, %c0_66] : memref<8x32xf32, #tpu.memory_space<vmem>>, vector<8x32xf32>
      %c0_67 = arith.constant 0 : index
      %c0_68 = arith.constant 0 : index
      %94 = vector.load %arg18[%c0_67, %c0_68] : memref<1x32xf32, #tpu.memory_space<vmem>>, vector<1x32xf32>
      %c0_69 = arith.constant 0 : index
      %c0_70 = arith.constant 0 : index
      %95 = vector.load %arg19[%c0_69, %c0_70] : memref<1x32xf32, #tpu.memory_space<vmem>>, vector<1x32xf32>
      %cst_71 = arith.constant dense<0.000000e+00> : vector<8xf32>
      %96 = vector.multi_reduction <add>, %93, %cst_71 [1] : vector<8x32xf32> to vector<8xf32>
      %97 = vector.shape_cast %96 : vector<8xf32> to vector<8x1xf32>
      %cst_72 = arith.constant 3.200000e+01 : f32
      %98 = vector.broadcast %cst_72 : f32 to vector<8x1xf32>
      %99 = arith.divf %97, %98 : vector<8x1xf32>
      %100 = vector.broadcast %99 : vector<8x1xf32> to vector<8x32xf32>
      %101 = arith.subf %93, %100 : vector<8x32xf32>
      %102 = arith.mulf %101, %101 : vector<8x32xf32>
      %cst_73 = arith.constant dense<0.000000e+00> : vector<8xf32>
      %103 = vector.multi_reduction <add>, %102, %cst_73 [1] : vector<8x32xf32> to vector<8xf32>
      %104 = vector.shape_cast %103 : vector<8xf32> to vector<8x1xf32>
      %cst_74 = arith.constant 3.200000e+01 : f32
      %105 = vector.broadcast %cst_74 : f32 to vector<8x1xf32>
      %106 = arith.divf %104, %105 : vector<8x1xf32>
      %107 = vector.broadcast %99 : vector<8x1xf32> to vector<8x32xf32>
      %108 = arith.subf %93, %107 : vector<8x32xf32>
      %cst_75 = arith.constant 9.99999974E-6 : f32
      %109 = vector.broadcast %cst_75 : f32 to vector<8x1xf32>
      %110 = arith.addf %106, %109 : vector<8x1xf32>
      %111 = math.rsqrt %110 : vector<8x1xf32>
      %112 = vector.broadcast %111 : vector<8x1xf32> to vector<8x32xf32>
      %113 = arith.mulf %108, %112 : vector<8x32xf32>
      %114 = vector.broadcast %94 : vector<1x32xf32> to vector<8x32xf32>
      %115 = arith.mulf %113, %114 : vector<8x32xf32>
      %116 = vector.broadcast %95 : vector<1x32xf32> to vector<8x32xf32>
      %117 = arith.addf %115, %116 : vector<8x32xf32>
      %c0_76 = arith.constant 0 : index
      %c0_77 = arith.constant 0 : index
      %118 = vector.load %arg14[%c0_76, %c0_77] : memref<32x64xbf16, #tpu.memory_space<vmem>>, vector<32x64xbf16>
      %119 = arith.truncf %117 : vector<8x32xf32> to vector<8x32xbf16>
      %cst_78 = arith.constant dense<0.000000e+00> : vector<8x64xf32>
      %120 = tpu.matmul %119, %118, %cst_78 {dimension_numbers = #tpu.dot_dimension_numbers<[1], [0], [0], [1], [0, 0, 1, 1], [], []>} : vector<8x32xbf16>, vector<32x64xbf16>, vector<8x64xf32> -> vector<8x64xf32>
      %c0_79 = arith.constant 0 : index
      %c0_80 = arith.constant 0 : index
      %121 = vector.load %arg15[%c0_79, %c0_80] : memref<1x64xf32, #tpu.memory_space<vmem>>, vector<1x64xf32>
      %122 = vector.broadcast %121 : vector<1x64xf32> to vector<8x64xf32>
      %123 = arith.addf %120, %122 : vector<8x64xf32>
      %cst_81 = arith.constant 0.000000e+00 : f32
      %124 = vector.broadcast %cst_81 : f32 to vector<8x64xf32>
      %125 = arith.maximumf %123, %124 : vector<8x64xf32>
      %c0_82 = arith.constant 0 : index
      %c0_83 = arith.constant 0 : index
      %126 = vector.load %arg16[%c0_82, %c0_83] : memref<64x32xbf16, #tpu.memory_space<vmem>>, vector<64x32xbf16>
      %127 = arith.truncf %125 : vector<8x64xf32> to vector<8x64xbf16>
      %cst_84 = arith.constant dense<0.000000e+00> : vector<8x32xf32>
      %128 = tpu.matmul %127, %126, %cst_84 {dimension_numbers = #tpu.dot_dimension_numbers<[1], [0], [0], [1], [0, 0, 1, 1], [], []>} : vector<8x64xbf16>, vector<64x32xbf16>, vector<8x32xf32> -> vector<8x32xf32>
      %c0_85 = arith.constant 0 : index
      %c0_86 = arith.constant 0 : index
      %129 = vector.load %arg17[%c0_85, %c0_86] : memref<1x32xf32, #tpu.memory_space<vmem>>, vector<1x32xf32>
      %130 = vector.broadcast %129 : vector<1x32xf32> to vector<8x32xf32>
      %131 = arith.addf %128, %130 : vector<8x32xf32>
      %132 = arith.addf %117, %131 : vector<8x32xf32>
      %c0_87 = arith.constant 0 : index
      %c0_88 = arith.constant 0 : index
      %133 = vector.load %arg20[%c0_87, %c0_88] : memref<1x32xf32, #tpu.memory_space<vmem>>, vector<1x32xf32>
      %c0_89 = arith.constant 0 : index
      %c0_90 = arith.constant 0 : index
      %134 = vector.load %arg21[%c0_89, %c0_90] : memref<1x32xf32, #tpu.memory_space<vmem>>, vector<1x32xf32>
      %cst_91 = arith.constant dense<0.000000e+00> : vector<8xf32>
      %135 = vector.multi_reduction <add>, %132, %cst_91 [1] : vector<8x32xf32> to vector<8xf32>
      %136 = vector.shape_cast %135 : vector<8xf32> to vector<8x1xf32>
      %cst_92 = arith.constant 3.200000e+01 : f32
      %137 = vector.broadcast %cst_92 : f32 to vector<8x1xf32>
      %138 = arith.divf %136, %137 : vector<8x1xf32>
      %139 = vector.broadcast %138 : vector<8x1xf32> to vector<8x32xf32>
      %140 = arith.subf %132, %139 : vector<8x32xf32>
      %141 = arith.mulf %140, %140 : vector<8x32xf32>
      %cst_93 = arith.constant dense<0.000000e+00> : vector<8xf32>
      %142 = vector.multi_reduction <add>, %141, %cst_93 [1] : vector<8x32xf32> to vector<8xf32>
      %143 = vector.shape_cast %142 : vector<8xf32> to vector<8x1xf32>
      %cst_94 = arith.constant 3.200000e+01 : f32
      %144 = vector.broadcast %cst_94 : f32 to vector<8x1xf32>
      %145 = arith.divf %143, %144 : vector<8x1xf32>
      %146 = vector.broadcast %138 : vector<8x1xf32> to vector<8x32xf32>
      %147 = arith.subf %132, %146 : vector<8x32xf32>
      %cst_95 = arith.constant 9.99999974E-6 : f32
      %148 = vector.broadcast %cst_95 : f32 to vector<8x1xf32>
      %149 = arith.addf %145, %148 : vector<8x1xf32>
      %150 = math.rsqrt %149 : vector<8x1xf32>
      %151 = vector.broadcast %150 : vector<8x1xf32> to vector<8x32xf32>
      %152 = arith.mulf %147, %151 : vector<8x32xf32>
      %153 = vector.broadcast %133 : vector<1x32xf32> to vector<8x32xf32>
      %154 = arith.mulf %152, %153 : vector<8x32xf32>
      %155 = vector.broadcast %134 : vector<1x32xf32> to vector<8x32xf32>
      %156 = arith.addf %154, %155 : vector<8x32xf32>
      %157 = arith.truncf %156 : vector<8x32xf32> to vector<8x32xbf16>
      %c0_96 = arith.constant 0 : index
      %c0_97 = arith.constant 0 : index
      %c0_98 = arith.constant 0 : index
      %158 = vector.load %arg22[%c0_96, %c0_97, %c0_98] : memref<1x8x32xbf16, #tpu.memory_space<vmem>>, vector<1x8x32xbf16>
      %159 = vector.shape_cast %158 : vector<1x8x32xbf16> to vector<8x32xbf16>
      %160 = vector.shape_cast %157 : vector<8x32xbf16> to vector<1x8x32xbf16>
      tpu.vector_store %arg22[%c0_96, %c0_97, %c0_98], %160 {strides = array<i32>} : memref<1x8x32xbf16, #tpu.memory_space<vmem>>, vector<1x8x32xbf16>,
    } else {
    }
    return
  }
  func.func @transform_0(%arg0: i32, %arg1: i32) -> (i32, i32, i32) {
    %c0_i32 = arith.constant 0 : i32
    %c0_i32_0 = arith.constant 0 : i32
    %c0_i32_1 = arith.constant 0 : i32
    return %arg0, %c0_i32, %c0_i32_0 : i32, i32, i32
  }
  func.func @transform_1(%arg0: i32, %arg1: i32) -> (i32, i32) {
    %c0_i32 = arith.constant 0 : i32
    %c0_i32_0 = arith.constant 0 : i32
    %c0_i32_1 = arith.constant 0 : i32
    return %c0_i32, %c0_i32_0 : i32, i32
  }
  func.func @transform_2(%arg0: i32, %arg1: i32) -> (i32, i32) {
    %c0_i32 = arith.constant 0 : i32
    %c0_i32_0 = arith.constant 0 : i32
    %c0_i32_1 = arith.constant 0 : i32
    return %c0_i32, %c0_i32_0 : i32, i32
  }
  func.func @transform_3(%arg0: i32, %arg1: i32) -> (i32, i32) {
    %c0_i32 = arith.constant 0 : i32
    %c0_i32_0 = arith.constant 0 : i32
    %c0_i32_1 = arith.constant 0 : i32
    return %c0_i32, %c0_i32_0 : i32, i32
  }
  func.func @transform_4(%arg0: i32, %arg1: i32) -> (i32, i32, i32, i32) {
    %c0_i32 = arith.constant 0 : i32
    %c0_i32_0 = arith.constant 0 : i32
    %c0_i32_1 = arith.constant 0 : i32
    %c0_i32_2 = arith.constant 0 : i32
    return %arg1, %c0_i32, %c0_i32_0, %c0_i32_1 : i32, i32, i32, i32
  }
  func.func @transform_5(%arg0: i32, %arg1: i32) -> (i32, i32, i32) {
    %c0_i32 = arith.constant 0 : i32
    %c0_i32_0 = arith.constant 0 : i32
    %c0_i32_1 = arith.constant 0 : i32
    return %arg1, %c0_i32, %c0_i32_0 : i32, i32, i32
  }
  func.func @transform_6(%arg0: i32, %arg1: i32) -> (i32, i32, i32, i32) {
    %c0_i32 = arith.constant 0 : i32
    %c0_i32_0 = arith.constant 0 : i32
    %c0_i32_1 = arith.constant 0 : i32
    %c0_i32_2 = arith.constant 0 : i32
    return %arg1, %c0_i32, %c0_i32_0, %c0_i32_1 : i32, i32, i32, i32
  }
  func.func @transform_7(%arg0: i32, %arg1: i32) -> (i32, i32, i32) {
    %c0_i32 = arith.constant 0 : i32
    %c0_i32_0 = arith.constant 0 : i32
    %c0_i32_1 = arith.constant 0 : i32
    return %arg1, %c0_i32, %c0_i32_0 : i32, i32, i32
  }
  func.func @transform_8(%arg0: i32, %arg1: i32) -> (i32, i32, i32) {
    %c0_i32 = arith.constant 0 : i32
    %c0_i32_0 = arith.constant 0 : i32
    %c0_i32_1 = arith.constant 0 : i32
    return %arg1, %c0_i32, %c0_i32_0 : i32, i32, i32
  }
  func.func @transform_9(%arg0: i32, %arg1: i32) -> (i32, i32, i32) {
    %c0_i32 = arith.constant 0 : i32
    %c0_i32_0 = arith.constant 0 : i32
    %c0_i32_1 = arith.constant 0 : i32
    return %arg1, %c0_i32, %c0_i32_0 : i32, i32, i32
  }
  func.func @transform_10(%arg0: i32, %arg1: i32) -> (i32, i32, i32) {
    %c0_i32 = arith.constant 0 : i32
    %c0_i32_0 = arith.constant 0 : i32
    %c0_i32_1 = arith.constant 0 : i32
    return %arg1, %c0_i32, %c0_i32_0 : i32, i32, i32
  }
  func.func @transform_11(%arg0: i32, %arg1: i32) -> (i32, i32) {
    %c0_i32 = arith.constant 0 : i32
    %c0_i32_0 = arith.constant 0 : i32
    %c0_i32_1 = arith.constant 0 : i32
    return %c0_i32, %c0_i32_0 : i32, i32
  }
  func.func @transform_12(%arg0: i32, %arg1: i32) -> (i32, i32) {
    %c0_i32 = arith.constant 0 : i32
    %c0_i32_0 = arith.constant 0 : i32
    %c0_i32_1 = arith.constant 0 : i32
    return %c0_i32, %c0_i32_0 : i32, i32
  }
  func.func @transform_13(%arg0: i32, %arg1: i32) -> (i32, i32) {
    %c0_i32 = arith.constant 0 : i32
    %c0_i32_0 = arith.constant 0 : i32
    %c0_i32_1 = arith.constant 0 : i32
    return %c0_i32, %c0_i32_0 : i32, i32
  }
  func.func @transform_14(%arg0: i32, %arg1: i32) -> (i32, i32) {
    %c0_i32 = arith.constant 0 : i32
    %c0_i32_0 = arith.constant 0 : i32
    %c0_i32_1 = arith.constant 0 : i32
    return %c0_i32, %c0_i32_0 : i32, i32
  }
  func.func @transform_15(%arg0: i32, %arg1: i32) -> (i32, i32) {
    %c0_i32 = arith.constant 0 : i32
    %c0_i32_0 = arith.constant 0 : i32
    %c0_i32_1 = arith.constant 0 : i32
    return %c0_i32, %c0_i32_0 : i32, i32
  }
  func.func @transform_16(%arg0: i32, %arg1: i32) -> (i32, i32) {
    %c0_i32 = arith.constant 0 : i32
    %c0_i32_0 = arith.constant 0 : i32
    %c0_i32_1 = arith.constant 0 : i32
    return %c0_i32, %c0_i32_0 : i32, i32
  }
  func.func @transform_17(%arg0: i32, %arg1: i32) -> (i32, i32) {
    %c0_i32 = arith.constant 0 : i32
    %c0_i32_0 = arith.constant 0 : i32
    %c0_i32_1 = arith.constant 0 : i32
    return %c0_i32, %c0_i32_0 : i32, i32
  }
  func.func @transform_18(%arg0: i32, %arg1: i32) -> (i32, i32) {
    %c0_i32 = arith.constant 0 : i32
    %c0_i32_0 = arith.constant 0 : i32
    %c0_i32_1 = arith.constant 0 : i32
    return %c0_i32, %c0_i32_0 : i32, i32
  }
  func.func @transform_19(%arg0: i32, %arg1: i32) -> (i32, i32) {
    %c0_i32 = arith.constant 0 : i32
    %c0_i32_0 = arith.constant 0 : i32
    %c0_i32_1 = arith.constant 0 : i32
    return %c0_i32, %c0_i32_0 : i32, i32
  }
  func.func @transform_20(%arg0: i32, %arg1: i32) -> (i32, i32, i32) {
    %c0_i32 = arith.constant 0 : i32
    %c0_i32_0 = arith.constant 0 : i32
    %c0_i32_1 = arith.constant 0 : i32
    return %arg0, %c0_i32, %c0_i32_0 : i32, i32, i32
  }
  func.func @transform_21(%arg0: i32, %arg1: i32) -> (i32, i32, i32, i32) {
    %c0_i32 = arith.constant 0 : i32
    %c0_i32_0 = arith.constant 0 : i32
    %c0_i32_1 = arith.constant 0 : i32
    return %arg0, %arg1, %c0_i32, %c0_i32_0 : i32, i32, i32, i32
  }
}

module attributes {stable_mosaic.version = 11 : i64} {
  func.func @_block_kernel(%arg0: i32, %arg1: i32, %arg2: memref<1x8x32xbf16, #tpu.memory_space<vmem>>, %arg3: memref<1x3x32x32xbf16, #tpu.memory_space<vmem>>, %arg4: memref<1x1x32xf32, #tpu.memory_space<vmem>>, %arg5: memref<1x3x32x32xbf16, #tpu.memory_space<vmem>>, %arg6: memref<1x1x32xf32, #tpu.memory_space<vmem>>, %arg7: memref<1x32x32xbf16, #tpu.memory_space<vmem>>, %arg8: memref<1x1x32xf32, #tpu.memory_space<vmem>>, %arg9: memref<1x32x32xbf16, #tpu.memory_space<vmem>>, %arg10: memref<1x32xf32, #tpu.memory_space<vmem>>, %arg11: memref<32x64xbf16, #tpu.memory_space<vmem>>, %arg12: memref<1x64xf32, #tpu.memory_space<vmem>>, %arg13: memref<64x32xbf16, #tpu.memory_space<vmem>>, %arg14: memref<1x32xf32, #tpu.memory_space<vmem>>, %arg15: memref<1x32xf32, #tpu.memory_space<vmem>>, %arg16: memref<1x32xf32, #tpu.memory_space<vmem>>, %arg17: memref<1x32xf32, #tpu.memory_space<vmem>>, %arg18: memref<1x32xf32, #tpu.memory_space<vmem>>, %arg19: memref<32x1xbf16, #tpu.memory_space<vmem>>, %arg20: memref<1x1xf32, #tpu.memory_space<vmem>>, %arg21: memref<1x8x1xf32, #tpu.memory_space<vmem>>, %arg22: memref<1x1x8x8xf32, #tpu.memory_space<vmem>>, %arg23: memref<8x32xf32, #tpu.memory_space<vmem>>, %arg24: memref<8x32xf32, #tpu.memory_space<vmem>>) attributes {dimension_semantics = [#tpu.dimension_semantics<parallel>, #tpu.dimension_semantics<arbitrary>], iteration_bounds = array<i64: 2, 2>, scalar_prefetch = 0 : i64, scratch_operands = 2 : i64, tpu.core_type = #tpu.core_type<tc>, window_params = [{transform_indices = @transform_0, window_bounds = array<i64: 1, 8, 32>}, {transform_indices = @transform_1, window_bounds = array<i64: 1, 3, 32, 32>}, {transform_indices = @transform_2, window_bounds = array<i64: 1, 1, 32>}, {transform_indices = @transform_3, window_bounds = array<i64: 1, 3, 32, 32>}, {transform_indices = @transform_4, window_bounds = array<i64: 1, 1, 32>}, {transform_indices = @transform_5, window_bounds = array<i64: 1, 32, 32>}, {transform_indices = @transform_6, window_bounds = array<i64: 1, 1, 32>}, {transform_indices = @transform_7, window_bounds = array<i64: 1, 32, 32>}, {pipeline_mode = #tpu.pipeline_mode<synchronous>, transform_indices = @transform_8, window_bounds = array<i64: 1, 32>}, {pipeline_mode = #tpu.pipeline_mode<synchronous>, transform_indices = @transform_9, window_bounds = array<i64: 32, 64>}, {pipeline_mode = #tpu.pipeline_mode<synchronous>, transform_indices = @transform_10, window_bounds = array<i64: 1, 64>}, {pipeline_mode = #tpu.pipeline_mode<synchronous>, transform_indices = @transform_11, window_bounds = array<i64: 64, 32>}, {pipeline_mode = #tpu.pipeline_mode<synchronous>, transform_indices = @transform_12, window_bounds = array<i64: 1, 32>}, {pipeline_mode = #tpu.pipeline_mode<synchronous>, transform_indices = @transform_13, window_bounds = array<i64: 1, 32>}, {pipeline_mode = #tpu.pipeline_mode<synchronous>, transform_indices = @transform_14, window_bounds = array<i64: 1, 32>}, {pipeline_mode = #tpu.pipeline_mode<synchronous>, transform_indices = @transform_15, window_bounds = array<i64: 1, 32>}, {pipeline_mode = #tpu.pipeline_mode<synchronous>, transform_indices = @transform_16, window_bounds = array<i64: 1, 32>}, {pipeline_mode = #tpu.pipeline_mode<synchronous>, transform_indices = @transform_17, window_bounds = array<i64: 32, 1>}, {pipeline_mode = #tpu.pipeline_mode<synchronous>, transform_indices = @transform_18, window_bounds = array<i64: 1, 1>}, {transform_indices = @transform_19, window_bounds = array<i64: 1, 8, 1>}, {transform_indices = @transform_20, window_bounds = array<i64: 1, 1, 8, 8>}]} {
    %c0_i32 = arith.constant 0 : i32
    %0 = arith.cmpi eq, %arg1, %c0_i32 : i32
    %1 = arith.extui %0 : i1 to i32
    %c0_i32_0 = arith.constant 0 : i32
    %2 = arith.cmpi ne, %1, %c0_i32_0 : i32
    scf.if %2 {
      %c0_65 = arith.constant 0 : index
      %c0_66 = arith.constant 0 : index
      %c0_67 = arith.constant 0 : index
      %93 = vector.load %arg2[%c0_65, %c0_66, %c0_67] : memref<1x8x32xbf16, #tpu.memory_space<vmem>>, vector<1x8x32xbf16>
      %94 = vector.shape_cast %93 : vector<1x8x32xbf16> to vector<8x32xbf16>
      %95 = arith.extf %94 : vector<8x32xbf16> to vector<8x32xf32>
      %c0_68 = arith.constant 0 : index
      %c0_69 = arith.constant 0 : index
      %96 = vector.load %arg23[%c0_68, %c0_69] : memref<8x32xf32, #tpu.memory_space<vmem>>, vector<8x32xf32>
      tpu.vector_store %arg23[%c0_68, %c0_69], %95 {strides = array<i32>} : memref<8x32xf32, #tpu.memory_space<vmem>>, vector<8x32xf32>,
      %c0_70 = arith.constant 0 : index
      %c0_71 = arith.constant 0 : index
      %97 = vector.load %arg10[%c0_70, %c0_71] : memref<1x32xf32, #tpu.memory_space<vmem>>, vector<1x32xf32>
      %98 = vector.broadcast %97 : vector<1x32xf32> to vector<8x32xf32>
      %99 = arith.addf %95, %98 : vector<8x32xf32>
      %c0_72 = arith.constant 0 : index
      %c0_73 = arith.constant 0 : index
      %100 = vector.load %arg24[%c0_72, %c0_73] : memref<8x32xf32, #tpu.memory_space<vmem>>, vector<8x32xf32>
      tpu.vector_store %arg24[%c0_72, %c0_73], %99 {strides = array<i32>} : memref<8x32xf32, #tpu.memory_space<vmem>>, vector<8x32xf32>,
    } else {
    }
    %c0 = arith.constant 0 : index
    %c0_1 = arith.constant 0 : index
    %3 = vector.load %arg23[%c0, %c0_1] : memref<8x32xf32, #tpu.memory_space<vmem>>, vector<8x32xf32>
    %cst = arith.constant 0.000000e+00 : f32
    %4 = vector.broadcast %cst : f32 to vector<8x32xf32>
    %cst_2 = arith.constant 0.000000e+00 : f32
    %5 = vector.broadcast %cst_2 : f32 to vector<8x32xf32>
    %cst_3 = arith.constant 0.000000e+00 : f32
    %6 = vector.broadcast %cst_3 : f32 to vector<2x32xf32>
    %7 = vector.extract_strided_slice %3 {offsets = [0, 0], sizes = [6, 32], strides = [1, 1]} : vector<8x32xf32> to vector<6x32xf32>
    %8 = tpu.concatenate %6, %7 in 0 : vector<2x32xf32>, vector<6x32xf32> -> vector<8x32xf32>
    %c0_4 = arith.constant 0 : index
    %c0_5 = arith.constant 0 : index
    %c0_6 = arith.constant 0 : index
    %c0_7 = arith.constant 0 : index
    %9 = vector.load %arg3[%c0_4, %c0_5, %c0_6, %c0_7] : memref<1x3x32x32xbf16, #tpu.memory_space<vmem>>, vector<1x1x32x32xbf16>
    %10 = vector.shape_cast %9 : vector<1x1x32x32xbf16> to vector<32x32xbf16>
    %11 = arith.truncf %8 : vector<8x32xf32> to vector<8x32xbf16>
    %cst_8 = arith.constant dense<0.000000e+00> : vector<8x32xf32>
    %12 = tpu.matmul %11, %10, %cst_8 {dimension_numbers = #tpu.dot_dimension_numbers<[1], [0], [0], [1], [0, 0, 1, 1], [], []>} : vector<8x32xbf16>, vector<32x32xbf16>, vector<8x32xf32> -> vector<8x32xf32>
    %13 = arith.addf %4, %12 : vector<8x32xf32>
    %c0_9 = arith.constant 0 : index
    %c0_10 = arith.constant 0 : index
    %c0_11 = arith.constant 0 : index
    %c0_12 = arith.constant 0 : index
    %14 = vector.load %arg5[%c0_9, %c0_10, %c0_11, %c0_12] : memref<1x3x32x32xbf16, #tpu.memory_space<vmem>>, vector<1x1x32x32xbf16>
    %15 = vector.shape_cast %14 : vector<1x1x32x32xbf16> to vector<32x32xbf16>
    %16 = arith.truncf %8 : vector<8x32xf32> to vector<8x32xbf16>
    %cst_13 = arith.constant dense<0.000000e+00> : vector<8x32xf32>
    %17 = tpu.matmul %16, %15, %cst_13 {dimension_numbers = #tpu.dot_dimension_numbers<[1], [0], [0], [1], [0, 0, 1, 1], [], []>} : vector<8x32xbf16>, vector<32x32xbf16>, vector<8x32xf32> -> vector<8x32xf32>
    %18 = arith.addf %5, %17 : vector<8x32xf32>
    %cst_14 = arith.constant 0.000000e+00 : f32
    %19 = vector.broadcast %cst_14 : f32 to vector<1x32xf32>
    %20 = vector.extract_strided_slice %3 {offsets = [0, 0], sizes = [7, 32], strides = [1, 1]} : vector<8x32xf32> to vector<7x32xf32>
    %21 = tpu.concatenate %19, %20 in 0 : vector<1x32xf32>, vector<7x32xf32> -> vector<8x32xf32>
    %c0_15 = arith.constant 0 : index
    %c1 = arith.constant 1 : index
    %c0_16 = arith.constant 0 : index
    %c0_17 = arith.constant 0 : index
    %22 = vector.load %arg3[%c0_15, %c1, %c0_16, %c0_17] : memref<1x3x32x32xbf16, #tpu.memory_space<vmem>>, vector<1x1x32x32xbf16>
    %23 = vector.shape_cast %22 : vector<1x1x32x32xbf16> to vector<32x32xbf16>
    %24 = arith.truncf %21 : vector<8x32xf32> to vector<8x32xbf16>
    %cst_18 = arith.constant dense<0.000000e+00> : vector<8x32xf32>
    %25 = tpu.matmul %24, %23, %cst_18 {dimension_numbers = #tpu.dot_dimension_numbers<[1], [0], [0], [1], [0, 0, 1, 1], [], []>} : vector<8x32xbf16>, vector<32x32xbf16>, vector<8x32xf32> -> vector<8x32xf32>
    %26 = arith.addf %13, %25 : vector<8x32xf32>
    %c0_19 = arith.constant 0 : index
    %c1_20 = arith.constant 1 : index
    %c0_21 = arith.constant 0 : index
    %c0_22 = arith.constant 0 : index
    %27 = vector.load %arg5[%c0_19, %c1_20, %c0_21, %c0_22] : memref<1x3x32x32xbf16, #tpu.memory_space<vmem>>, vector<1x1x32x32xbf16>
    %28 = vector.shape_cast %27 : vector<1x1x32x32xbf16> to vector<32x32xbf16>
    %29 = arith.truncf %21 : vector<8x32xf32> to vector<8x32xbf16>
    %cst_23 = arith.constant dense<0.000000e+00> : vector<8x32xf32>
    %30 = tpu.matmul %29, %28, %cst_23 {dimension_numbers = #tpu.dot_dimension_numbers<[1], [0], [0], [1], [0, 0, 1, 1], [], []>} : vector<8x32xbf16>, vector<32x32xbf16>, vector<8x32xf32> -> vector<8x32xf32>
    %31 = arith.addf %18, %30 : vector<8x32xf32>
    %c0_24 = arith.constant 0 : index
    %c2 = arith.constant 2 : index
    %c0_25 = arith.constant 0 : index
    %c0_26 = arith.constant 0 : index
    %32 = vector.load %arg3[%c0_24, %c2, %c0_25, %c0_26] : memref<1x3x32x32xbf16, #tpu.memory_space<vmem>>, vector<1x1x32x32xbf16>
    %33 = vector.shape_cast %32 : vector<1x1x32x32xbf16> to vector<32x32xbf16>
    %34 = arith.truncf %3 : vector<8x32xf32> to vector<8x32xbf16>
    %cst_27 = arith.constant dense<0.000000e+00> : vector<8x32xf32>
    %35 = tpu.matmul %34, %33, %cst_27 {dimension_numbers = #tpu.dot_dimension_numbers<[1], [0], [0], [1], [0, 0, 1, 1], [], []>} : vector<8x32xbf16>, vector<32x32xbf16>, vector<8x32xf32> -> vector<8x32xf32>
    %36 = arith.addf %26, %35 : vector<8x32xf32>
    %c0_28 = arith.constant 0 : index
    %c2_29 = arith.constant 2 : index
    %c0_30 = arith.constant 0 : index
    %c0_31 = arith.constant 0 : index
    %37 = vector.load %arg5[%c0_28, %c2_29, %c0_30, %c0_31] : memref<1x3x32x32xbf16, #tpu.memory_space<vmem>>, vector<1x1x32x32xbf16>
    %38 = vector.shape_cast %37 : vector<1x1x32x32xbf16> to vector<32x32xbf16>
    %39 = arith.truncf %3 : vector<8x32xf32> to vector<8x32xbf16>
    %cst_32 = arith.constant dense<0.000000e+00> : vector<8x32xf32>
    %40 = tpu.matmul %39, %38, %cst_32 {dimension_numbers = #tpu.dot_dimension_numbers<[1], [0], [0], [1], [0, 0, 1, 1], [], []>} : vector<8x32xbf16>, vector<32x32xbf16>, vector<8x32xf32> -> vector<8x32xf32>
    %41 = arith.addf %31, %40 : vector<8x32xf32>
    %c0_33 = arith.constant 0 : index
    %c0_34 = arith.constant 0 : index
    %c0_35 = arith.constant 0 : index
    %42 = vector.load %arg4[%c0_33, %c0_34, %c0_35] : memref<1x1x32xf32, #tpu.memory_space<vmem>>, vector<1x1x32xf32>
    %43 = vector.shape_cast %42 : vector<1x1x32xf32> to vector<1x32xf32>
    %44 = vector.broadcast %43 : vector<1x32xf32> to vector<8x32xf32>
    %45 = arith.addf %36, %44 : vector<8x32xf32>
    %c0_36 = arith.constant 0 : index
    %c0_37 = arith.constant 0 : index
    %c0_38 = arith.constant 0 : index
    %46 = vector.load %arg6[%c0_36, %c0_37, %c0_38] : memref<1x1x32xf32, #tpu.memory_space<vmem>>, vector<1x1x32xf32>
    %47 = vector.shape_cast %46 : vector<1x1x32xf32> to vector<1x32xf32>
    %48 = vector.broadcast %47 : vector<1x32xf32> to vector<8x32xf32>
    %49 = arith.addf %41, %48 : vector<8x32xf32>
    %c0_39 = arith.constant 0 : index
    %c0_40 = arith.constant 0 : index
    %c0_41 = arith.constant 0 : index
    %50 = vector.load %arg7[%c0_39, %c0_40, %c0_41] : memref<1x32x32xbf16, #tpu.memory_space<vmem>>, vector<1x32x32xbf16>
    %51 = vector.shape_cast %50 : vector<1x32x32xbf16> to vector<32x32xbf16>
    %52 = arith.truncf %3 : vector<8x32xf32> to vector<8x32xbf16>
    %cst_42 = arith.constant dense<0.000000e+00> : vector<8x32xf32>
    %53 = tpu.matmul %52, %51, %cst_42 {dimension_numbers = #tpu.dot_dimension_numbers<[1], [0], [0], [1], [0, 0, 1, 1], [], []>} : vector<8x32xbf16>, vector<32x32xbf16>, vector<8x32xf32> -> vector<8x32xf32>
    %c0_43 = arith.constant 0 : index
    %c0_44 = arith.constant 0 : index
    %c0_45 = arith.constant 0 : index
    %54 = vector.load %arg8[%c0_43, %c0_44, %c0_45] : memref<1x1x32xf32, #tpu.memory_space<vmem>>, vector<1x1x32xf32>
    %55 = vector.shape_cast %54 : vector<1x1x32xf32> to vector<1x32xf32>
    %56 = vector.broadcast %55 : vector<1x32xf32> to vector<8x32xf32>
    %57 = arith.addf %53, %56 : vector<8x32xf32>
    %58 = arith.truncf %45 : vector<8x32xf32> to vector<8x32xbf16>
    %59 = arith.truncf %49 : vector<8x32xf32> to vector<8x32xbf16>
    %cst_46 = arith.constant dense<0.000000e+00> : vector<8x8xf32>
    %60 = tpu.matmul %58, %59, %cst_46 {dimension_numbers = #tpu.dot_dimension_numbers<[1], [1], [0], [0], [0, 0, 1, 0], [], []>} : vector<8x32xbf16>, vector<8x32xbf16>, vector<8x8xf32> -> vector<8x8xf32>
    %cst_47 = arith.constant 0.176776692 : f32
    %61 = vector.broadcast %cst_47 : f32 to vector<8x8xf32>
    %62 = arith.mulf %60, %61 : vector<8x8xf32>
    %63 = tpu.iota {dimensions = array<i32: 0>} : vector<8x8xi32>
    %64 = tpu.iota {dimensions = array<i32: 1>} : vector<8x8xi32>
    %65 = arith.cmpi sge, %63, %64 : vector<8x8xi32>
    %cst_48 = arith.constant -1.000000e+09 : f32
    %66 = vector.broadcast %cst_48 : f32 to vector<8x8xf32>
    %67 = arith.select %65, %62, %66 : vector<8x8xi1>, vector<8x8xf32>
    %cst_49 = arith.constant dense<0xFF800000> : vector<8xf32>
    %68 = vector.multi_reduction <maximumf>, %67, %cst_49 [1] : vector<8x8xf32> to vector<8xf32>
    %69 = vector.shape_cast %68 : vector<8xf32> to vector<8x1xf32>
    %70 = vector.broadcast %69 : vector<8x1xf32> to vector<8x8xf32>
    %71 = arith.subf %67, %70 : vector<8x8xf32>
    %72 = math.exp %71 : vector<8x8xf32>
    %cst_50 = arith.constant dense<0.000000e+00> : vector<8xf32>
    %73 = vector.multi_reduction <add>, %72, %cst_50 [1] : vector<8x8xf32> to vector<8xf32>
    %74 = vector.shape_cast %73 : vector<8xf32> to vector<8x1xf32>
    %75 = vector.broadcast %74 : vector<8x1xf32> to vector<8x8xf32>
    %76 = arith.divf %72, %75 : vector<8x8xf32>
    %c0_51 = arith.constant 0 : index
    %c0_52 = arith.constant 0 : index
    %c0_53 = arith.constant 0 : index
    %c0_54 = arith.constant 0 : index
    %77 = vector.load %arg22[%c0_51, %c0_52, %c0_53, %c0_54] : memref<1x1x8x8xf32, #tpu.memory_space<vmem>>, vector<1x1x8x8xf32>
    %78 = vector.shape_cast %77 : vector<1x1x8x8xf32> to vector<8x8xf32>
    %79 = vector.shape_cast %76 : vector<8x8xf32> to vector<1x1x8x8xf32>
    tpu.vector_store %arg22[%c0_51, %c0_52, %c0_53, %c0_54], %79 {strides = array<i32>} : memref<1x1x8x8xf32, #tpu.memory_space<vmem>>, vector<1x1x8x8xf32>,
    %c0_55 = arith.constant 0 : index
    %c0_56 = arith.constant 0 : index
    %80 = vector.load %arg24[%c0_55, %c0_56] : memref<8x32xf32, #tpu.memory_space<vmem>>, vector<8x32xf32>
    %81 = arith.truncf %76 : vector<8x8xf32> to vector<8x8xbf16>
    %82 = arith.truncf %57 : vector<8x32xf32> to vector<8x32xbf16>
    %cst_57 = arith.constant dense<0.000000e+00> : vector<8x32xf32>
    %83 = tpu.matmul %81, %82, %cst_57 {dimension_numbers = #tpu.dot_dimension_numbers<[1], [0], [0], [1], [0, 0, 1, 1], [], []>} : vector<8x8xbf16>, vector<8x32xbf16>, vector<8x32xf32> -> vector<8x32xf32>
    %c0_58 = arith.constant 0 : index
    %c0_59 = arith.constant 0 : index
    %c0_60 = arith.constant 0 : index
    %84 = vector.load %arg9[%c0_58, %c0_59, %c0_60] : memref<1x32x32xbf16, #tpu.memory_space<vmem>>, vector<1x32x32xbf16>
    %85 = vector.shape_cast %84 : vector<1x32x32xbf16> to vector<32x32xbf16>
    %86 = arith.truncf %83 : vector<8x32xf32> to vector<8x32xbf16>
    %cst_61 = arith.constant dense<0.000000e+00> : vector<8x32xf32>
    %87 = tpu.matmul %86, %85, %cst_61 {dimension_numbers = #tpu.dot_dimension_numbers<[1], [0], [0], [1], [0, 0, 1, 1], [], []>} : vector<8x32xbf16>, vector<32x32xbf16>, vector<8x32xf32> -> vector<8x32xf32>
    %88 = arith.addf %80, %87 : vector<8x32xf32>
    %c0_62 = arith.constant 0 : index
    %c0_63 = arith.constant 0 : index
    %89 = vector.load %arg24[%c0_62, %c0_63] : memref<8x32xf32, #tpu.memory_space<vmem>>, vector<8x32xf32>
    tpu.vector_store %arg24[%c0_62, %c0_63], %88 {strides = array<i32>} : memref<8x32xf32, #tpu.memory_space<vmem>>, vector<8x32xf32>,
    %c1_i32 = arith.constant 1 : i32
    %90 = arith.cmpi eq, %arg1, %c1_i32 : i32
    %91 = arith.extui %90 : i1 to i32
    %c0_i32_64 = arith.constant 0 : i32
    %92 = arith.cmpi ne, %91, %c0_i32_64 : i32
    scf.if %92 {
      %c0_65 = arith.constant 0 : index
      %c0_66 = arith.constant 0 : index
      %93 = vector.load %arg24[%c0_65, %c0_66] : memref<8x32xf32, #tpu.memory_space<vmem>>, vector<8x32xf32>
      %c0_67 = arith.constant 0 : index
      %c0_68 = arith.constant 0 : index
      %94 = vector.load %arg15[%c0_67, %c0_68] : memref<1x32xf32, #tpu.memory_space<vmem>>, vector<1x32xf32>
      %c0_69 = arith.constant 0 : index
      %c0_70 = arith.constant 0 : index
      %95 = vector.load %arg16[%c0_69, %c0_70] : memref<1x32xf32, #tpu.memory_space<vmem>>, vector<1x32xf32>
      %cst_71 = arith.constant dense<0.000000e+00> : vector<8xf32>
      %96 = vector.multi_reduction <add>, %93, %cst_71 [1] : vector<8x32xf32> to vector<8xf32>
      %97 = vector.shape_cast %96 : vector<8xf32> to vector<8x1xf32>
      %cst_72 = arith.constant 3.200000e+01 : f32
      %98 = vector.broadcast %cst_72 : f32 to vector<8x1xf32>
      %99 = arith.divf %97, %98 : vector<8x1xf32>
      %100 = vector.broadcast %99 : vector<8x1xf32> to vector<8x32xf32>
      %101 = arith.subf %93, %100 : vector<8x32xf32>
      %102 = arith.mulf %101, %101 : vector<8x32xf32>
      %cst_73 = arith.constant dense<0.000000e+00> : vector<8xf32>
      %103 = vector.multi_reduction <add>, %102, %cst_73 [1] : vector<8x32xf32> to vector<8xf32>
      %104 = vector.shape_cast %103 : vector<8xf32> to vector<8x1xf32>
      %cst_74 = arith.constant 3.200000e+01 : f32
      %105 = vector.broadcast %cst_74 : f32 to vector<8x1xf32>
      %106 = arith.divf %104, %105 : vector<8x1xf32>
      %107 = vector.broadcast %99 : vector<8x1xf32> to vector<8x32xf32>
      %108 = arith.subf %93, %107 : vector<8x32xf32>
      %cst_75 = arith.constant 9.99999974E-6 : f32
      %109 = vector.broadcast %cst_75 : f32 to vector<8x1xf32>
      %110 = arith.addf %106, %109 : vector<8x1xf32>
      %111 = math.rsqrt %110 : vector<8x1xf32>
      %112 = vector.broadcast %111 : vector<8x1xf32> to vector<8x32xf32>
      %113 = arith.mulf %108, %112 : vector<8x32xf32>
      %114 = vector.broadcast %94 : vector<1x32xf32> to vector<8x32xf32>
      %115 = arith.mulf %113, %114 : vector<8x32xf32>
      %116 = vector.broadcast %95 : vector<1x32xf32> to vector<8x32xf32>
      %117 = arith.addf %115, %116 : vector<8x32xf32>
      %c0_76 = arith.constant 0 : index
      %c0_77 = arith.constant 0 : index
      %118 = vector.load %arg11[%c0_76, %c0_77] : memref<32x64xbf16, #tpu.memory_space<vmem>>, vector<32x64xbf16>
      %119 = arith.truncf %117 : vector<8x32xf32> to vector<8x32xbf16>
      %cst_78 = arith.constant dense<0.000000e+00> : vector<8x64xf32>
      %120 = tpu.matmul %119, %118, %cst_78 {dimension_numbers = #tpu.dot_dimension_numbers<[1], [0], [0], [1], [0, 0, 1, 1], [], []>} : vector<8x32xbf16>, vector<32x64xbf16>, vector<8x64xf32> -> vector<8x64xf32>
      %c0_79 = arith.constant 0 : index
      %c0_80 = arith.constant 0 : index
      %121 = vector.load %arg12[%c0_79, %c0_80] : memref<1x64xf32, #tpu.memory_space<vmem>>, vector<1x64xf32>
      %122 = vector.broadcast %121 : vector<1x64xf32> to vector<8x64xf32>
      %123 = arith.addf %120, %122 : vector<8x64xf32>
      %cst_81 = arith.constant 0.000000e+00 : f32
      %124 = vector.broadcast %cst_81 : f32 to vector<8x64xf32>
      %125 = arith.maximumf %123, %124 : vector<8x64xf32>
      %c0_82 = arith.constant 0 : index
      %c0_83 = arith.constant 0 : index
      %126 = vector.load %arg13[%c0_82, %c0_83] : memref<64x32xbf16, #tpu.memory_space<vmem>>, vector<64x32xbf16>
      %127 = arith.truncf %125 : vector<8x64xf32> to vector<8x64xbf16>
      %cst_84 = arith.constant dense<0.000000e+00> : vector<8x32xf32>
      %128 = tpu.matmul %127, %126, %cst_84 {dimension_numbers = #tpu.dot_dimension_numbers<[1], [0], [0], [1], [0, 0, 1, 1], [], []>} : vector<8x64xbf16>, vector<64x32xbf16>, vector<8x32xf32> -> vector<8x32xf32>
      %c0_85 = arith.constant 0 : index
      %c0_86 = arith.constant 0 : index
      %129 = vector.load %arg14[%c0_85, %c0_86] : memref<1x32xf32, #tpu.memory_space<vmem>>, vector<1x32xf32>
      %130 = vector.broadcast %129 : vector<1x32xf32> to vector<8x32xf32>
      %131 = arith.addf %128, %130 : vector<8x32xf32>
      %132 = arith.addf %117, %131 : vector<8x32xf32>
      %c0_87 = arith.constant 0 : index
      %c0_88 = arith.constant 0 : index
      %133 = vector.load %arg17[%c0_87, %c0_88] : memref<1x32xf32, #tpu.memory_space<vmem>>, vector<1x32xf32>
      %c0_89 = arith.constant 0 : index
      %c0_90 = arith.constant 0 : index
      %134 = vector.load %arg18[%c0_89, %c0_90] : memref<1x32xf32, #tpu.memory_space<vmem>>, vector<1x32xf32>
      %cst_91 = arith.constant dense<0.000000e+00> : vector<8xf32>
      %135 = vector.multi_reduction <add>, %132, %cst_91 [1] : vector<8x32xf32> to vector<8xf32>
      %136 = vector.shape_cast %135 : vector<8xf32> to vector<8x1xf32>
      %cst_92 = arith.constant 3.200000e+01 : f32
      %137 = vector.broadcast %cst_92 : f32 to vector<8x1xf32>
      %138 = arith.divf %136, %137 : vector<8x1xf32>
      %139 = vector.broadcast %138 : vector<8x1xf32> to vector<8x32xf32>
      %140 = arith.subf %132, %139 : vector<8x32xf32>
      %141 = arith.mulf %140, %140 : vector<8x32xf32>
      %cst_93 = arith.constant dense<0.000000e+00> : vector<8xf32>
      %142 = vector.multi_reduction <add>, %141, %cst_93 [1] : vector<8x32xf32> to vector<8xf32>
      %143 = vector.shape_cast %142 : vector<8xf32> to vector<8x1xf32>
      %cst_94 = arith.constant 3.200000e+01 : f32
      %144 = vector.broadcast %cst_94 : f32 to vector<8x1xf32>
      %145 = arith.divf %143, %144 : vector<8x1xf32>
      %146 = vector.broadcast %138 : vector<8x1xf32> to vector<8x32xf32>
      %147 = arith.subf %132, %146 : vector<8x32xf32>
      %cst_95 = arith.constant 9.99999974E-6 : f32
      %148 = vector.broadcast %cst_95 : f32 to vector<8x1xf32>
      %149 = arith.addf %145, %148 : vector<8x1xf32>
      %150 = math.rsqrt %149 : vector<8x1xf32>
      %151 = vector.broadcast %150 : vector<8x1xf32> to vector<8x32xf32>
      %152 = arith.mulf %147, %151 : vector<8x32xf32>
      %153 = vector.broadcast %133 : vector<1x32xf32> to vector<8x32xf32>
      %154 = arith.mulf %152, %153 : vector<8x32xf32>
      %155 = vector.broadcast %134 : vector<1x32xf32> to vector<8x32xf32>
      %156 = arith.addf %154, %155 : vector<8x32xf32>
      %c0_96 = arith.constant 0 : index
      %c0_97 = arith.constant 0 : index
      %157 = vector.load %arg19[%c0_96, %c0_97] : memref<32x1xbf16, #tpu.memory_space<vmem>>, vector<32x1xbf16>
      %158 = arith.truncf %156 : vector<8x32xf32> to vector<8x32xbf16>
      %cst_98 = arith.constant dense<0.000000e+00> : vector<8x1xf32>
      %159 = tpu.matmul %158, %157, %cst_98 {dimension_numbers = #tpu.dot_dimension_numbers<[1], [0], [0], [1], [0, 0, 1, 1], [], []>} : vector<8x32xbf16>, vector<32x1xbf16>, vector<8x1xf32> -> vector<8x1xf32>
      %c0_99 = arith.constant 0 : index
      %c0_100 = arith.constant 0 : index
      %160 = vector.load %arg20[%c0_99, %c0_100] : memref<1x1xf32, #tpu.memory_space<vmem>>, vector<1x1xf32>
      %161 = vector.broadcast %160 : vector<1x1xf32> to vector<8x1xf32>
      %162 = arith.addf %159, %161 : vector<8x1xf32>
      %c0_101 = arith.constant 0 : index
      %c0_102 = arith.constant 0 : index
      %c0_103 = arith.constant 0 : index
      %163 = vector.load %arg21[%c0_101, %c0_102, %c0_103] : memref<1x8x1xf32, #tpu.memory_space<vmem>>, vector<1x8x1xf32>
      %164 = vector.shape_cast %163 : vector<1x8x1xf32> to vector<8x1xf32>
      %165 = vector.shape_cast %162 : vector<8x1xf32> to vector<1x8x1xf32>
      tpu.vector_store %arg21[%c0_101, %c0_102, %c0_103], %165 {strides = array<i32>} : memref<1x8x1xf32, #tpu.memory_space<vmem>>, vector<1x8x1xf32>,
    } else {
    }
    return
  }
  func.func @transform_0(%arg0: i32, %arg1: i32) -> (i32, i32, i32) {
    %c0_i32 = arith.constant 0 : i32
    %c0_i32_0 = arith.constant 0 : i32
    %c0_i32_1 = arith.constant 0 : i32
    return %arg0, %c0_i32, %c0_i32_0 : i32, i32, i32
  }
  func.func @transform_1(%arg0: i32, %arg1: i32) -> (i32, i32, i32, i32) {
    %c0_i32 = arith.constant 0 : i32
    %c0_i32_0 = arith.constant 0 : i32
    %c0_i32_1 = arith.constant 0 : i32
    %c0_i32_2 = arith.constant 0 : i32
    return %arg1, %c0_i32, %c0_i32_0, %c0_i32_1 : i32, i32, i32, i32
  }
  func.func @transform_2(%arg0: i32, %arg1: i32) -> (i32, i32, i32) {
    %c0_i32 = arith.constant 0 : i32
    %c0_i32_0 = arith.constant 0 : i32
    %c0_i32_1 = arith.constant 0 : i32
    return %arg1, %c0_i32, %c0_i32_0 : i32, i32, i32
  }
  func.func @transform_3(%arg0: i32, %arg1: i32) -> (i32, i32, i32, i32) {
    %c0_i32 = arith.constant 0 : i32
    %c0_i32_0 = arith.constant 0 : i32
    %c0_i32_1 = arith.constant 0 : i32
    %c0_i32_2 = arith.constant 0 : i32
    return %arg1, %c0_i32, %c0_i32_0, %c0_i32_1 : i32, i32, i32, i32
  }
  func.func @transform_4(%arg0: i32, %arg1: i32) -> (i32, i32, i32) {
    %c0_i32 = arith.constant 0 : i32
    %c0_i32_0 = arith.constant 0 : i32
    %c0_i32_1 = arith.constant 0 : i32
    return %arg1, %c0_i32, %c0_i32_0 : i32, i32, i32
  }
  func.func @transform_5(%arg0: i32, %arg1: i32) -> (i32, i32, i32) {
    %c0_i32 = arith.constant 0 : i32
    %c0_i32_0 = arith.constant 0 : i32
    %c0_i32_1 = arith.constant 0 : i32
    return %arg1, %c0_i32, %c0_i32_0 : i32, i32, i32
  }
  func.func @transform_6(%arg0: i32, %arg1: i32) -> (i32, i32, i32) {
    %c0_i32 = arith.constant 0 : i32
    %c0_i32_0 = arith.constant 0 : i32
    %c0_i32_1 = arith.constant 0 : i32
    return %arg1, %c0_i32, %c0_i32_0 : i32, i32, i32
  }
  func.func @transform_7(%arg0: i32, %arg1: i32) -> (i32, i32, i32) {
    %c0_i32 = arith.constant 0 : i32
    %c0_i32_0 = arith.constant 0 : i32
    %c0_i32_1 = arith.constant 0 : i32
    return %arg1, %c0_i32, %c0_i32_0 : i32, i32, i32
  }
  func.func @transform_8(%arg0: i32, %arg1: i32) -> (i32, i32) {
    %c0_i32 = arith.constant 0 : i32
    %c0_i32_0 = arith.constant 0 : i32
    %c0_i32_1 = arith.constant 0 : i32
    return %c0_i32, %c0_i32_0 : i32, i32
  }
  func.func @transform_9(%arg0: i32, %arg1: i32) -> (i32, i32) {
    %c0_i32 = arith.constant 0 : i32
    %c0_i32_0 = arith.constant 0 : i32
    %c0_i32_1 = arith.constant 0 : i32
    return %c0_i32, %c0_i32_0 : i32, i32
  }
  func.func @transform_10(%arg0: i32, %arg1: i32) -> (i32, i32) {
    %c0_i32 = arith.constant 0 : i32
    %c0_i32_0 = arith.constant 0 : i32
    %c0_i32_1 = arith.constant 0 : i32
    return %c0_i32, %c0_i32_0 : i32, i32
  }
  func.func @transform_11(%arg0: i32, %arg1: i32) -> (i32, i32) {
    %c0_i32 = arith.constant 0 : i32
    %c0_i32_0 = arith.constant 0 : i32
    %c0_i32_1 = arith.constant 0 : i32
    return %c0_i32, %c0_i32_0 : i32, i32
  }
  func.func @transform_12(%arg0: i32, %arg1: i32) -> (i32, i32) {
    %c0_i32 = arith.constant 0 : i32
    %c0_i32_0 = arith.constant 0 : i32
    %c0_i32_1 = arith.constant 0 : i32
    return %c0_i32, %c0_i32_0 : i32, i32
  }
  func.func @transform_13(%arg0: i32, %arg1: i32) -> (i32, i32) {
    %c0_i32 = arith.constant 0 : i32
    %c0_i32_0 = arith.constant 0 : i32
    %c0_i32_1 = arith.constant 0 : i32
    return %c0_i32, %c0_i32_0 : i32, i32
  }
  func.func @transform_14(%arg0: i32, %arg1: i32) -> (i32, i32) {
    %c0_i32 = arith.constant 0 : i32
    %c0_i32_0 = arith.constant 0 : i32
    %c0_i32_1 = arith.constant 0 : i32
    return %c0_i32, %c0_i32_0 : i32, i32
  }
  func.func @transform_15(%arg0: i32, %arg1: i32) -> (i32, i32) {
    %c0_i32 = arith.constant 0 : i32
    %c0_i32_0 = arith.constant 0 : i32
    %c0_i32_1 = arith.constant 0 : i32
    return %c0_i32, %c0_i32_0 : i32, i32
  }
  func.func @transform_16(%arg0: i32, %arg1: i32) -> (i32, i32) {
    %c0_i32 = arith.constant 0 : i32
    %c0_i32_0 = arith.constant 0 : i32
    %c0_i32_1 = arith.constant 0 : i32
    return %c0_i32, %c0_i32_0 : i32, i32
  }
  func.func @transform_17(%arg0: i32, %arg1: i32) -> (i32, i32) {
    %c0_i32 = arith.constant 0 : i32
    %c0_i32_0 = arith.constant 0 : i32
    %c0_i32_1 = arith.constant 0 : i32
    return %c0_i32, %c0_i32_0 : i32, i32
  }
  func.func @transform_18(%arg0: i32, %arg1: i32) -> (i32, i32) {
    %c0_i32 = arith.constant 0 : i32
    %c0_i32_0 = arith.constant 0 : i32
    %c0_i32_1 = arith.constant 0 : i32
    return %c0_i32, %c0_i32_0 : i32, i32
  }
  func.func @transform_19(%arg0: i32, %arg1: i32) -> (i32, i32, i32) {
    %c0_i32 = arith.constant 0 : i32
    %c0_i32_0 = arith.constant 0 : i32
    %c0_i32_1 = arith.constant 0 : i32
    return %arg0, %c0_i32, %c0_i32_0 : i32, i32, i32
  }
  func.func @transform_20(%arg0: i32, %arg1: i32) -> (i32, i32, i32, i32) {
    %c0_i32 = arith.constant 0 : i32
    %c0_i32_0 = arith.constant 0 : i32
    %c0_i32_1 = arith.constant 0 : i32
    return %arg0, %arg1, %c0_i32, %c0_i32_0 : i32, i32, i32, i32
  }
}

</mosaic_0001>

<bundles_post_ra>
// kernel: forward.3
= control target key start
LH: loop header
LB: loop body
LE: loop exit
PB: predicated region body
PF: predicated region fallthrough
CT: control target
= control target key end

     0   :  { %s2766_s0 = inlined_call_operand.vmem [shape: bf16[2,8,32], index: 0, kind: input, shape index: {}]   ;;  %s2767_s1 = inlined_call_operand.vmem [shape: bf16[2,3,32,32], index: 1, kind: input, shape index: {}]   ;;  %s2768_s2 = inlined_call_operand.vmem [shape: f32[2,1,32], index: 2, kind: input, shape index: {}]   ;;  %s2769_s3 = inlined_call_operand.vmem [shape: bf16[2,3,32,32], index: 3, kind: input, shape index: {}]   ;;  %s2770_s4 = inlined_call_operand.vmem [shape: f32[2,1,32], index: 4, kind: input, shape index: {}]   ;;  %s2771_s5 = inlined_call_operand.vmem [shape: bf16[2,32,32], index: 5, kind: input, shape index: {}]   ;;  %s2772_s6 = inlined_call_operand.vmem [shape: f32[2,1,32], index: 6, kind: input, shape index: {}]   ;;  %s2773_s7 = inlined_call_operand.vmem [shape: bf16[2,32,32], index: 7, kind: input, shape index: {}]   ;;  %s2774_s8 = inlined_call_operand.vmem [shape: f32[1,32], index: 8, kind: input, shape index: {}]   ;;  %s2775_s9 = inlined_call_operand.vmem [shape: bf16[32,64], index: 9, kind: input, shape index: {}]   ;;  %s2776_s10 = inlined_call_operand.vmem [shape: f32[1,64], index: 10, kind: input, shape index: {}]   ;;  %s2777_s11 = inlined_call_operand.vmem [shape: bf16[64,32], index: 11, kind: input, shape index: {}]   ;;  %s2778_s12 = inlined_call_operand.vmem [shape: f32[1,32], index: 12, kind: input, shape index: {}]   ;;  %s2779_s13 = inlined_call_operand.vmem [shape: f32[1,32], index: 13, kind: input, shape index: {}]   ;;  %s2780_s14 = inlined_call_operand.vmem [shape: f32[1,32], index: 14, kind: input, shape index: {}]   ;;  %s2781_s15 = inlined_call_operand.vmem [shape: f32[1,32], index: 15, kind: input, shape index: {}]   ;;  %s2782_s16 = inlined_call_operand.vmem [shape: f32[1,32], index: 16, kind: input, shape index: {}]   ;;  %s2783_s17 = inlined_call_operand.vmem [shape: bf16[32,1], index: 17, kind: input, shape index: {}]   ;;  %s2784_s18 = inlined_call_operand.<no memory space> [shape: f32[1,1], index: 18, kind: input, shape index: {}]   ;;  %s2785_s19 = inlined_call_operand.vmem [shape: f32[2,8,1], index: 19, kind: output, shape index: {0}]   ;;  %s2786_s20 = inlined_call_operand.hbm [shape: f32[2,2,8,8], index: 20, kind: output, shape index: {1}]  }
   0x1   :  { %2805 = sst [smem:[#allocation20_spill]] %s2766_s0  ;;  %v26_v0 = vstv %s2784_s18 }
   0x2   :  { %2806 = sst [smem:[#allocation21_spill]] %s2767_s1  ;;  %27 = vst [vmem:[#allocation4] sm:$0x1] %v26_v0 }
   0x3   :  { %2807 = sst [smem:[#allocation22_spill]] %s2768_s2 }
   0x4   :  { %2808 = sst [smem:[#allocation23_spill]] %s2769_s3 }
   0x5   :  { %2809 = sst [smem:[#allocation24_spill]] %s2770_s4 }
   0x6   :  { %2810 = sst [smem:[#allocation25_spill]] %s2775_s9 }
   0x7   :  { %2811 = sst [smem:[#allocation26_spill]] %s2776_s10 }
   0x8   :  { %2812 = sst [smem:[#allocation27_spill]] %s2777_s11 }
   0x9   :  { %2813 = sst [smem:[#allocation28_spill]] %s2778_s12 }
   0xa   :  { %2814 = sst [smem:[#allocation29_spill]] %s2779_s13 }
   0xb   :  { %2815 = sst [smem:[#allocation30_spill]] %s2780_s14 }
   0xc   :  { %2816 = sst [smem:[#allocation31_spill]] %s2781_s15 }
   0xd   :  { %2817 = sst [smem:[#allocation32_spill]] %s2782_s16 }
   0xe   :  { %2818 = sst [smem:[#allocation33_spill]] %s2783_s17 }
   0xf   :  { %2819 = sst [smem:[#allocation34_spill]] %s2786_s20 }
  0x10   :  { %28 = vsyncpa [#allocation6], 0 }
  0x11   :  { %30 = vsyncpa [#allocation6 + $0x1], 0  ;;  %s2443_s23 = smov 0   ;;  %s2445_s24 = smov 0  }
  0x12   :  { %s2447_s2 = smov 0   ;;  %s2449_s25 = smov 0  }
  0x13   :  { %s2451_s3 = smov 0   ;;  %s2453_s26 = smov 0  }
  0x14   :  { %s2455_s27 = smov 0   ;;  %s2457_s28 = smov 0  }
  0x15 LB: > { %2820 = sst [smem:[#allocation8_spill]] %s2300_s23  ;;  %s1896_s18 = sadd.s32 4294967295, %s2328_s28   ;;  %s2328_s28 = sphi %s2457_s28, %s36_s28   ;;  %s2324_s27 = sphi %s2455_s27, %s2866_s27   ;;  %s2320_s26 = sphi %s2453_s26, %s2865_s26   ;;  %s2316_s3 = sphi %s2451_s3, %s2864_s3   ;;  %s2312_s25 = sphi %s2449_s25, %s2863_s25   ;;  %s2308_s2 = sphi %s2447_s2, %s2862_s2   ;;  %s2304_s24 = sphi %s2445_s24, %s2861_s24   ;;  %s2300_s23 = sphi %s2443_s23, %s2860_s23  }
  0x16   : > { %2821 = sst [smem:[#allocation9_spill]] %s2304_s24  ;;  %s1897_s4 = sadd.s32 4294967294, %s2328_s28  }
  0x17   : > { %2822 = sst [smem:[#allocation10_spill]] %s2308_s2  ;;  %s45_s29 = sadd.s32 1, %s2320_s26 }
  0x18   : > { %2823 = sst [smem:[#allocation11_spill]] %s2316_s3  ;;  %p46_p0 = scmp.ge.s32.totalorder %s45_s29, 2 }
  0x19   : > { %2824 = sst [smem:[#allocation12_spill]] %s2320_s26  ;;  %s48_s30 = sadd.s32 1, %s2324_s27 }
  0x1a   : > { %2825 = sst [smem:[#allocation13_spill]] %s2324_s27  ;;  %p532_p1 = scmp.ne.s32.totalorder %s2308_s2, %s2304_s24 }
  0x1b   : > { %2826 = sst [smem:[#allocation14_spill]] %s2328_s28  ;;  %p533_p2 = scmp.eq.s32.totalorder %s1896_s18, 3 }
  0x1c   : > { %s2868_s29 = smov (%p46_p0, %s45_s29), 0  ;;  %s2870_s30 = smov (!%p46_p0, %s48_s30), %s2324_s27 }
  0x1d   : > { %2827 = sst [smem:[#allocation15_spill]] %s2868_s29  ;;  %s518_s0 = ssub.s32 %s2320_s26, %s2868_s29 }
  0x1e   : > { %p2494_p3 = por %p533_p2, %p532_p1  ;;  %p50_p4 = scmp.ge.s32.totalorder %s2870_s30, 2 }
  0x1f   : > { %p538_p5 = scmp.ne.s32.totalorder %s2304_s24, %s2300_s23  ;;  %p539_p6 = scmp.eq.s32.totalorder %s1897_s4, 3 }
  0x20   : > { %s2828_s21 = scalar_select %p2494_p3, 1, 0 }
  0x21   : > { %p1900_p7 = scmp.ge.s32.totalorder %s2328_s28, 1  ;;  %s2872_s30 = smov (%p50_p4, %s2870_s30), 0 }
  0x22   : > { %2829 = sst [smem:[#allocation16_spill]] %s2828_s21  ;;  %p2503_p8 = por %p539_p6, %p538_p5 }
  0x23   : > { %2830 = sst [smem:[#allocation17_spill]] %s2872_s30  ;;  %p647_p9 = scmp.lt.s32.totalorder %s2328_s28, 5 }
  0x24   : > { %s2831_s1 = scalar_select %p2503_p8, 1, 0 }
  0x25   : > { %s517_s22 = ssub.s32 %s2324_s27, %s2872_s30  ;;  %s522_s18 = sadd.s32 1, %s2308_s2 }
  0x26   : > { %2832 = sst [smem:[#allocation18_spill]] %s2831_s1  ;;  %s519_s20 = sor.u32 %s518_s0, %s517_s22 }
  0x27   : > { %p648_p10 = pnand %p1900_p7, %p647_p9  ;;  %p520_p11 = scmp.eq.s32.totalorder %s519_s20, 0 }
  0x28   : > { %s2795_s4 = sand.u32 (!%p648_p10), 1, %s2304_s24   ;;  %p737_p12 = scmp.lt.s32.totalorder (!%p648_p10), %s2316_s3, 1 }
  0x29   : > { %s2512_s29 = scalar_select %p520_p11, %s2308_s2, %s522_s18  }
  0x2a   : > { %651 = sbr.rel (%p648_p10) target bundleno = 2594 (0xa22), region = 96  ;;  %s2518_s26 = sshll.u32 (!%p648_p10), %s2795_s4, 3 }
  0x2b   : > { %2833 = sst [smem:[#allocation19_spill]] %s2512_s29  ;;  %p741_p13 = scmp.lt.s32.totalorder (!%p648_p10), %s2312_s25, 1 }
  0x2c   : > { %s2834_s29 = sld [smem:[#allocation20_spill]] (!%p648_p10)  ;;  %s2835_s28 = sld [smem:[#allocation22_spill]] (!%p648_p10) }
  0x2d   : > { %s2836_s16 = sld [smem:[#allocation24_spill]] (!%p648_p10)  ;;  %s2837_s10 = sld [smem:[#allocation21_spill]] (!%p648_p10) }
  0x2e   : > { %s2838_s11 = sld [smem:[#allocation23_spill]] (!%p648_p10)  ;;  %s736_s13 = scalar_lea.vmem (!%p648_p10), [#allocation5], %s2518_s26 }
  0x2f   : > { %p1910_p0 = scmp.ne.s32.totalorder (!%p648_p10), %s2312_s25, 0 }
  0x31   : > { %s738_s30 = scalar_select %p737_p12, %s2316_s3, 1 }
  0x32   : > { %s2523_s0 = scalar_select %p741_p13, %s2312_s25, 1 }
  0x33   : > { %s1902_s20 = sshll.u32 %s738_s30, 2  ;;  %s1909_s22 = sshll.u32 %s738_s30, 3  ;;  %vm781_vm0 = vcmask (!%p1910_p0), 261120   ;;  %v1911_v2 = vld [vmem:[%s2774_s8] ss:$0 sm:$0xff] (!%p1910_p0) }
  0x34   : > { %s740_s2 = scalar_lea.vmem %s2834_s29, %s1902_s20  ;;  %s2126_s1 = smul.u32 48, %s2523_s0 }
  0x35   : > { %s748_s21 = scalar_lea.vmem %s2835_s28, %s2523_s0  ;;  %s756_s15 = scalar_lea.vmem %s2836_s16, %s2523_s0  ;;  %v779_v1 = vld [vmem:[%s740_s2] sm:$0xf] (!%p1910_p0) }
  0x36   : > { %s2540_s14 = scalar_lea.vmem %s2837_s10, %s2126_s1  ;;  %s2545_s9 = scalar_lea.vmem %s2838_s11, %s2126_s1  ;;  %v780_v3 = vunpack.c.l.bf16 (!%p1910_p0), %v779_v1 }
  0x37   : > { %s1981_s27 = sshll.u32 %s2523_s0, 4  ;;  %s764_s23 = scalar_lea.vmem %s2772_s6, %s2523_s0 }
  0x38   : > { %s2555_s24 = scalar_lea.vmem %s2771_s5, %s1981_s27  ;;  %s2560_s10 = scalar_lea.vmem %s2773_s7, %s1981_s27  ;;  %782 = vst.msk [vmem:[#allocation2] sm:$0xff] (!%p1910_p0), %vm781_vm0, %v780_v3  ;;  %v790_v4 = vadd.f32 (!%p1910_p0), %v1911_v2, %v780_v3 }
  0x39   : > { %s2565_s11 = scalar_lea.vmem %s2785_s19, %s1909_s22  ;;  %778 = sbr.rel (%p1910_p0) target bundleno = 64 (0x40), region = 100 }
  0x3a   : > { %791 = vst.msk [vmem:[#allocation3] sm:$0xff] (!%p1910_p0), %vm781_vm0, %v790_v4 }
  0x40 PF: > { %v2202_v5 = vld [vmem:[%s2540_s14 + $0x10] sm:$0xff]   ;;  %v2330_v6 = vmov 0.0   ;;  %v2203_v7 = vld [vmem:[%s2540_s14] sm:$0xff]   ;;  %v2204_v8 = vld [vmem:[%s2540_s14 + $0x18] sm:$0xff]   ;;  %vm2331_vm1 = vmmov 0   ;;  %vm809_vm2 = vcmask 1040384   ;;  %v1285_v63 = vlaneseq }
  0x41   : > { %2022 = vmatprep.subr.bf16.mxu0 %v2330_v6  ;;  %2030 = vmatprep.subr.bf16.mxu1 %v2330_v6  ;;  %v2205_v9 = vld [vmem:[%s2540_s14 + $0x8] sm:$0xff]   ;;  %v792_v10 = vld [vmem:[#allocation2] sm:$0xff]  ;;  %vm796_vm3 = vcmask 1041408   ;;  %vm829_vm4 = vcmask 261120   ;;  %v2206_v15 = vld [vmem:[%s2545_s9 + $0x10] sm:$0xff]   ;;  %vm1291_vm6 = vcmask 64512  }
  0x42   : > { %2023 = vmatpush3.bf16.msra.mxu0 %v2202_v5  ;;  %2026 = vmatprep.mubr.msk.bf16.mxu0 %vm2331_vm1, %v2330_v6  ;;  %v807_v11 = vrot.slane %v792_v10, 7  ;;  %v794_v12 = vrot.slane %v792_v10, 6  ;;  %v2207_v16 = vld [vmem:[%s2545_s9] sm:$0xff]   ;;  %v2208_v19 = vld [vmem:[%s2545_s9 + $0x18] sm:$0xff]   ;;  %v2209_v20 = vld [vmem:[%s2545_s9 + $0x8] sm:$0xff]   ;;  %v1042_v25 = vpack.c.bf16 %v792_v10, %v792_v10  ;;  %v1286_v0 = vshrl.u32 %v1285_v63, 7 }
  0x43   : > { %2031 = vmatpush3.bf16.msra.mxu1 %v2203_v7  ;;  %2024 = vmatprep.subr.bf16.mxu0 %v2330_v6  ;;  %v2210_v21 = vld [vmem:[%s2540_s14 + $0x20] sm:$0xff]   ;;  %v2212_v23 = vld [vmem:[%s2540_s14 + $0x28] sm:$0xff]   ;;  %v1288_v1 = vand.u32 127, %v1285_v63  ;;  %vm1310_vm7 = vcmask 1043456   ;;  %p1957_p1 = scmp.ne.s32.totalorder %s2312_s25, 1 }
  0x44   : > { %2032 = vmatprep.subr.bf16.mxu1 %v2330_v6  ;;  %2034 = vmatprep.mubr.msk.bf16.mxu1 %vm2331_vm1, %v2330_v6  ;;  %v810_v13 = vsel %vm809_vm2, 0.0, %v807_v11  ;;  %v797_v14 = vsel %vm796_vm3, 0.0, %v794_v12  ;;  %v2211_v22 = vld [vmem:[%s2545_s9 + $0x20] sm:$0xff]   ;;  %v2213_v24 = vld [vmem:[%s2545_s9 + $0x28] sm:$0xff]   ;;  %s2841_s20 = sld [smem:[#allocation25_spill]] (!%p1957_p1)  ;;  %vm2333_vm8 = vmmov (!%p1957_p1), 0  }
  0x45   : > { %v816_v17 = vpack.c.bf16 %v810_v13, %v810_v13  ;;  %v802_v18 = vpack.c.bf16 %v797_v14, %v797_v14  ;;  %v1947_v46 = vld [vmem:[%s756_s15] ss:$0 sm:$0xff]  ;;  %v2215_v62 = vld [vmem:[%s2555_s24 + $0x8] sm:$0xff]   ;;  %vm1289_vm5 = vcmp.ge.s32.totalorder %v1286_v0, %v1288_v1  ;;  %s2842_s16 = sld [smem:[#allocation27_spill]] (!%p1957_p1)  ;;  %s2843_s1 = sld [smem:[#allocation29_spill]] (!%p1957_p1)  ;;  %vm1559_vm9 = vcmask (!%p1957_p1), 523264  }
  0x46   : > { %2025 = vmatpush3.bf16.msra.mxu0 %v2204_v8  ;;  %v1946_v57 = vld [vmem:[%s748_s21] ss:$0 sm:$0xff]  ;;  %s2844_s14 = sld [smem:[#allocation30_spill]] (!%p1957_p1)  ;;  %s2845_s0 = sld [smem:[#allocation26_spill]] (!%p1957_p1)  ;;  %vm1700_vm10 = vcmask (!%p1957_p1), 7168  }
  0x47   : > { %2033 = vmatpush3.bf16.msra.mxu1 %v2205_v9  ;;  %2038 = vmatprep.subr.bf16.mxu0 %v2330_v6  ;;  %v2214_v61 = vld [vmem:[%s2555_s24] sm:$0xff]   ;;  %s2846_s28 = sld [smem:[#allocation28_spill]] (!%p1957_p1)  ;;  %s2847_s3 = sld [smem:[#allocation33_spill]] (!%p1957_p1) }
  0x48   : > { %2046 = vmatprep.subr.bf16.mxu1 %v2330_v6  ;;  %v1948_v10 = vld [vmem:[%s764_s23] ss:$0 sm:$0xff]  ;;  %s2849_s9 = sld [smem:[#allocation31_spill]] (!%p1957_p1)  ;;  %s2850_s22 = sld [smem:[#allocation32_spill]] (!%p1957_p1) }
  0x49   : > { %2027 = vmatmul.mubr.msk.bf16.vlgmr.msra.gmra.mrb[0].mxu0 %vm829_vm4, %v816_v17 }
  0x4a   : > { %2035 = vmatmul.mubr.msk.bf16.vlgmr.msra.gmra.mrb[0].mxu1 %vm829_vm4, %v802_v18  ;;  %2039 = vmatpush3.bf16.msra.mxu0 %v2206_v15 }
  0x4b   : > { %2047 = vmatpush3.bf16.msra.mxu1 %v2207_v16  ;;  %2040 = vmatprep.subr.bf16.mxu0 %v2330_v6 }
  0x4c   : > { %2048 = vmatprep.subr.bf16.mxu1 %v2330_v6  ;;  %2042 = vmatprep.mubr.msk.bf16.mxu0 %vm2331_vm1, %v2330_v6  ;;  %v1960_v63 = vld [vmem:[%s2845_s0] ss:$0 sm:$0xff] (!%p1957_p1) }
  0x4d   : > { %2050 = vmatprep.mubr.msk.bf16.mxu1 %vm2331_vm1, %v2330_v6 }
  0x4e   : > { %2041 = vmatpush3.bf16.msra.mxu0 %v2208_v19 }
  0x4f   : > { %2049 = vmatpush3.bf16.msra.mxu1 %v2209_v20  ;;  %2054 = vmatprep.subr.bf16.mxu0 %v2330_v6 }
  0x50   : > { %2062 = vmatprep.subr.bf16.mxu1 %v2330_v6 }
  0x51   : > { %2043 = vmatmul.mubr.msk.bf16.vlgmr.msra.gmra.mrb[4].mxu0 %vm829_vm4, %v816_v17 }
  0x52   : > { %2051 = vmatmul.mubr.msk.bf16.vlgmr.msra.gmra.mrb[4].mxu1 %vm829_vm4, %v802_v18  ;;  %2055 = vmatpush3.bf16.msra.mxu0 %v2210_v21 }
  0x53   : > { %2063 = vmatpush3.bf16.msra.mxu1 %v2211_v22  ;;  %2056 = vmatprep.subr.bf16.mxu0 %v2330_v6 }
  0x54   : > { %2064 = vmatprep.subr.bf16.mxu1 %v2330_v6  ;;  %2058 = vmatprep.mubr.msk.bf16.mxu0 %vm2331_vm1, %v2330_v6 }
  0x55   : > { %2066 = vmatprep.mubr.msk.bf16.mxu1 %vm2331_vm1, %v2330_v6 }
  0x56   : > { %2057 = vmatpush3.bf16.msra.mxu0 %v2212_v23  ;;  %v2216_v23 = vld [vmem:[%s2560_s10] sm:$0xff]  }
  0x57   : > { %2065 = vmatpush3.bf16.msra.mxu1 %v2213_v24  ;;  %2070 = vmatprep.subr.bf16.mxu0 %v2330_v6 }
  0x58   : > { %2078 = vmatprep.subr.bf16.mxu1 %v2330_v6 }
  0x59   : > { %2059 = vmatmul.mubr.msk.bf16.vlgmr.msra.gmra.mrb[8].mxu0 %vm829_vm4, %v1042_v25 }
  0x5a   : > { %2067 = vmatmul.mubr.msk.bf16.vlgmr.msra.gmra.mrb[8].mxu1 %vm829_vm4, %v1042_v25  ;;  %2074 = vmatprep.mubr.msk.bf16.mxu0 %vm2331_vm1, %v2330_v6 }
  0x5b   : > { %2080 = vmatprep.mubr.msk.bf16.mxu1 %vm2331_vm1, %v2330_v6  ;;  %2071 = vmatpush3.bf16.msra.mxu0 %v2214_v61  ;;  %v2226_v61 = vld [vmem:[%s2842_s16 + $0x10] sm:$0xff] (!%p1957_p1)  }
  0x5c   : > { %2072 = vmatprep.subr.bf16.mxu0 %v2330_v6 }
  0x5f   : > { %2073 = vmatpush3.bf16.msra.mxu0 %v2215_v62  ;;  %v2227_v62 = vld [vmem:[%s2842_s16 + $0x18] sm:$0xff] (!%p1957_p1)  }
  0x60   : > { %2084 = vmatprep.subr.bf16.mxu0 %v2330_v6 }
  0x62   : > { %2075 = vmatmul.mubr.msk.bf16.vlgmr.msra.gmra.mrb[12].mxu0 %vm829_vm4, %v1042_v25 }
  0x63   : > { %2086 = vmatprep.mubr.msk.bf16.mxu0 %vm2331_vm1, %v2330_v6 }
 0x11c   : > { %v867_v26 = vpop.f32.mrb[0].mxu0 }
 0x11d   : > { %v922_v27 = vpop.f32.mrb[0].mxu1  ;;  %v2028_v30 = vpop.f32.mrb[1].mxu0 }
 0x11e   : > { %v923_v28 = vadd.f32 %v922_v27, %v867_v26  ;;  %v2036_v29 = vpop.f32.mrb[1].mxu1  ;;  %v870_v32 = vpop.f32.mrb[2].mxu0 }
 0x11f   : > { %v925_v31 = vpop.f32.mrb[2].mxu1  ;;  %v2029_v34 = vpop.f32.mrb[3].mxu0 }
 0x120   : > { %v2037_v33 = vpop.f32.mrb[3].mxu1 }
 0x124   : > { %v979_v35 = vpop.f32.mrb[4].mxu0 }
 0x125   : > { %v1031_v36 = vpop.f32.mrb[4].mxu1  ;;  %v2044_v39 = vpop.f32.mrb[5].mxu0 }
 0x126   : > { %v1032_v37 = vadd.f32 %v1031_v36, %v979_v35  ;;  %v2052_v38 = vpop.f32.mrb[5].mxu1  ;;  %v982_v41 = vpop.f32.mrb[6].mxu0 }
 0x127   : > { %v1034_v40 = vpop.f32.mrb[6].mxu1  ;;  %v2045_v43 = vpop.f32.mrb[7].mxu0 }
 0x128   : > { %v2053_v42 = vpop.f32.mrb[7].mxu1 }
 0x12c   : > { %v1092_v44 = vpop.f32.mrb[8].mxu0 }
 0x12d   : > { %v1150_v45 = vpop.f32.mrb[8].mxu1  ;;  %v1098_v47 = vadd.f32 %v1092_v44, %v923_v28  ;;  %v2060_v50 = vpop.f32.mrb[9].mxu0  ;;  %v2217_v28 = vld [vmem:[%s2560_s10 + $0x8] sm:$0xff]   ;;  %s2848_s10 = smov (!%p1957_p1), %s2847_s3 }
 0x12e   : > { %v1156_v48 = vadd.f32 %v1150_v45, %v1032_v37  ;;  %v2068_v49 = vpop.f32.mrb[9].mxu1  ;;  %v1095_v52 = vpop.f32.mrb[10].mxu0  ;;  %v2225_v50 = vld [vmem:[%s2842_s16 + $0x8] sm:$0xff] (!%p1957_p1)  }
 0x12f   : > { %v1153_v51 = vpop.f32.mrb[10].mxu1  ;;  %v2061_v55 = vpop.f32.mrb[11].mxu0  ;;  %v1164_v59 = vadd.f32 %v1946_v57, %v1098_v47  ;;  %v2332_v47 = vmov (!%p1957_p1), 0.0   ;;  %v2224_v49 = vld [vmem:[%s2842_s16] sm:$0xff] (!%p1957_p1)  }
 0x130   : > { %v1172_v53 = vadd.f32 %v1947_v46, %v1156_v48  ;;  %v2069_v54 = vpop.f32.mrb[11].mxu1  ;;  %v2222_v46 = vld [vmem:[%s2841_s20] sm:$0xff] (!%p1957_p1)   ;;  %v2223_v48 = vld [vmem:[%s2841_s20 + $0x8] sm:$0xff] (!%p1957_p1)  }
 0x131   : > { %v1236_v60 = vpack.c.bf16 %v1164_v59, %v1164_v59  ;;  %v1958_v55 = vld [vmem:[%s2843_s1] ss:$0 sm:$0xff] (!%p1957_p1) }
 0x132   : > { %v1237_v56 = vpack.c.bf16 %v1172_v53, %v1172_v53  ;;  %v1959_v57 = vld [vmem:[%s2844_s14] ss:$0 sm:$0xff] (!%p1957_p1) }
 0x134   : > { %v1242_v58 = vsel %vm829_vm4, %v1237_v56, 0 }
 0x135   : > { %2079 = vmatpush3.bf16.xpose.msra.mxu1 %v1242_v58  ;;  %v1230_v11 = vpop.f32.mrb[12].mxu0 }
 0x136   : > { %2090 = vmatprep.subr.bf16.mxu1 %v2330_v6  ;;  %v1231_v12 = vadd.f32 %v1948_v10, %v1230_v11  ;;  %v2076_v13 = vpop.f32.mrb[13].mxu0 }
 0x137   : > { %v1233_v14 = vpop.f32.mrb[14].mxu0 }
 0x138   : > { %v1306_v15 = vpack.c.bf16 %v1231_v12, %v1231_v12  ;;  %v2077_v16 = vpop.f32.mrb[15].mxu0 }
 0x13a   : > { %v1312_v17 = vsel %vm1310_vm7, %v1306_v15, 0 }
 0x13b   : > { %2085 = vmatpush3.bf16.msra.mxu0 %v1312_v17 }
 0x13c   : > { %2081 = vmatmul.mubr.msk.bf16.vlgmr.msra.gmra.mrb[12].mxu1 %vm829_vm4, %v1236_v60  ;;  %2098 = vmatprep.subr.bf16.mxu0 (!%p1957_p1), %v2332_v47 }
 0x13d   : > { %2094 = vmatprep.mubr.msk.bf16.mxu1 %vm2331_vm1, %v2330_v6  ;;  %2091 = vmatpush3.bf16.msra.mxu1 %v2216_v23 }
 0x13e   : > { %2092 = vmatprep.subr.bf16.mxu1 %v2330_v6  ;;  %v1304_v6 = vld [vmem:[#allocation3] sm:$0xff] }
 0x141   : > { %2093 = vmatpush3.bf16.msra.mxu1 %v2217_v28 }
 0x142   : > { %2106 = vmatprep.subr.bf16.mxu1 (!%p1957_p1), %v2332_v47 }
 0x20f   : > { %v1278_v2 = vpop.f32.mrb[12].mxu1 }
 0x210   : > { %v1284_v3 = vmul.f32 0.17677669, %v1278_v2  ;;  %v2082_v4 = vpop.f32.mrb[13].mxu1 }
 0x211   : > { %v1281_v5 = vpop.f32.mrb[14].mxu1 }
 0x212   : > { %v2083_v7 = vpop.f32.mrb[15].mxu1  ;;  %v1290_v8 = vsel %vm1289_vm5, %v1284_v3, -1e+09 }
 0x213   : > { %v1292_v9 = vsel %vm1291_vm6, %v1290_v8, -inf }
 0x214   : > { %1293 = vmax.xlane.f32.xlu0 %v1292_v9 }
 0x2a1   : > { %v1294_v18 = vpop.xlane.xlu0 %1293 }
 0x2a2   : > { %v1295_v19 = vsub.f32 %v1290_v8, %v1294_v18  ;;  %v1964_v8 = vld [vmem:[%s2846_s28] ss:$0 sm:$0xff] (!%p1957_p1) }
 0x2a4   : > { %v1296_v20 = vmul.f32 1.442695, %v1295_v19 }
 0x2a6   : > { %2218 = vpow2.f32 %v1296_v20 }
 0x2b0   : > { %v2219_v21 = vpop.eup %2218 }
 0x2b1   : > { %v1298_v22 = vsel %vm1291_vm6, %v2219_v21, 0.0 }
 0x2b2   : > { %1299 = vadd.xlane.f32.xlu0 %v1298_v22  ;;  %v2229_v22 = vld [vmem:[%s2848_s10 + $0x8] sm:$0xff] (!%p1957_p1)  }
 0x33f   : > { %v1300_v24 = vpop.xlane.xlu0 %1299 }
 0x340   : > { %2220 = vrcp.f32 %v1300_v24 }
 0x34a   : > { %v2221_v25 = vpop.eup %2220 }
 0x34b   : > { %v1302_v26 = vmul.f32 %v2221_v25, %v2219_v21  ;;  %v2228_v21 = vld [vmem:[%s2847_s3] sm:$0xff] (!%p1957_p1)  }
 0x34d   : > { %1303 = vst.msk [vmem:[%s736_s13] sm:$0xff] %vm1291_vm6, %v1302_v26  ;;  %v1305_v27 = vpack.c.bf16 %v1302_v26, %v1302_v26 }
 0x34f   : > { %2087 = vmatmul.mubr.msk.bf16.vlgmr.msra.gmra.mrb[16].mxu0 %vm1291_vm6, %v1305_v27  ;;  %v1970_v27 = vld [vmem:[%s2849_s9] ss:$0 sm:$0xff] (!%p1957_p1) }
 0x350   : > { %2102 = vmatprep.mubr.msk.bf16.mxu0 (!%p1957_p1), %vm2333_vm8, %v2332_v47  ;;  %2099 = vmatpush3.bf16.msra.mxu0 (!%p1957_p1), %v2222_v46 }
 0x351   : > { %2100 = vmatprep.subr.bf16.mxu0 (!%p1957_p1), %v2332_v47 }
 0x354   : > { %2101 = vmatpush3.bf16.msra.mxu0 (!%p1957_p1), %v2223_v48 }
 0x355   : > { %2118 = vmatprep.subr.bf16.mxu0 (!%p1957_p1), %v2332_v47 }
 0x422   : > { %v1348_v29 = vpop.f32.mrb[16].mxu0 }
 0x423   : > { %v1358_v30 = vpack.c.bf16 %v1348_v29, %v1348_v29  ;;  %v2088_v31 = vpop.f32.mrb[17].mxu0  ;;  %v1971_v29 = vld [vmem:[%s2850_s22] ss:$0 sm:$0xff] (!%p1957_p1) }
 0x424   : > { %v1351_v32 = vpop.f32.mrb[18].mxu0 }
 0x425   : > { %v2089_v33 = vpop.f32.mrb[19].mxu0  ;;  %2095 = vmatmul.mubr.msk.bf16.vlgmr.msra.gmra.mrb[16].mxu1 %vm829_vm4, %v1358_v30 }
 0x426   : > { %2114 = vmatprep.mubr.msk.bf16.mxu1 (!%p1957_p1), %vm2333_vm8, %v2332_v47  ;;  %2107 = vmatpush3.bf16.msra.mxu1 (!%p1957_p1), %v2224_v49  ;;  %v1972_v33 = vld [vmem:[#allocation4] ss:$0 sm:$0xff] (!%p1957_p1) }
 0x427   : > { %2108 = vmatprep.subr.bf16.mxu1 (!%p1957_p1), %v2332_v47 }
 0x42a   : > { %2109 = vmatpush3.bf16.msra.mxu1 (!%p1957_p1), %v2225_v50 }
 0x42b   : > { %2110 = vmatprep.subr.bf16.mxu1 (!%p1957_p1), %v2332_v47 }
 0x42e   : > { %2111 = vmatpush3.bf16.msra.mxu1 (!%p1957_p1), %v2226_v61 }
 0x42f   : > { %2112 = vmatprep.subr.bf16.mxu1 (!%p1957_p1), %v2332_v47 }
 0x432   : > { %2113 = vmatpush3.bf16.msra.mxu1 (!%p1957_p1), %v2227_v62 }
 0x4f5   : > { %1419 = sbr.rel (%p1957_p1) target bundleno = 2562 (0xa02), region = 104 }
 0x4f8   : > { %v1408_v34 = vpop.f32.mrb[16].mxu1 }
 0x4f9   : > { %v1414_v35 = vadd.f32 %v1408_v34, %v1304_v6  ;;  %v2096_v36 = vpop.f32.mrb[17].mxu1 }
 0x4fa   : > { %v1411_v37 = vpop.f32.mrb[18].mxu1 }
 0x4fb   : > { %1415 = vst.msk [vmem:[#allocation3] sm:$0xff] %vm829_vm4, %v1414_v35  ;;  %v2097_v38 = vpop.f32.mrb[19].mxu1 }
 0x502   : > { %v1420_v39 = vld [vmem:[#allocation3] sm:$0xff] }
 0x503   : > { %v1423_v40 = vsel %vm829_vm4, %v1420_v39, 0.0 }
 0x504   : > { %1424 = vadd.xlane.f32.xlu0 %v1423_v40 }
 0x591   : > { %v1425_v41 = vpop.xlane.xlu0 %1424 }
 0x592   : > { %v1427_v42 = vmul.f32 0.03125, %v1425_v41 }
 0x594   : > { %v1428_v43 = vsub.f32 %v1420_v39, %v1427_v42 }
 0x596   : > { %v1429_v44 = vmul.f32 %v1428_v43, %v1428_v43 }
 0x598   : > { %v1430_v45 = vsel %vm829_vm4, %v1429_v44, 0.0 }
 0x599   : > { %1431 = vadd.xlane.f32.xlu0 %v1430_v45 }
 0x626   : > { %v1432_v51 = vpop.xlane.xlu0 %1431 }
 0x627   : > { %v1433_v52 = vmul.f32 0.03125, %v1432_v51 }
 0x629   : > { %v1434_v53 = vadd.f32 1e-05, %v1433_v52 }
 0x62b   : > { %2230 = vrsqrt.f32 %v1434_v53 }
 0x635   : > { %v2231_v54 = vpop.eup %2230 }
 0x636   : > { %v1436_v56 = vmul.f32 %v2231_v54, %v1428_v43 }
 0x638   : > { %v1443_v58 = vmul.f32 %v1958_v55, %v1436_v56 }
 0x63a   : > { %v1450_v59 = vadd.f32 %v1959_v57, %v1443_v58 }
 0x63c   : > { %v1455_v60 = vpack.c.bf16 %v1450_v59, %v1450_v59 }
 0x63e   : > { %2103 = vmatmul.mubr.msk.bf16.vlgmr.msra.gmra.mrb[0].mxu0 %vm829_vm4, %v1455_v60 }
 0x63f   : > { %2122 = vmatprep.mubr.msk.bf16.mxu0 %vm2333_vm8, %v2332_v47  ;;  %2119 = vmatpush3.bf16.msra.mxu0 %v2228_v21 }
 0x640   : > { %2120 = vmatprep.subr.bf16.mxu0 %v2332_v47 }
 0x643   : > { %2121 = vmatpush3.bf16.msra.mxu0 %v2229_v22 }
 0x711   : > { %v1512_v0 = vpop.f32.mrb[0].mxu0 }
 0x712   : > { %v1513_v1 = vadd.f32 %v1960_v63, %v1512_v0  ;;  %v2104_v2 = vpop.f32.mrb[1].mxu0 }
 0x713   : > { %v1515_v3 = vpop.f32.mrb[2].mxu0 }
 0x714   : > { %v1518_v4 = vmax.f32 %v1513_v1, 0.0  ;;  %v2105_v5 = vpop.f32.mrb[3].mxu0 }
 0x716   : > { %v1527_v7 = vpack.c.bf16 %v1518_v4, %v1518_v4 }
 0x718   : > { %2115 = vmatmul.mubr.msk.bf16.vlgmr.msra.gmra.mrb[0].mxu1 %vm1559_vm9, %v1527_v7 }
 0x7eb   : > { %v1597_v9 = vpop.f32.mrb[0].mxu1 }
 0x7ec   : > { %v1598_v10 = vadd.f32 %v1964_v8, %v1597_v9  ;;  %v2116_v11 = vpop.f32.mrb[1].mxu1 }
 0x7ed   : > { %v1600_v12 = vpop.f32.mrb[2].mxu1 }
 0x7ee   : > { %v2117_v13 = vpop.f32.mrb[3].mxu1  ;;  %v1603_v14 = vadd.f32 %v1598_v10, %v1450_v59 }
 0x7f0   : > { %v1606_v15 = vsel %vm829_vm4, %v1603_v14, 0.0 }
 0x7f1   : > { %1607 = vadd.xlane.f32.xlu1 %v1606_v15 }
 0x87e   : > { %v1608_v16 = vpop.xlane.xlu1 %1607 }
 0x87f   : > { %v1609_v17 = vmul.f32 0.03125, %v1608_v16 }
 0x881   : > { %v1610_v18 = vsub.f32 %v1603_v14, %v1609_v17 }
 0x883   : > { %v1611_v19 = vmul.f32 %v1610_v18, %v1610_v18 }
 0x885   : > { %v1612_v20 = vsel %vm829_vm4, %v1611_v19, 0.0 }
 0x886   : > { %1613 = vadd.xlane.f32.xlu1 %v1612_v20 }
 0x913   : > { %v1614_v23 = vpop.xlane.xlu1 %1613 }
 0x914   : > { %v1615_v24 = vmul.f32 0.03125, %v1614_v23 }
 0x916   : > { %v1616_v25 = vadd.f32 1e-05, %v1615_v24 }
 0x918   : > { %2232 = vrsqrt.f32 %v1616_v25 }
 0x922   : > { %v2233_v26 = vpop.eup %2232 }
 0x923   : > { %v1618_v28 = vmul.f32 %v2233_v26, %v1610_v18 }
 0x925   : > { %v1625_v30 = vmul.f32 %v1970_v27, %v1618_v28 }
 0x927   : > { %v1632_v31 = vadd.f32 %v1971_v29, %v1625_v30 }
 0x929   : > { %v1637_v32 = vpack.c.bf16 %v1632_v31, %v1632_v31 }
 0x92b   : > { %2123 = vmatmul.mubr.msk.bf16.vlgmr.msra.gmra.mrb[4].mxu0 %vm829_vm4, %v1637_v32 }
 0x9fe   : > { %v1694_v6 = vpop.f32.mrb[4].mxu0 }
 0x9ff   : > { %v1695_v34 = vadd.f32 %v1972_v33, %v1694_v6  ;;  %v2124_v35 = vpop.f32.mrb[5].mxu0 }
 0xa00   : > { %v1697_v36 = vpop.f32.mrb[6].mxu0 }
 0xa01   : > { %1701 = vst.msk [vmem:[%s2565_s11] sm:$0xff] %vm1700_vm10, %v1695_v34  ;;  %v2125_v37 = vpop.f32.mrb[7].mxu0 }
 0xa02 PF: > { %s2851_s30 = sld [smem:[#allocation11_spill]]  ;;  %s1725_s29 = sshll.u32 %s736_s13, 4  ;;  %s2715_s29 = int_to_ptr.vmem [resolvable:$true] %s1725_s29 }
 0xa03   : > { %s2852_s27 = sld [smem:[#allocation9_spill]]  ;;  %s2854_s24 = sld [smem:[#allocation34_spill]] }
 0xa04   : > { %s2234_s1 = scalar_lea.vmem %s2715_s29, 128 }
 0xa05   : > { %p2235_p2 = scmp.ne.s32.totalorder %s2715_s29, %s2234_s1 }
 0xa07   : > { %p2236_p4 = pnand %p2235_p2, %p2494_p3 }
 0xa08   : > { %s1977_s21 = sshll.u32 %s2851_s30, 1 }
 0xa09   : > { %s1721_s0 = sadd.s32 %s2312_s25, %s1977_s21  ;;  %s2855_s12 = smov %s2854_s24 }
 0xa0a   : > { %s1978_s23 = sshll.u32 %s1721_s0, 7  ;;  %s2856_s3 = sand.u32 1, %s2852_s27  }
 0xa0b   : > { %s1723_s11 = scalar_lea.hbm %s2854_s24, %s1978_s23  ;;  %s1707_s17 = scalar_lea.sflag [#allocation6], %s2856_s3 }
 0xa0c   : > { %p2237_p5 = pneg %p2236_p4  ;;  %s2334_s25 = smov [#allocation5]  }
 0xa0d   : > { %s2238_s26 = sshll.u32 %s2334_s25, 4  ;;  %s2239_s26 = int_to_ptr.vmem [resolvable:$false] %s2238_s26 }
 0xa0e   : > { %s2240_s13 = scalar_lea.vmem %s2239_s26, 256  ;;  %p2241_p6 = scmp.lt.s32.totalorder %s2715_s29, %s2239_s26 }
 0xa0f   : > { %p2242_p7 = scmp.lt.s32.totalorder %s2240_s13, %s2234_s1 }
 0xa11   : > { %p2243_p9 = por %p2242_p7, %p2241_p6 }
 0xa13   : > { %p2244_p10 = pnand %p2243_p9, %p2237_p5 }
 0xa15   : > { %2247 = shalt.err (!%p2244_p10)
}
 0xa16   : > { %s2248_s18 = scalar_lea.hbm %s1723_s11, 128  ;;  %s2252_s2 = scalar_lea.hbm %s2855_s12, 512 }
 0xa17   : > { %p2249_p11 = scmp.ne.s32.totalorder %s1723_s11, %s2248_s18  ;;  %p2253_p0 = scmp.lt.u32.totalorder %s1723_s11, %s2855_s12 }
 0xa18   : > { %p2254_p1 = scmp.lt.u32.totalorder %s2252_s2, %s2248_s18  ;;  %p2256_p4 = scmp.lt.u32.totalorder %s2248_s18, %s1723_s11 }
 0xa19   : > { %p2250_p12 = pnand %p2249_p11, %p2494_p3 }
 0xa1a   : > { %p2255_p2 = por %p2254_p1, %p2253_p0 }
 0xa1b   : > { %p2251_p13 = pneg %p2250_p12 }
 0xa1c   : > { %p2257_p6 = por %p2256_p4, %p2255_p2 }
 0xa1e   : > { %p2258_p5 = pnand %p2257_p6, %p2251_p13 }
 0xa20   : > { %2261 = shalt.err (!%p2258_p5)
}
 0xa21   : > { %2127 = dma.vmem_to_hbm [thread:$0]  (%p2494_p3), %s2715_s29, 128, %s1723_s11, %s1707_s17  }
 0xa22 PF: > { %s2857_s27 = sld [smem:[#allocation14_spill]]  ;;  %s2858_s21 = sld [smem:[#allocation8_spill]] }
 0xa28   : > { %p2133_p7 = scmp.ge.s32.totalorder %s2857_s27, 2  ;;  %s1744_s23 = sand.u32 1, %s2858_s21  }
 0xa29   : > { %s1745_s28 = scalar_lea.sflag [#allocation6], %s1744_s23 }
 0xa2a   : > { %p2130_p9 = pnand %p2133_p7, %p2503_p8 }
 0xa2c   : > { %2295 = dma.done.wait (!%p2130_p9), %s1745_s28, 128  }
 0xa2d   : > { %2297 = vsyncadd (!%p2130_p9), %s1745_s28, 4294967168  ;;  %s36_s28 = sadd.s32 1, %s2857_s27   ;;  %s2860_s23 = sld [smem:[#allocation9_spill]] }
 0xa2e   : > { %p33_p10 = scmp.ge.s32.totalorder %s36_s28, 6   ;;  %s2861_s24 = sld [smem:[#allocation10_spill]] }
 0xa2f   : > { %s2862_s2 = sld [smem:[#allocation19_spill]]  ;;  %s2863_s25 = sld [smem:[#allocation12_spill]] }
 0xa30   : > { %s2864_s3 = sld [smem:[#allocation13_spill]]  ;;  %s2865_s26 = sld [smem:[#allocation15_spill]] }
 0xa31   : > { %s2866_s27 = sld [smem:[#allocation17_spill]]  ;;  %35 = sbr.rel (!%p33_p10) target bundleno = 21 (0x15), region = 176 }
 0xa38   :  { %1750 = vsyncpa [#allocation6], 1 }
 0xa39   :  { %1752 = vsyncpa [#allocation6 + $0x1], 1 }

// kernel: forward.2
= control target key start
LH: loop header
LB: loop body
LE: loop exit
PB: predicated region body
PF: predicated region fallthrough
CT: control target
= control target key end

     0   :  { %s3491_s0 = inlined_call_operand.vmem [shape: f32[2,8,4], index: 0, kind: input, shape index: {}]   ;;  %s3492_s1 = inlined_call_operand.vmem [shape: bf16[4,32], index: 1, kind: input, shape index: {}]   ;;  %s3493_s2 = inlined_call_operand.vmem [shape: f32[1,32], index: 2, kind: input, shape index: {}]   ;;  %s3494_s3 = inlined_call_operand.vmem [shape: f32[8,32], index: 3, kind: input, shape index: {}]   ;;  %s3495_s4 = inlined_call_operand.vmem [shape: bf16[2,3,32,32], index: 4, kind: input, shape index: {}]   ;;  %s3496_s5 = inlined_call_operand.vmem [shape: f32[2,1,32], index: 5, kind: input, shape index: {}]   ;;  %s3497_s6 = inlined_call_operand.vmem [shape: bf16[2,3,32,32], index: 6, kind: input, shape index: {}]   ;;  %s3498_s7 = inlined_call_operand.hbm [shape: f32[2,1,32], index: 7, kind: input, shape index: {}]   ;;  %s3499_s8 = inlined_call_operand.vmem [shape: bf16[2,32,32], index: 8, kind: input, shape index: {}]   ;;  %s3500_s9 = inlined_call_operand.vmem [shape: f32[2,1,32], index: 9, kind: input, shape index: {}]   ;;  %s3501_s10 = inlined_call_operand.hbm [shape: bf16[2,32,32], index: 10, kind: input, shape index: {}]   ;;  %s3502_s11 = inlined_call_operand.hbm [shape: f32[1,32], index: 11, kind: input, shape index: {}]   ;;  %s3503_s12 = inlined_call_operand.hbm [shape: bf16[32,64], index: 12, kind: input, shape index: {}]   ;;  %s3504_s13 = inlined_call_operand.hbm [shape: f32[1,64], index: 13, kind: input, shape index: {}]   ;;  %s3505_s14 = inlined_call_operand.vmem [shape: bf16[64,32], index: 14, kind: input, shape index: {}]   ;;  %s3506_s15 = inlined_call_operand.hbm [shape: f32[1,32], index: 15, kind: input, shape index: {}]   ;;  %s3507_s16 = inlined_call_operand.vmem [shape: f32[1,32], index: 16, kind: input, shape index: {}]   ;;  %s3508_s17 = inlined_call_operand.vmem [shape: f32[1,32], index: 17, kind: input, shape index: {}]   ;;  %s3509_s18 = inlined_call_operand.vmem [shape: f32[1,32], index: 18, kind: input, shape index: {}]   ;;  %s3510_s19 = inlined_call_operand.vmem [shape: f32[1,32], index: 19, kind: input, shape index: {}]   ;;  %s3511_s20 = inlined_call_operand.vmem [shape: bf16[2,8,32], index: 20, kind: output, shape index: {0}]   ;;  %s3512_s21 = inlined_call_operand.hbm [shape: f32[2,2,8,8], index: 21, kind: output, shape index: {1}]  }
   0x1   :  { %3535 = sst [smem:[#allocation36_spill]] %s3491_s0 }
   0x2   :  { %3536 = sst [smem:[#allocation37_spill]] %s3492_s1 }
   0x3   :  { %3537 = sst [smem:[#allocation38_spill]] %s3493_s2 }
   0x4   :  { %3538 = sst [smem:[#allocation39_spill]] %s3494_s3 }
   0x5   :  { %3539 = sst [smem:[#allocation40_spill]] %s3495_s4 }
   0x6   :  { %3540 = sst [smem:[#allocation41_spill]] %s3496_s5 }
   0x7   :  { %3541 = sst [smem:[#allocation42_spill]] %s3497_s6 }
   0x8   :  { %3542 = sst [smem:[#allocation43_spill]] %s3498_s7 }
   0x9   :  { %3543 = sst [smem:[#allocation44_spill]] %s3499_s8 }
   0xa   :  { %3544 = sst [smem:[#allocation45_spill]] %s3500_s9 }
   0xb   :  { %3545 = sst [smem:[#allocation46_spill]] %s3501_s10 }
   0xc   :  { %3546 = sst [smem:[#allocation47_spill]] %s3502_s11 }
   0xd   :  { %3547 = sst [smem:[#allocation48_spill]] %s3503_s12 }
   0xe   :  { %3548 = sst [smem:[#allocation49_spill]] %s3504_s13 }
   0xf   :  { %3549 = sst [smem:[#allocation50_spill]] %s3505_s14 }
  0x10   :  { %3550 = sst [smem:[#allocation51_spill]] %s3506_s15 }
  0x11   :  { %3551 = sst [smem:[#allocation52_spill]] %s3507_s16 }
  0x12   :  { %3552 = sst [smem:[#allocation53_spill]] %s3508_s17 }
  0x13   :  { %3553 = sst [smem:[#allocation54_spill]] %s3509_s18 }
  0x14   :  { %3554 = sst [smem:[#allocation55_spill]] %s3510_s19 }
  0x15   :  { %3555 = sst [smem:[#allocation56_spill]] %s3511_s20 }
  0x16   :  { %3556 = sst [smem:[#allocation57_spill]] %s3512_s21 }
  0x17   :  { %27 = vsyncpa [#allocation5], 0 }
  0x18   :  { %29 = vsyncpa [#allocation5 + $0x1], 0 }
  0x19   :  { %30 = vsyncpa [#allocation8], 0 }
  0x1a   :  { %32 = vsyncpa [#allocation8 + $0x1], 0 }
  0x1b   :  { %33 = vsyncpa [#allocation11], 0 }
  0x1c   :  { %34 = vsyncpa [#allocation14], 0 }
  0x1d   :  { %35 = vsyncpa [#allocation6], 0 }
  0x1e   :  { %37 = vsyncpa [#allocation6 + $0x1], 0  ;;  %s2925_s2 = smov 0   ;;  %s2927_s25 = smov 0  }
  0x1f   :  { %s2929_s26 = smov 0   ;;  %s2931_s27 = smov 0  }
  0x20   :  { %s2933_s3 = smov 0   ;;  %s2935_s28 = smov 0  }
  0x21   :  { %s2937_s29 = smov 0   ;;  %s2939_s0 = smov 0  }
  0x22   :  { %s2941_s4 = smov 0   ;;  %s2943_s30 = smov 0  }
  0x23   :  { %s2945_s5 = smov 0  }
  0x24 LB: > { %3557 = sst [smem:[#allocation22_spill]] %s2758_s2  ;;  %s2981_s22 = sadd.s32 4294967295, %s2798_s5   ;;  %s2798_s5 = sphi %s2945_s5, %s43_s5   ;;  %s2794_s30 = sphi %s2943_s30, %s3636_s30   ;;  %s2790_s4 = sphi %s2941_s4, %s3635_s4   ;;  %s2786_s0 = sphi %s2939_s0, %s3634_s0   ;;  %s2782_s29 = sphi %s2937_s29, %s3633_s29   ;;  %s2778_s28 = sphi %s2935_s28, %s3632_s28   ;;  %s2774_s3 = sphi %s2933_s3, %s3631_s3   ;;  %s2770_s27 = sphi %s2931_s27, %s3630_s27   ;;  %s2766_s26 = sphi %s2929_s26, %s3629_s26   ;;  %s2762_s25 = sphi %s2927_s25, %s3638_s25   ;;  %s2758_s2 = sphi %s2925_s2, %s3637_s2  }
  0x25   : > { %3558 = sst [smem:[#allocation23_spill]] %s2766_s26  ;;  %p2067_p0 = scmp.ge.s32.totalorder %s2798_s5, 1 }
  0x26   : > { %3559 = sst [smem:[#allocation24_spill]] %s2774_s3  ;;  %p3515_p1 = scmp.eq.s32.totalorder %s2981_s22, 0 }
  0x27   : > { %3560 = sst [smem:[#allocation25_spill]] %s2778_s28  ;;  %p574_p3 = scmp.lt.s32.totalorder %s2798_s5, 5 }
  0x28   : > { %3561 = sst [smem:[#allocation26_spill]] %s2782_s29  ;;  %s2800_s1 = smov [#allocation9]  }
  0x29   : > { %3562 = sst [smem:[#allocation27_spill]] %s2786_s0  ;;  %p2987_p4 = pnand %p2067_p0, %p574_p3 }
  0x2a   : > { %3563 = sst [smem:[#allocation28_spill]] %s2790_s4  ;;  %s596_s24 = sshll.u32 %s2800_s1, 4  ;;  %s597_s24 = int_to_ptr.vmem [resolvable:$true] %s596_s24 }
  0x2b   : > { %3564 = sst [smem:[#allocation29_spill]] %s2794_s30  ;;  %p2324_p5 = pneg %p2987_p4 }
  0x2c   : > { %s3565_s23 = scalar_select %p2987_p4, 1, 0 }
  0x2d   : > { %s2801_s21 = smov [#allocation10]   ;;  %p2997_p6 = pnand %p2324_p5, %p3515_p1 }
  0x2e   : > { %3566 = sst [smem:[#allocation30_spill]] %s3565_s23  ;;  %s606_s19 = sshll.u32 %s2801_s21, 4  ;;  %s2993_s19 = int_to_ptr.vmem [resolvable:$true] %s606_s19 }
  0x2f   : > { %s2802_s17 = smov [#allocation12]   ;;  %s3568_s11 = sld [smem:[#allocation47_spill]] }
  0x30   : > { %s3001_s16 = sshll.u32 %s2802_s17, 4  ;;  %p3011_p8 = pneg %p2997_p6  ;;  %s621_s16 = int_to_ptr.vmem [resolvable:$true] %s3001_s16 }
  0x35   : > { %s2488_s1 = scalar_lea.hbm %s3568_s11, 16 }
  0x36   : > { %p2489_p7 = scmp.ne.s32.totalorder %s3568_s11, %s2488_s1  ;;  %p2495_p11 = scmp.lt.u32.totalorder %s2488_s1, %s3568_s11 }
  0x38   : > { %p2491_p9 = pnand %p3011_p8, %p2489_p7 }
  0x3a   : > { %p2492_p10 = pneg %p2491_p9 }
  0x3c   : > { %p2497_p12 = pnand %p2495_p11, %p2492_p10 }
  0x3e   : > { %2500 = shalt.err (!%p2497_p12)
}
  0x3f   : > { %s2501_s14 = scalar_lea.vmem %s597_s24, 16  ;;  %s2508_s8 = scalar_lea.vmem %s597_s24, 32 }
  0x40   : > { %p2502_p13 = scmp.ne.s32.totalorder %s597_s24, %s2501_s14  ;;  %p2509_p5 = scmp.lt.s32.totalorder %s597_s24, %s597_s24 }
  0x41   : > { %p2510_p2 = scmp.lt.s32.totalorder %s2508_s8, %s2501_s14 }
  0x42   : > { %p2504_p0 = pnand %p2502_p13, %p3011_p8 }
  0x43   : > { %p2511_p1 = por %p2510_p2, %p2509_p5 }
  0x44   : > { %p2505_p3 = pneg %p2504_p0 }
  0x46   : > { %p2512_p4 = pnand %p2511_p1, %p2505_p3 }
  0x48   : > { %2515 = shalt.err (!%p2512_p4)
}
  0x49   : > { %2327 = dma.hbm_to_vmem [thread:$0]  (!%p2997_p6), %s3568_s11, 16, %s597_s24, [#allocation8]  }
  0x4a   : > { %s3570_s12 = sld [smem:[#allocation48_spill]] }
  0x50   : > { %s2516_s17 = scalar_lea.hbm %s3570_s12, 256 }
  0x51   : > { %p2517_p7 = scmp.ne.s32.totalorder %s3570_s12, %s2516_s17  ;;  %p2523_p1 = scmp.lt.u32.totalorder %s2516_s17, %s3570_s12 }
  0x53   : > { %p2519_p9 = pnand %p2517_p7, %p3011_p8 }
  0x55   : > { %p2520_p2 = pneg %p2519_p9 }
  0x57   : > { %p2525_p4 = pnand %p2523_p1, %p2520_p2 }
  0x59   : > { %2528 = shalt.err (!%p2525_p4)
}
  0x5a   : > { %s2529_s24 = scalar_lea.vmem %s2993_s19, 256  ;;  %p2537_p13 = scmp.lt.s32.totalorder %s2993_s19, %s2993_s19 }
  0x5b   : > { %p2530_p10 = scmp.ne.s32.totalorder %s2993_s19, %s2529_s24  ;;  %p2538_p0 = scmp.lt.s32.totalorder %s2529_s24, %s2529_s24 }
  0x5d   : > { %p2532_p11 = pnand %p2530_p10, %p3011_p8  ;;  %p2539_p3 = por %p2538_p0, %p2537_p13 }
  0x5f   : > { %p2533_p12 = pneg %p2532_p11 }
  0x61   : > { %p2540_p5 = pnand %p2539_p3, %p2533_p12 }
  0x63   : > { %2543 = shalt.err (!%p2540_p5)
}
  0x64   : > { %s3521_s29 = smov 64   ;;  %s3522_s0 = smov 4  }
  0x65   : > { %2330 = dma.hbm_to_vmem [thread:$0]  (!%p2997_p6), %s3570_s12, 256, %s2993_s19, [#allocation11], %s3521_s29, %s3521_s29, %s3522_s0  }
  0x66   : > { %s2805_s6 = smov [#allocation13]   ;;  %s3571_s13 = sld [smem:[#allocation49_spill]] }
  0x67   : > { %s634_s1 = sshll.u32 %s2805_s6, 4  ;;  %s635_s1 = int_to_ptr.vmem [resolvable:$true] %s634_s1 }
  0x6c   : > { %s2544_s8 = scalar_lea.hbm %s3571_s13, 16 }
  0x6d   : > { %p2545_p7 = scmp.ne.s32.totalorder %s3571_s13, %s2544_s8  ;;  %p2551_p1 = scmp.lt.u32.totalorder %s2544_s8, %s3571_s13 }
  0x6f   : > { %p2547_p9 = pnand %p2545_p7, %p3011_p8 }
  0x71   : > { %p2548_p2 = pneg %p2547_p9 }
  0x73   : > { %p2553_p4 = pnand %p2551_p1, %p2548_p2 }
  0x75   : > { %2556 = shalt.err (!%p2553_p4)
}
  0x76   : > { %s2557_s19 = scalar_lea.vmem %s621_s16, 16  ;;  %s2564_s9 = scalar_lea.vmem %s621_s16, 32 }
  0x77   : > { %p2558_p10 = scmp.ne.s32.totalorder %s621_s16, %s2557_s19  ;;  %p2565_p13 = scmp.lt.s32.totalorder %s621_s16, %s621_s16 }
  0x78   : > { %p2566_p0 = scmp.lt.s32.totalorder %s2564_s9, %s2557_s19 }
  0x79   : > { %p2560_p11 = pnand %p2558_p10, %p3011_p8 }
  0x7a   : > { %p2567_p3 = por %p2566_p0, %p2565_p13 }
  0x7b   : > { %p2561_p12 = pneg %p2560_p11 }
  0x7d   : > { %p2568_p5 = pnand %p2567_p3, %p2561_p12 }
  0x7f   : > { %2571 = shalt.err (!%p2568_p5)
}
  0x80   : > { %2333 = dma.hbm_to_vmem [thread:$0]  (!%p2997_p6), %s3571_s13, 16, %s621_s16, [#allocation11]  }
  0x81   : > { %s3572_s15 = sld [smem:[#allocation51_spill]] }
  0x87   : > { %s2572_s6 = scalar_lea.hbm %s3572_s15, 16 }
  0x88   : > { %p2573_p7 = scmp.ne.s32.totalorder %s3572_s15, %s2572_s6  ;;  %p2579_p1 = scmp.lt.u32.totalorder %s2572_s6, %s3572_s15 }
  0x8a   : > { %p2575_p9 = pnand %p2573_p7, %p3011_p8 }
  0x8c   : > { %p2576_p2 = pneg %p2575_p9 }
  0x8e   : > { %p2581_p4 = pnand %p2579_p1, %p2576_p2 }
  0x90   : > { %2584 = shalt.err (!%p2581_p4)
}
  0x91   : > { %s2585_s19 = scalar_lea.vmem %s635_s1, 16  ;;  %s2592_s16 = scalar_lea.vmem %s635_s1, 32 }
  0x92   : > { %p2586_p10 = scmp.ne.s32.totalorder %s635_s1, %s2585_s19  ;;  %p2593_p13 = scmp.lt.s32.totalorder %s635_s1, %s635_s1 }
  0x93   : > { %p2594_p0 = scmp.lt.s32.totalorder %s2592_s16, %s2585_s19 }
  0x94   : > { %p2588_p11 = pnand %p2586_p10, %p3011_p8 }
  0x95   : > { %p2595_p3 = por %p2594_p0, %p2593_p13 }
  0x96   : > { %p2589_p12 = pneg %p2588_p11 }
  0x98   : > { %p2596_p5 = pnand %p2595_p3, %p2589_p12 }
  0x9a   : > { %2599 = shalt.err (!%p2596_p5)
}
  0x9b   : > { %2336 = dma.hbm_to_vmem [thread:$0]  (!%p2997_p6), %s3572_s15, 16, %s635_s1, [#allocation14]  }
  0x9c   : > { %s2066_s21 = sadd.s32 4294967294, %s2798_s5   ;;  %s52_s20 = sadd.s32 1, %s2790_s4 }
  0x9d   : > { %s55_s18 = sadd.s32 1, %s2794_s30  ;;  %p53_p8 = scmp.ge.s32.totalorder %s52_s20, 2 }
  0x9e   : > { %s229_s10 = sadd.s32 1, %s2778_s28  ;;  %p236_p7 = scmp.ne.s32.totalorder %s2778_s28, %s2774_s3 }
  0x9f   : > { %p237_p9 = scmp.eq.s32.totalorder %s2798_s5, 0  ;;  %s3640_s20 = smov (%p53_p8, %s52_s20), 0 }
  0xa0   : > { %3573 = sst [smem:[#allocation31_spill]] %s3640_s20  ;;  %s3642_s18 = smov (!%p53_p8, %s55_s18), %s2794_s30 }
  0xa1   : > { %s226_s1 = ssub.s32 %s2790_s4, %s3640_s20  ;;  %p3102_p6 = por %p237_p9, %p236_p7 }
  0xa2   : > { %p57_p2 = scmp.ge.s32.totalorder %s3642_s18, 2  ;;  %p227_p1 = scmp.eq.s32.totalorder %s226_s1, 0 }
  0xa3   : > { %p242_p4 = scmp.ne.s32.totalorder %s2774_s3, %s2770_s27  ;;  %s550_s6 = sadd.s32 1, %s2766_s26 }
  0xa4   : > { %s3644_s18 = smov (%p57_p2, %s3642_s18), 0  ;;  %p3577_p10 = scmp.eq.s32.totalorder %s2981_s22, 0 }
  0xa5   : > { %3575 = sst [smem:[#allocation32_spill]] %s3644_s18  ;;  %s545_s8 = ssub.s32 %s2794_s30, %s3644_s18 }
  0xa6   : > { %s3112_s17 = scalar_select %p227_p1, %s2778_s28, %s229_s10  }
  0xa7   : > { %p3116_p11 = por %p3577_p10, %p242_p4  ;;  %s547_s24 = sor.u32 %s545_s8, %s226_s1 }
  0xa8   : > { %3576 = sst [smem:[#allocation33_spill]] %s3112_s17  ;;  %p560_p12 = scmp.ne.s32.totalorder %s2766_s26, %s2762_s25 }
  0xa9   : > { %p548_p13 = scmp.eq.s32.totalorder %s547_s24, 0  ;;  %p566_p0 = scmp.ne.s32.totalorder %s2762_s25, %s2758_s2 }
  0xaa   : > { %p3579_p3 = scmp.eq.s32.totalorder %s2981_s22, 3  ;;  %p567_p8 = scmp.eq.s32.totalorder %s2066_s21, 3 }
  0xab   : > { %s3133_s19 = scalar_select %p548_p13, %s2766_s26, %s550_s6  }
  0xac   : > { %p3128_p5 = por %p3579_p3, %p560_p12  ;;  %p3135_p7 = por %p567_p8, %p566_p0 }
  0xad   : > { %3581 = sst [smem:[#allocation34_spill]] %s3133_s19  ;;  %p2352_p9 = scmp.lt.s32.totalorder %s2798_s5, 4 }
  0xae   : > { %s3580_s27 = scalar_select %p3128_p5, 1, 0 }
  0xaf   : > { %s3582_s16 = scalar_select %p3135_p7, 1, 0 }
  0xb0   : > { %s3141_s9 = sand.u32 1, %s2778_s28   ;;  %s2073_s11 = sshll.u32 %s2790_s4, 4 }
  0xb1   : > { %3583 = sst [smem:[#allocation35_spill]] %s3582_s16  ;;  %s3584_s7 = sld [smem:[#allocation43_spill]] }
  0xb2   : > { %s689_s21 = scalar_lea.vmem [#allocation4], %s3141_s9  ;;  %p3154_p2 = pnand %p2352_p9, %p3102_p6 }
  0xb3   : > { %s696_s6 = sshll.u32 %s689_s21, 4  ;;  %s2074_s29 = sshll.u32 %s3141_s9, 4  ;;  %s3150_s6 = int_to_ptr.vmem [resolvable:$true] %s696_s6 }
  0xb4   : > { %s687_s10 = scalar_lea.sflag [#allocation5], %s3141_s9  ;;  %p2602_p4 = pneg %p3154_p2 }
  0xb7   : > { %s3147_s8 = scalar_lea.hbm %s3584_s7, %s2073_s11  ;;  %s2605_s23 = scalar_lea.hbm %s3584_s7, 32 }
  0xb8   : > { %s2600_s11 = scalar_lea.hbm %s3147_s8, 16  ;;  %p2606_p6 = scmp.lt.u32.totalorder %s3147_s8, %s3584_s7 }
  0xb9   : > { %p2601_p1 = scmp.ne.s32.totalorder %s3147_s8, %s2600_s11  ;;  %p2607_p13 = scmp.lt.u32.totalorder %s2605_s23, %s2600_s11 }
  0xba   : > { %p2609_p3 = scmp.lt.u32.totalorder %s2600_s11, %s3147_s8 }
  0xbb   : > { %p2603_p10 = pnand %p2602_p4, %p2601_p1  ;;  %p2608_p0 = por %p2607_p13, %p2606_p6 }
  0xbd   : > { %p2604_p12 = pneg %p2603_p10  ;;  %p2610_p8 = por %p2609_p3, %p2608_p0 }
  0xbf   : > { %p2611_p9 = pnand %p2610_p8, %p2604_p12 }
  0xc1   : > { %2614 = shalt.err (!%p2611_p9)
}
  0xc2   : > { %s2615_s0 = scalar_lea.vmem %s3150_s6, 16  ;;  %s2806_s1 = smov [#allocation4]  }
  0xc3   : > { %p2616_p1 = scmp.ne.s32.totalorder %s3150_s6, %s2615_s0  ;;  %s2620_s21 = sshll.u32 %s2806_s1, 4  ;;  %s2621_s21 = int_to_ptr.vmem [resolvable:$false] %s2620_s21 }
  0xc4   : > { %s2622_s12 = scalar_lea.vmem %s2621_s21, 32  ;;  %p2623_p5 = scmp.lt.s32.totalorder %s3150_s6, %s2621_s21 }
  0xc5   : > { %p2618_p10 = pnand %p2616_p1, %p2602_p4  ;;  %p2624_p6 = scmp.lt.s32.totalorder %s2622_s12, %s2615_s0 }
  0xc7   : > { %p2619_p7 = pneg %p2618_p10  ;;  %p2625_p13 = por %p2624_p6, %p2623_p5 }
  0xc9   : > { %p2626_p0 = pnand %p2625_p13, %p2619_p7 }
  0xcb   : > { %2629 = shalt.err (!%p2626_p0)
}
  0xcc   : > { %2340 = dma.hbm_to_vmem [thread:$0]  (!%p3154_p2), %s3147_s8, 16, %s3150_s6, %s687_s10  }
  0xcd   : > { %s721_s13 = scalar_lea.vmem [#allocation7], %s2074_s29  ;;  %s717_s23 = sand.u32 1, %s2798_s5  }
  0xce   : > { %s728_s11 = sshll.u32 %s721_s13, 4  ;;  %s3586_s1 = sshll.u32 %s2790_s4, 8  ;;  %s3189_s11 = int_to_ptr.vmem [resolvable:$true] %s728_s11 }
  0xcf   : > { %s3587_s12 = sld [smem:[#allocation46_spill]]  ;;  %s3198_s15 = scalar_lea.sflag [#allocation8], %s717_s23 }
  0xd5   : > { %s3196_s7 = scalar_lea.hbm %s3587_s12, %s3586_s1  ;;  %s2635_s8 = scalar_lea.hbm %s3587_s12, 512 }
  0xd6   : > { %s2630_s18 = scalar_lea.hbm %s3196_s7, 256  ;;  %p2636_p3 = scmp.lt.u32.totalorder %s3196_s7, %s3587_s12 }
  0xd7   : > { %p2631_p5 = scmp.ne.s32.totalorder %s3196_s7, %s2630_s18  ;;  %p2637_p8 = scmp.lt.u32.totalorder %s2635_s8, %s2630_s18 }
  0xd8   : > { %p2639_p1 = scmp.lt.u32.totalorder %s2630_s18, %s3196_s7 }
  0xd9   : > { %p2633_p7 = pnand %p2631_p5, %p2602_p4  ;;  %p2638_p9 = por %p2637_p8, %p2636_p3 }
  0xdb   : > { %p2634_p12 = pneg %p2633_p7  ;;  %p2640_p10 = por %p2639_p1, %p2638_p9 }
  0xdd   : > { %p2641_p6 = pnand %p2640_p10, %p2634_p12 }
  0xdf   : > { %2644 = shalt.err (!%p2641_p6)
}
  0xe0   : > { %s2645_s13 = scalar_lea.vmem %s3189_s11, 256  ;;  %s2807_s23 = smov [#allocation7]  }
  0xe1   : > { %p2646_p13 = scmp.ne.s32.totalorder %s3189_s11, %s2645_s13  ;;  %s2650_s1 = sshll.u32 %s2807_s23, 4  ;;  %s2651_s1 = int_to_ptr.vmem [resolvable:$false] %s2650_s1 }
  0xe2   : > { %s2652_s0 = scalar_lea.vmem %s2651_s1, 512  ;;  %p2653_p7 = scmp.lt.s32.totalorder %s3189_s11, %s2651_s1 }
  0xe3   : > { %p2648_p0 = pnand %p2646_p13, %p2602_p4  ;;  %p2654_p3 = scmp.lt.s32.totalorder %s2652_s0, %s2645_s13 }
  0xe5   : > { %p2649_p5 = pneg %p2648_p0  ;;  %p2655_p8 = por %p2654_p3, %p2653_p7 }
  0xe7   : > { %p2656_p9 = pnand %p2655_p8, %p2649_p5 }
  0xe9   : > { %2659 = shalt.err (!%p2656_p9)
}
  0xea   : > { %s3588_s18 = smov 4   ;;  %s3589_s21 = smov 64  }
  0xeb   : > { %2343 = dma.hbm_to_vmem [thread:$0]  (!%p3154_p2), %s3196_s7, 256, %s3189_s11, %s3198_s15, %s3589_s21, %s3589_s21, %s3588_s18  }
  0xec   : > { %s3590_s29 = sld [smem:[#allocation30_spill]] }
  0xf2   : > { %p3591_p4 = scmp.ne.s32.totalorder %s3590_s29, 0 }
  0xf3   : > { %s3230_s9 = sand.u32 (!%p3591_p4), 1, %s2774_s3  }
  0xf4   : > { %740 = sbr.rel (%p3591_p4) target bundleno = 2815 (0xaff), region = 100  ;;  %s743_s8 = scalar_lea.sflag (!%p3591_p4), [#allocation5], %s3230_s9 }
  0xfb   : > { %2733 = dma.done.wait (%p3116_p11), %s743_s8, 16  }
  0xfc   : > { %2735 = vsyncadd (%p3116_p11), %s743_s8, 4294967280  ;;  %s750_s7 = sand.u32 1, %s2981_s22   ;;  %s2078_s15 = sshll.u32 %s3230_s9, 4 }
  0xfd   : > { %s751_s24 = scalar_lea.sflag [#allocation8], %s750_s7  ;;  %s3240_s11 = scalar_lea.vmem [#allocation7], %s2078_s15 }
  0xfe   : > { %2737 = dma.done.wait (%p3116_p11), %s751_s24, 256  }
  0xff   : > { %2739 = vsyncadd (%p3116_p11), %s751_s24, 4294967040  ;;  %p3592_p2 = scmp.eq.s32.totalorder %s2981_s22, 0 }
 0x101   : > { %2741 = dma.done.wait (%p3592_p2), [#allocation8], 16   ;;  %p3593_p12 = pmov %p3592_p2 }
 0x102   : > { %p3594_p1 = pmov %p3592_p2 }
 0x103   : > { %2743 = vsyncadd (%p3593_p12), [#allocation8], 4294967280 }
 0x104   : > { %2745 = dma.done.wait (%p3594_p1), [#allocation11], 272   ;;  %p3595_p10 = pmov %p3594_p1 }
 0x105   : > { %p3596_p6 = pmov %p3594_p1 }
 0x106   : > { %2747 = vsyncadd (%p3595_p10), [#allocation11], 4294967024 }
 0x107   : > { %2749 = dma.done.wait (%p3596_p6), [#allocation14], 16   ;;  %p3597_p13 = pmov %p3594_p1 }
 0x108   : > { %s3598_s14 = sld [smem:[#allocation27_spill]]  ;;  %s3599_s10 = sld [smem:[#allocation26_spill]] }
 0x109   : > { %2751 = vsyncadd (%p3597_p13), [#allocation14], 4294967280  ;;  %s3525_s13 = sand.u32 1, %s2762_s25   ;;  %s3600_s29 = sld [smem:[#allocation36_spill]] }
 0x10a   : > { %s3262_s23 = sshll.u32 %s3525_s13, 3  ;;  %s3602_s4 = sld [smem:[#allocation40_spill]] }
 0x10b   : > { %s3603_s19 = sld [smem:[#allocation42_spill]]  ;;  %s3604_s18 = sld [smem:[#allocation44_spill]] }
 0x10c   : > { %s3605_s15 = sld [smem:[#allocation45_spill]]  ;;  %s3606_s2 = sld [smem:[#allocation56_spill]] }
 0x10e   : > { %p862_p11 = scmp.lt.s32.totalorder %s3598_s14, 1  ;;  %p866_p0 = scmp.lt.s32.totalorder %s3599_s10, 1 }
 0x10f   : > { %p2090_p5 = scmp.ne.s32.totalorder %s3599_s10, 0 }
 0x110   : > { %s3646_s14 = smov (!%p862_p11, %s3598_s14), 1  ;;  %s3607_s20 = sld [smem:[#allocation37_spill]] (!%p2090_p5)  ;;  %vm910_vm0 = vcmask (!%p2090_p5), 1041408   ;;  %v2808_v2 = vmov (!%p2090_p5), 0.0   ;;  %vm2809_vm1 = vmmov (!%p2090_p5), 0   ;;  %vm906_vm2 = vcmask (!%p2090_p5), 31744  }
 0x111   : > { %s3267_s1 = scalar_select %p866_p0, %s3599_s10, 1 }
 0x112   : > { %s2084_s22 = sshll.u32 %s3646_s14, 3  ;;  %s2089_s0 = sshll.u32 %s3646_s14, 2  ;;  %2199 = vmatprep.subr.bf16.mxu0 (!%p2090_p5), %v2808_v2  ;;  %2201 = vmatprep.mubr.msk.bf16.mxu0 (!%p2090_p5), %vm2809_vm1, %v2808_v2  ;;  %vm956_vm3 = vcmask (!%p2090_p5), 261120   ;;  %v2093_v10 = vld [vmem:[#allocation9] ss:$0 sm:$0xff] (!%p2090_p5) }
 0x113   : > { %s865_s8 = scalar_lea.vmem %s3600_s29, %s2084_s22  ;;  %s2301_s7 = smul.u32 48, %s3267_s1 }
 0x114   : > { %s2160_s12 = sshll.u32 %s3267_s1, 4  ;;  %s886_s13 = scalar_lea.vmem %s3605_s15, %s3267_s1  ;;  %v896_v1 = vld [vmem:[%s865_s8] sm:$0xff] (!%p2090_p5) }
 0x115   : > { %s3281_s17 = scalar_lea.vmem %s3602_s4, %s2301_s7  ;;  %s3286_s26 = scalar_lea.vmem %s3603_s19, %s2301_s7  ;;  %v898_v4 = vpack.c.bf16 (!%p2090_p5), %v896_v1, %v896_v1 }
 0x116   : > { %s3291_s22 = scalar_lea.vmem %s3604_s18, %s2160_s12  ;;  %s3300_s30 = scalar_lea.vmem %s3606_s2, %s2089_s0  ;;  %v897_v0 = vld [vmem:[%s3607_s20] sm:$0x3] (!%p2090_p5) }
 0x117   : > { %s861_s4 = scalar_lea.vmem [#allocation15], %s3262_s23  ;;  %895 = sbr.rel (%p2090_p5) target bundleno = 502 (0x1f6), region = 128  ;;  %v912_v3 = vsel (!%p2090_p5), %vm910_vm0, %v897_v0, 0 }
 0x118   : > { %2200 = vmatpush3.bf16.msra.mxu0 (!%p2090_p5), %v912_v3  ;;  %s3608_s16 = sld [smem:[#allocation38_spill]] (!%p2090_p5)  ;;  %s3609_s10 = sld [smem:[#allocation39_spill]] (!%p2090_p5) }
 0x11b   : > { %2202 = vmatmul.mubr.msk.bf16.vlgmr.msra.gmra.mrb[0].mxu0 (!%p2090_p5), %vm906_vm2, %v898_v4 }
 0x11e   : > { %v2091_v5 = vld [vmem:[%s3608_s16] ss:$0 sm:$0xff] }
 0x11f   : > { %v954_v7 = vld [vmem:[%s3609_s10] sm:$0xff] }
 0x1ee   : > { %v948_v6 = vpop.f32.mrb[0].mxu0 }
 0x1ef   : > { %v949_v8 = vadd.f32 %v2091_v5, %v948_v6  ;;  %v2203_v9 = vpop.f32.mrb[1].mxu0 }
 0x1f0   : > { %v951_v11 = vpop.f32.mrb[2].mxu0 }
 0x1f1   : > { %v955_v12 = vadd.f32 %v954_v7, %v949_v8  ;;  %v2204_v13 = vpop.f32.mrb[3].mxu0 }
 0x1f3   : > { %957 = vst.msk [vmem:[#allocation2] sm:$0xff] %vm956_vm3, %v955_v12  ;;  %v965_v14 = vadd.f32 %v2093_v10, %v955_v12 }
 0x1f5   : > { %966 = vst.msk [vmem:[#allocation3] sm:$0xff] %vm956_vm3, %v965_v14 }
 0x1f6 PF: > { %v2458_v15 = vld [vmem:[%s3281_s17 + $0x10] sm:$0xff]   ;;  %v2810_v16 = vmov 0.0   ;;  %v2459_v17 = vld [vmem:[%s3281_s17] sm:$0xff]   ;;  %v2460_v18 = vld [vmem:[%s3281_s17 + $0x18] sm:$0xff]   ;;  %vm2811_vm4 = vmmov 0   ;;  %vm984_vm5 = vcmask 1040384   ;;  %v1460_v9 = vlaneseq }
 0x1f7   : > { %2205 = vmatprep.subr.bf16.mxu0 %v2810_v16  ;;  %2213 = vmatprep.subr.bf16.mxu1 %v2810_v16  ;;  %v2461_v19 = vld [vmem:[%s3281_s17 + $0x8] sm:$0xff]   ;;  %vm971_vm6 = vcmask 1041408   ;;  %vm1004_vm7 = vcmask 261120   ;;  %v2462_v25 = vld [vmem:[%s3286_s26 + $0x10] sm:$0xff]   ;;  %v2463_v26 = vld [vmem:[%s3286_s26] sm:$0xff]   ;;  %s3611_s8 = sld [smem:[#allocation41_spill]] }
 0x1f8   : > { %2206 = vmatpush3.bf16.msra.mxu0 %v2458_v15  ;;  %2209 = vmatprep.mubr.msk.bf16.mxu0 %vm2811_vm4, %v2810_v16  ;;  %v2464_v29 = vld [vmem:[%s3286_s26 + $0x18] sm:$0xff]   ;;  %v2465_v30 = vld [vmem:[%s3286_s26 + $0x8] sm:$0xff]   ;;  %v2466_v31 = vld [vmem:[%s3281_s17 + $0x20] sm:$0xff]   ;;  %v1461_v10 = vshrl.u32 %v1460_v9, 7  ;;  %v1463_v11 = vand.u32 127, %v1460_v9  ;;  %vm1466_vm9 = vcmask 64512  }
 0x1f9   : > { %2214 = vmatpush3.bf16.msra.mxu1 %v2459_v17  ;;  %2207 = vmatprep.subr.bf16.mxu0 %v2810_v16  ;;  %v2467_v32 = vld [vmem:[%s3286_s26 + $0x20] sm:$0xff]   ;;  %v2468_v33 = vld [vmem:[%s3281_s17 + $0x28] sm:$0xff]   ;;  %vm1485_vm10 = vcmask 1043456  }
 0x1fa   : > { %2215 = vmatprep.subr.bf16.mxu1 %v2810_v16  ;;  %2217 = vmatprep.mubr.msk.bf16.mxu1 %vm2811_vm4, %v2810_v16  ;;  %v967_v20 = vld [vmem:[#allocation2] sm:$0xff]  ;;  %v2469_v34 = vld [vmem:[%s3286_s26 + $0x28] sm:$0xff]   ;;  %s3610_s26 = scalar_lea.vmem [#allocation4], %s3230_s9  ;;  %vm1464_vm8 = vcmp.ge.s32.totalorder %v1461_v10, %v1463_v11 }
 0x1fb   : > { %v982_v21 = vrot.slane %v967_v20, 7  ;;  %v969_v22 = vrot.slane %v967_v20, 6  ;;  %v1217_v35 = vpack.c.bf16 %v967_v20, %v967_v20  ;;  %v2129_v56 = vld [vmem:[%s3610_s26] ss:$0 sm:$0xff]  ;;  %v2471_v8 = vld [vmem:[%s3291_s22 + $0x8] sm:$0xff]  }
 0x1fc   : > { %2208 = vmatpush3.bf16.msra.mxu0 %v2460_v18  ;;  %v2470_v7 = vld [vmem:[%s3291_s22] sm:$0xff]  }
 0x1fd   : > { %2216 = vmatpush3.bf16.msra.mxu1 %v2461_v19  ;;  %v985_v23 = vsel %vm984_vm5, 0.0, %v982_v21  ;;  %v972_v24 = vsel %vm971_vm6, 0.0, %v969_v22  ;;  %2221 = vmatprep.subr.bf16.mxu0 %v2810_v16  ;;  %s3612_s7 = scalar_lea.vmem %s3611_s8, %s3267_s1  ;;  %v2130_v20 = vld [vmem:[%s886_s13] ss:$0 sm:$0xff]  ;;  %s3614_s1 = sld [smem:[#allocation26_spill]] }
 0x1fe   : > { %v991_v27 = vpack.c.bf16 %v985_v23, %v985_v23  ;;  %v977_v28 = vpack.c.bf16 %v972_v24, %v972_v24  ;;  %2229 = vmatprep.subr.bf16.mxu1 %v2810_v16  ;;  %v2128_v3 = vld [vmem:[%s3612_s7] ss:$0 sm:$0xff] }
 0x200   : > { %2210 = vmatmul.mubr.msk.bf16.vlgmr.msra.gmra.mrb[0].mxu0 %vm1004_vm7, %v991_v27  ;;  %2218 = vmatmul.mubr.msk.bf16.vlgmr.msra.gmra.mrb[0].mxu1 %vm1004_vm7, %v977_v28 }
 0x201   : > { %2222 = vmatpush3.bf16.msra.mxu0 %v2462_v25  ;;  %2230 = vmatpush3.bf16.msra.mxu1 %v2463_v26 }
 0x202   : > { %2223 = vmatprep.subr.bf16.mxu0 %v2810_v16  ;;  %2231 = vmatprep.subr.bf16.mxu1 %v2810_v16 }
 0x203   : > { %2225 = vmatprep.mubr.msk.bf16.mxu0 %vm2811_vm4, %v2810_v16  ;;  %2233 = vmatprep.mubr.msk.bf16.mxu1 %vm2811_vm4, %v2810_v16  ;;  %p2139_p7 = scmp.ne.s32.totalorder %s3614_s1, 1 }
 0x204   : > { %vm2813_vm11 = vmmov (!%p2139_p7), 0   ;;  %s3615_s21 = sld [smem:[#allocation50_spill]] (!%p2139_p7)  ;;  %s3616_s3 = sld [smem:[#allocation52_spill]] (!%p2139_p7)  ;;  %v2142_v9 = vld [vmem:[#allocation12] ss:$0 sm:$0xff] (!%p2139_p7)  ;;  %vm1734_vm12 = vcmask (!%p2139_p7), 523264  }
 0x205   : > { %2224 = vmatpush3.bf16.msra.mxu0 %v2464_v29  ;;  %2232 = vmatpush3.bf16.msra.mxu1 %v2465_v30  ;;  %s3617_s2 = sld [smem:[#allocation53_spill]] (!%p2139_p7)  ;;  %s3618_s17 = sld [smem:[#allocation54_spill]] (!%p2139_p7)  ;;  %vm1809_vm13 = vcmask (!%p2139_p7), 257024  }
 0x206   : > { %2237 = vmatprep.subr.bf16.mxu0 %v2810_v16  ;;  %2245 = vmatprep.subr.bf16.mxu1 %v2810_v16  ;;  %s3619_s7 = sld [smem:[#allocation55_spill]] (!%p2139_p7) }
 0x208   : > { %2226 = vmatmul.mubr.msk.bf16.vlgmr.msra.gmra.mrb[4].mxu0 %vm1004_vm7, %v991_v27  ;;  %2234 = vmatmul.mubr.msk.bf16.vlgmr.msra.gmra.mrb[4].mxu1 %vm1004_vm7, %v977_v28 }
 0x209   : > { %2238 = vmatpush3.bf16.msra.mxu0 %v2466_v31  ;;  %2246 = vmatpush3.bf16.msra.mxu1 %v2467_v32 }
 0x20a   : > { %2239 = vmatprep.subr.bf16.mxu0 %v2810_v16  ;;  %2247 = vmatprep.subr.bf16.mxu1 %v2810_v16 }
 0x20b   : > { %2241 = vmatprep.mubr.msk.bf16.mxu0 %vm2811_vm4, %v2810_v16  ;;  %2249 = vmatprep.mubr.msk.bf16.mxu1 %vm2811_vm4, %v2810_v16 }
 0x20d   : > { %2240 = vmatpush3.bf16.msra.mxu0 %v2468_v33  ;;  %2248 = vmatpush3.bf16.msra.mxu1 %v2469_v34  ;;  %v2472_v33 = vld [vmem:[%s3240_s11] sm:$0xff]  }
 0x20e   : > { %2261 = vmatprep.subr.bf16.mxu1 %v2810_v16  ;;  %2253 = vmatprep.subr.bf16.mxu0 %v2810_v16 }
 0x210   : > { %2242 = vmatmul.mubr.msk.bf16.vlgmr.msra.gmra.mrb[8].mxu0 %vm1004_vm7, %v1217_v35  ;;  %2250 = vmatmul.mubr.msk.bf16.vlgmr.msra.gmra.mrb[8].mxu1 %vm1004_vm7, %v1217_v35 }
 0x211   : > { %2263 = vmatprep.mubr.msk.bf16.mxu1 %vm2811_vm4, %v2810_v16  ;;  %2257 = vmatprep.mubr.msk.bf16.mxu0 %vm2811_vm4, %v2810_v16 }
 0x212   : > { %2254 = vmatpush3.bf16.msra.mxu0 %v2470_v7  ;;  %v2482_v7 = vld [vmem:[%s3615_s21 + $0x10] sm:$0xff] (!%p2139_p7)  }
 0x213   : > { %2255 = vmatprep.subr.bf16.mxu0 %v2810_v16 }
 0x216   : > { %2256 = vmatpush3.bf16.msra.mxu0 %v2471_v8  ;;  %v2483_v8 = vld [vmem:[%s3615_s21 + $0x18] sm:$0xff] (!%p2139_p7)  }
 0x217   : > { %2267 = vmatprep.subr.bf16.mxu0 %v2810_v16 }
 0x219   : > { %2258 = vmatmul.mubr.msk.bf16.vlgmr.msra.gmra.mrb[12].mxu0 %vm1004_vm7, %v1217_v35 }
 0x21a   : > { %2269 = vmatprep.mubr.msk.bf16.mxu0 %vm2811_vm4, %v2810_v16 }
 0x2d3   : > { %v1042_v36 = vpop.f32.mrb[0].mxu0  ;;  %v1097_v37 = vpop.f32.mrb[0].mxu1 }
 0x2d4   : > { %v1098_v38 = vadd.f32 %v1097_v37, %v1042_v36  ;;  %v2219_v39 = vpop.f32.mrb[1].mxu1  ;;  %v2211_v40 = vpop.f32.mrb[1].mxu0 }
 0x2d5   : > { %v1100_v41 = vpop.f32.mrb[2].mxu1  ;;  %v1045_v42 = vpop.f32.mrb[2].mxu0 }
 0x2d6   : > { %v2220_v43 = vpop.f32.mrb[3].mxu1  ;;  %v2212_v44 = vpop.f32.mrb[3].mxu0 }
 0x2db   : > { %v1154_v45 = vpop.f32.mrb[4].mxu0  ;;  %v1206_v46 = vpop.f32.mrb[4].mxu1 }
 0x2dc   : > { %v1207_v47 = vadd.f32 %v1206_v46, %v1154_v45  ;;  %v2235_v48 = vpop.f32.mrb[5].mxu1  ;;  %v2227_v49 = vpop.f32.mrb[5].mxu0 }
 0x2dd   : > { %v1209_v50 = vpop.f32.mrb[6].mxu1  ;;  %v1157_v51 = vpop.f32.mrb[6].mxu0 }
 0x2de   : > { %v2236_v52 = vpop.f32.mrb[7].mxu1  ;;  %v2228_v53 = vpop.f32.mrb[7].mxu0 }
 0x2e3   : > { %v1267_v54 = vpop.f32.mrb[8].mxu0  ;;  %v1325_v55 = vpop.f32.mrb[8].mxu1 }
 0x2e4   : > { %v1273_v57 = vadd.f32 %v1267_v54, %v1098_v38  ;;  %v1331_v58 = vadd.f32 %v1325_v55, %v1207_v47  ;;  %v2251_v59 = vpop.f32.mrb[9].mxu1  ;;  %v2243_v60 = vpop.f32.mrb[9].mxu0  ;;  %v2473_v38 = vld [vmem:[%s3240_s11 + $0x8] sm:$0xff]  }
 0x2e5   : > { %v1328_v61 = vpop.f32.mrb[10].mxu1  ;;  %v1270_v62 = vpop.f32.mrb[10].mxu0  ;;  %v2480_v59 = vld [vmem:[%s3615_s21] sm:$0xff] (!%p2139_p7)   ;;  %v2481_v60 = vld [vmem:[%s3615_s21 + $0x8] sm:$0xff] (!%p2139_p7)  }
 0x2e6   : > { %v1347_v63 = vadd.f32 %v2129_v56, %v1331_v58  ;;  %v2252_v0 = vpop.f32.mrb[11].mxu1  ;;  %v2244_v1 = vpop.f32.mrb[11].mxu0  ;;  %v1339_v5 = vadd.f32 %v2128_v3, %v1273_v57  ;;  %v2478_v56 = vld [vmem:[#allocation10] sm:$0xff] (!%p2139_p7)   ;;  %v2812_v57 = vmov (!%p2139_p7), 0.0   ;;  %v2479_v58 = vld [vmem:[#allocation10 + $0x8] sm:$0xff] (!%p2139_p7)  }
 0x2e7   : > { %v2140_v1 = vld [vmem:[%s3616_s3] ss:$0 sm:$0xff] (!%p2139_p7) }
 0x2e8   : > { %v1412_v2 = vpack.c.bf16 %v1347_v63, %v1347_v63  ;;  %v1411_v6 = vpack.c.bf16 %v1339_v5, %v1339_v5  ;;  %v2141_v3 = vld [vmem:[%s3617_s2] ss:$0 sm:$0xff] (!%p2139_p7) }
 0x2ea   : > { %v1417_v4 = vsel %vm1004_vm7, %v1412_v2, 0 }
 0x2eb   : > { %2262 = vmatpush3.bf16.xpose.msra.mxu1 %v1417_v4 }
 0x2ec   : > { %2273 = vmatprep.subr.bf16.mxu1 %v2810_v16  ;;  %v1405_v21 = vpop.f32.mrb[12].mxu0 }
 0x2ed   : > { %v1406_v22 = vadd.f32 %v2130_v20, %v1405_v21  ;;  %v2259_v23 = vpop.f32.mrb[13].mxu0 }
 0x2ee   : > { %v1408_v24 = vpop.f32.mrb[14].mxu0 }
 0x2ef   : > { %v1481_v25 = vpack.c.bf16 %v1406_v22, %v1406_v22  ;;  %v2260_v26 = vpop.f32.mrb[15].mxu0 }
 0x2f1   : > { %v1487_v27 = vsel %vm1485_vm10, %v1481_v25, 0 }
 0x2f2   : > { %2264 = vmatmul.mubr.msk.bf16.vlgmr.msra.gmra.mrb[12].mxu1 %vm1004_vm7, %v1411_v6  ;;  %2268 = vmatpush3.bf16.msra.mxu0 %v1487_v27 }
 0x2f3   : > { %2277 = vmatprep.mubr.msk.bf16.mxu1 %vm2811_vm4, %v2810_v16  ;;  %2274 = vmatpush3.bf16.msra.mxu1 %v2472_v33 }
 0x2f4   : > { %2275 = vmatprep.subr.bf16.mxu1 %v2810_v16  ;;  %v1479_v16 = vld [vmem:[#allocation3] sm:$0xff]  ;;  %2281 = vmatprep.subr.bf16.mxu0 (!%p2139_p7), %v2812_v57 }
 0x2f7   : > { %2276 = vmatpush3.bf16.msra.mxu1 %v2473_v38 }
 0x2f8   : > { %2289 = vmatprep.subr.bf16.mxu1 (!%p2139_p7), %v2812_v57 }
 0x3c5   : > { %v1453_v12 = vpop.f32.mrb[12].mxu1 }
 0x3c6   : > { %v1459_v13 = vmul.f32 0.17677669, %v1453_v12  ;;  %v2265_v14 = vpop.f32.mrb[13].mxu1 }
 0x3c7   : > { %v1456_v15 = vpop.f32.mrb[14].mxu1 }
 0x3c8   : > { %v2266_v17 = vpop.f32.mrb[15].mxu1  ;;  %v1465_v18 = vsel %vm1464_vm8, %v1459_v13, -1e+09 }
 0x3c9   : > { %v1467_v19 = vsel %vm1466_vm9, %v1465_v18, -inf }
 0x3ca   : > { %1468 = vmax.xlane.f32.xlu0 %v1467_v19 }
 0x457   : > { %v1469_v28 = vpop.xlane.xlu0 %1468 }
 0x458   : > { %v1470_v29 = vsub.f32 %v1465_v18, %v1469_v28  ;;  %v2146_v18 = vld [vmem:[#allocation13] ss:$0 sm:$0xff] (!%p2139_p7) }
 0x45a   : > { %v1471_v30 = vmul.f32 1.442695, %v1470_v29 }
 0x45c   : > { %2474 = vpow2.f32 %v1471_v30 }
 0x466   : > { %v2475_v31 = vpop.eup %2474 }
 0x467   : > { %v1473_v32 = vsel %vm1466_vm9, %v2475_v31, 0.0 }
 0x468   : > { %1474 = vadd.xlane.f32.xlu0 %v1473_v32 }
 0x4f5   : > { %v1475_v34 = vpop.xlane.xlu0 %1474 }
 0x4f6   : > { %2476 = vrcp.f32 %v1475_v34 }
 0x500   : > { %v2477_v35 = vpop.eup %2476 }
 0x501   : > { %v1477_v36 = vmul.f32 %v2477_v35, %v2475_v31  ;;  %v2152_v35 = vld [vmem:[%s3618_s17] ss:$0 sm:$0xff] (!%p2139_p7) }
 0x503   : > { %1478 = vst.msk [vmem:[%s861_s4] sm:$0xff] %vm1466_vm9, %v1477_v36  ;;  %v1480_v37 = vpack.c.bf16 %v1477_v36, %v1477_v36 }
 0x505   : > { %2270 = vmatmul.mubr.msk.bf16.vlgmr.msra.gmra.mrb[16].mxu0 %vm1466_vm9, %v1480_v37  ;;  %v2153_v37 = vld [vmem:[%s3619_s7] ss:$0 sm:$0xff] (!%p2139_p7) }
 0x506   : > { %2285 = vmatprep.mubr.msk.bf16.mxu0 (!%p2139_p7), %vm2813_vm11, %v2812_v57  ;;  %2282 = vmatpush3.bf16.msra.mxu0 (!%p2139_p7), %v2478_v56 }
 0x507   : > { %2283 = vmatprep.subr.bf16.mxu0 (!%p2139_p7), %v2812_v57 }
 0x50a   : > { %2284 = vmatpush3.bf16.msra.mxu0 (!%p2139_p7), %v2479_v58 }
 0x5d8   : > { %v1523_v39 = vpop.f32.mrb[16].mxu0 }
 0x5d9   : > { %v1533_v40 = vpack.c.bf16 %v1523_v39, %v1523_v39  ;;  %v2271_v41 = vpop.f32.mrb[17].mxu0 }
 0x5da   : > { %v1526_v42 = vpop.f32.mrb[18].mxu0 }
 0x5db   : > { %v2272_v43 = vpop.f32.mrb[19].mxu0  ;;  %2278 = vmatmul.mubr.msk.bf16.vlgmr.msra.gmra.mrb[16].mxu1 %vm1004_vm7, %v1533_v40 }
 0x5dc   : > { %2297 = vmatprep.mubr.msk.bf16.mxu1 (!%p2139_p7), %vm2813_vm11, %v2812_v57  ;;  %2290 = vmatpush3.bf16.msra.mxu1 (!%p2139_p7), %v2480_v59 }
 0x5dd   : > { %2291 = vmatprep.subr.bf16.mxu1 (!%p2139_p7), %v2812_v57 }
 0x5e0   : > { %2292 = vmatpush3.bf16.msra.mxu1 (!%p2139_p7), %v2481_v60 }
 0x5e1   : > { %2293 = vmatprep.subr.bf16.mxu1 (!%p2139_p7), %v2812_v57 }
 0x5e4   : > { %2294 = vmatpush3.bf16.msra.mxu1 (!%p2139_p7), %v2482_v7 }
 0x5e5   : > { %2295 = vmatprep.subr.bf16.mxu1 (!%p2139_p7), %v2812_v57 }
 0x5e8   : > { %2296 = vmatpush3.bf16.msra.mxu1 (!%p2139_p7), %v2483_v8 }
 0x6ab   : > { %1594 = sbr.rel (%p2139_p7) target bundleno = 2786 (0xae2), region = 132 }
 0x6ae   : > { %v1583_v44 = vpop.f32.mrb[16].mxu1 }
 0x6af   : > { %v1589_v45 = vadd.f32 %v1583_v44, %v1479_v16  ;;  %v2279_v46 = vpop.f32.mrb[17].mxu1 }
 0x6b0   : > { %v1586_v47 = vpop.f32.mrb[18].mxu1 }
 0x6b1   : > { %1590 = vst.msk [vmem:[#allocation3] sm:$0xff] %vm1004_vm7, %v1589_v45  ;;  %v2280_v48 = vpop.f32.mrb[19].mxu1 }
 0x6b8   : > { %v1595_v49 = vld [vmem:[#allocation3] sm:$0xff] }
 0x6b9   : > { %v1598_v50 = vsel %vm1004_vm7, %v1595_v49, 0.0 }
 0x6ba   : > { %1599 = vadd.xlane.f32.xlu0 %v1598_v50 }
 0x747   : > { %v1600_v51 = vpop.xlane.xlu0 %1599 }
 0x748   : > { %v1602_v52 = vmul.f32 0.03125, %v1600_v51 }
 0x74a   : > { %v1603_v53 = vsub.f32 %v1595_v49, %v1602_v52 }
 0x74c   : > { %v1604_v54 = vmul.f32 %v1603_v53, %v1603_v53 }
 0x74e   : > { %v1605_v55 = vsel %vm1004_vm7, %v1604_v54, 0.0 }
 0x74f   : > { %1606 = vadd.xlane.f32.xlu0 %v1605_v55 }
 0x7dc   : > { %v1607_v61 = vpop.xlane.xlu0 %1606 }
 0x7dd   : > { %v1608_v62 = vmul.f32 0.03125, %v1607_v61 }
 0x7df   : > { %v1609_v63 = vadd.f32 1e-05, %v1608_v62 }
 0x7e1   : > { %2484 = vrsqrt.f32 %v1609_v63 }
 0x7eb   : > { %v2485_v0 = vpop.eup %2484 }
 0x7ec   : > { %v1611_v2 = vmul.f32 %v2485_v0, %v1603_v53 }
 0x7ee   : > { %v1618_v4 = vmul.f32 %v2140_v1, %v1611_v2 }
 0x7f0   : > { %v1625_v5 = vadd.f32 %v2141_v3, %v1618_v4 }
 0x7f2   : > { %v1630_v6 = vpack.c.bf16 %v1625_v5, %v1625_v5 }
 0x7f4   : > { %2286 = vmatmul.mubr.msk.bf16.vlgmr.msra.gmra.mrb[0].mxu0 %vm1004_vm7, %v1630_v6 }
 0x8c7   : > { %v1687_v10 = vpop.f32.mrb[0].mxu0 }
 0x8c8   : > { %v1688_v11 = vadd.f32 %v2142_v9, %v1687_v10  ;;  %v2287_v12 = vpop.f32.mrb[1].mxu0 }
 0x8c9   : > { %v1690_v13 = vpop.f32.mrb[2].mxu0 }
 0x8ca   : > { %v1693_v14 = vmax.f32 %v1688_v11, 0.0  ;;  %v2288_v15 = vpop.f32.mrb[3].mxu0 }
 0x8cc   : > { %v1702_v17 = vpack.c.bf16 %v1693_v14, %v1693_v14 }
 0x8ce   : > { %2298 = vmatmul.mubr.msk.bf16.vlgmr.msra.gmra.mrb[0].mxu1 %vm1734_vm12, %v1702_v17 }
 0x9a1   : > { %v1772_v19 = vpop.f32.mrb[0].mxu1 }
 0x9a2   : > { %v1773_v20 = vadd.f32 %v2146_v18, %v1772_v19  ;;  %v2299_v21 = vpop.f32.mrb[1].mxu1 }
 0x9a3   : > { %v1775_v22 = vpop.f32.mrb[2].mxu1 }
 0x9a4   : > { %v2300_v23 = vpop.f32.mrb[3].mxu1  ;;  %v1778_v24 = vadd.f32 %v1773_v20, %v1625_v5 }
 0x9a6   : > { %v1781_v25 = vsel %vm1004_vm7, %v1778_v24, 0.0 }
 0x9a7   : > { %1782 = vadd.xlane.f32.xlu1 %v1781_v25 }
 0xa34   : > { %v1783_v26 = vpop.xlane.xlu1 %1782 }
 0xa35   : > { %v1784_v27 = vmul.f32 0.03125, %v1783_v26 }
 0xa37   : > { %v1785_v28 = vsub.f32 %v1778_v24, %v1784_v27 }
 0xa39   : > { %v1786_v29 = vmul.f32 %v1785_v28, %v1785_v28 }
 0xa3b   : > { %v1787_v30 = vsel %vm1004_vm7, %v1786_v29, 0.0 }
 0xa3c   : > { %1788 = vadd.xlane.f32.xlu1 %v1787_v30 }
 0xac9   : > { %v1789_v31 = vpop.xlane.xlu1 %1788 }
 0xaca   : > { %v1790_v32 = vmul.f32 0.03125, %v1789_v31 }
 0xacc   : > { %v1791_v33 = vadd.f32 1e-05, %v1790_v32 }
 0xace   : > { %2486 = vrsqrt.f32 %v1791_v33 }
 0xad8   : > { %v2487_v34 = vpop.eup %2486 }
 0xad9   : > { %v1793_v36 = vmul.f32 %v2487_v34, %v1785_v28 }
 0xadb   : > { %v1800_v38 = vmul.f32 %v2152_v35, %v1793_v36 }
 0xadd   : > { %v1807_v39 = vadd.f32 %v2153_v37, %v1800_v38 }
 0xadf   : > { %v1808_v40 = vpack.c.bf16 %v1807_v39, %v1807_v39 }
 0xae1   : > { %1810 = vst.msk [vmem:[%s3300_s30] sm:$0xf] %vm1809_vm13, %v1808_v40 }
 0xae2 PF: > { %s3620_s9 = sld [smem:[#allocation27_spill]]  ;;  %s3621_s14 = sld [smem:[#allocation26_spill]] }
 0xae3   : > { %s1834_s11 = sshll.u32 %s861_s4, 4  ;;  %s3622_s13 = sld [smem:[#allocation57_spill]]  ;;  %s3431_s11 = int_to_ptr.vmem [resolvable:$true] %s1834_s11 }
 0xae4   : > { %s3623_s24 = sand.u32 1, %s2762_s25   ;;  %s2660_s28 = scalar_lea.vmem %s3431_s11, 128 }
 0xae5   : > { %s1816_s3 = scalar_lea.sflag [#allocation6], %s3623_s24  ;;  %p2661_p3 = scmp.ne.s32.totalorder %s3431_s11, %s2660_s28 }
 0xae6   : > { %p3624_p8 = scmp.ne.s32.totalorder %s3580_s27, 0  ;;  %s2814_s20 = smov [#allocation15]  }
 0xae7   : > { %s2664_s23 = sshll.u32 %s2814_s20, 4  ;;  %s2665_s23 = int_to_ptr.vmem [resolvable:$false] %s2664_s23 }
 0xae8   : > { %s2155_s18 = sshll.u32 %s3620_s9, 1  ;;  %p2662_p9 = pnand %p2661_p3, %p3624_p8 }
 0xae9   : > { %s1830_s1 = sadd.s32 %s3621_s14, %s2155_s18  ;;  %s2666_s4 = scalar_lea.vmem %s2665_s23, 256 }
 0xaea   : > { %s2156_s22 = sshll.u32 %s1830_s1, 7  ;;  %p2663_p4 = pneg %p2662_p9 }
 0xaeb   : > { %s1832_s30 = scalar_lea.hbm %s3622_s13, %s2156_s22  ;;  %p2667_p2 = scmp.lt.s32.totalorder %s3431_s11, %s2665_s23 }
 0xaec   : > { %p2668_p12 = scmp.lt.s32.totalorder %s2666_s4, %s2660_s28 }
 0xaee   : > { %p2669_p1 = por %p2668_p12, %p2667_p2 }
 0xaf0   : > { %p2670_p10 = pnand %p2669_p1, %p2663_p4 }
 0xaf2   : > { %2673 = shalt.err (!%p2670_p10)
}
 0xaf3   : > { %s2674_s2 = scalar_lea.hbm %s1832_s30, 128  ;;  %s2678_s12 = scalar_lea.hbm %s3622_s13, 512 }
 0xaf4   : > { %p2675_p6 = scmp.ne.s32.totalorder %s1832_s30, %s2674_s2  ;;  %p2679_p0 = scmp.lt.u32.totalorder %s1832_s30, %s3622_s13 }
 0xaf5   : > { %p2680_p5 = scmp.lt.u32.totalorder %s2678_s12, %s2674_s2  ;;  %p2682_p3 = scmp.lt.u32.totalorder %s2674_s2, %s1832_s30 }
 0xaf6   : > { %p2676_p13 = pnand %p2675_p6, %p3624_p8 }
 0xaf7   : > { %p2681_p7 = por %p2680_p5, %p2679_p0 }
 0xaf8   : > { %p2677_p11 = pneg %p2676_p13 }
 0xaf9   : > { %p2683_p9 = por %p2682_p3, %p2681_p7 }
 0xafb   : > { %p2684_p4 = pnand %p2683_p9, %p2677_p11 }
 0xafd   : > { %2687 = shalt.err (!%p2684_p4)
}
 0xafe   : > { %2322 = dma.vmem_to_hbm [thread:$0]  (%p3624_p8), %s3431_s11, 128, %s1832_s30, %s1816_s3  }
 0xaff PF: > { %s3625_s26 = sld [smem:[#allocation22_spill]]  ;;  %s3626_s17 = sld [smem:[#allocation35_spill]] }
 0xb00   : > { %p2357_p2 = scmp.ge.s32.totalorder %s2798_s5, 2 }
 0xb05   : > { %s1853_s0 = sand.u32 1, %s3625_s26   ;;  %p3627_p12 = scmp.ne.s32.totalorder %s3626_s17, 0 }
 0xb06   : > { %s1854_s8 = scalar_lea.sflag [#allocation6], %s1853_s0 }
 0xb07   : > { %p2345_p1 = pnand %p2357_p2, %p3627_p12 }
 0xb09   : > { %2753 = dma.done.wait (!%p2345_p1), %s1854_s8, 128  }
 0xb0a   : > { %2755 = vsyncadd (!%p2345_p1), %s1854_s8, 4294967168  ;;  %s43_s5 = sadd.s32 1, %s2798_s5   ;;  %s3628_s7 = sld [smem:[#allocation23_spill]] }
 0xb0b   : > { %p40_p10 = scmp.ge.s32.totalorder %s43_s5, 6   ;;  %s3629_s26 = sld [smem:[#allocation34_spill]] }
 0xb0c   : > { %s3630_s27 = sld [smem:[#allocation24_spill]]  ;;  %s3631_s3 = sld [smem:[#allocation25_spill]] }
 0xb0d   : > { %s3632_s28 = sld [smem:[#allocation33_spill]]  ;;  %s3633_s29 = sld [smem:[#allocation28_spill]] }
 0xb0e   : > { %s3634_s0 = sld [smem:[#allocation29_spill]]  ;;  %s3635_s4 = sld [smem:[#allocation31_spill]] }
 0xb0f   : > { %s3636_s30 = sld [smem:[#allocation32_spill]]  ;;  %s3637_s2 = smov %s2762_s25 }
 0xb10   : > { %s3638_s25 = smov %s3628_s7  ;;  %42 = sbr.rel (!%p40_p10) target bundleno = 36 (0x24), region = 216 }
 0xb17   :  { %1859 = vsyncpa [#allocation5], 1 }
 0xb18   :  { %1861 = vsyncpa [#allocation5 + $0x1], 1 }
 0xb19   :  { %1862 = vsyncpa [#allocation8], 1 }
 0xb1a   :  { %1864 = vsyncpa [#allocation8 + $0x1], 1 }
 0xb1b   :  { %1865 = vsyncpa [#allocation11], 1 }
 0xb1c   :  { %1866 = vsyncpa [#allocation14], 1 }
 0xb1d   :  { %1867 = vsyncpa [#allocation6], 1 }
 0xb1e   :  { %1869 = vsyncpa [#allocation6 + $0x1], 1 }

</bundles_post_ra>
